<compile_context>
chip_gen: v7x
topology: tpu7x:2x2x1
jax: 0.10.0
libtpu: 0.0.40
codegen_flags: <defaults>
</compile_context>

<pallas_src>
import functools

import jax
import jax.numpy as jnp
from jax.experimental import pallas as pl
from jax.experimental.pallas import tpu as pltpu

IN_FEATURES = 28 * 28   # 784
HIDDEN = 512
OUT_FEATURES = 10
OUT_PAD = 128           # lane-dense output, sliced back to 10 in the wrapper


def _device_kind():
    try:
        return jax.devices()[0].device_kind.lower()
    except Exception:
        return ""


_KIND = _device_kind()
_IS_V5E = any(s in _KIND for s in ("v5 lite", "v5e", "v5litepod"))
# v5e has no native bf16 VPU -> keep the bias/ReLU epilogue in f32 there.
_EPI_DTYPE = jnp.float32 if _IS_V5E else jnp.bfloat16
_MAX_TB = 256 if _IS_V5E else 512


def _pick_tb(batch):
    """Batch-tile rows: large enough to amortize the ~0.35us/step pipeline
    overhead, split roughly in half for small batches (keeps both v7x
    TensorCores busy), never below the 8-row sublane granule."""
    b8 = ((batch + 7) // 8) * 8
    if b8 <= 16:
        return b8
    if b8 <= 2 * _MAX_TB:
        return min(_MAX_TB, ((b8 + 15) // 16) * 8)   # ~half the batch
    return _MAX_TB


def mlp_kernel(x_ref, w1_ref, b1_ref, w2_ref, b2_ref, w3_ref, b3_ref, o_ref,
               *, epi_dtype):
    # Layer 1: cast the input tile to bf16 on the fly (no wrapper pad/cast
    # pass); K=784 (not a 128 multiple) is masked by Mosaic; f32 MXU acc.
    x = x_ref[...].astype(jnp.bfloat16)
    h = jnp.dot(x, w1_ref[...], preferred_element_type=jnp.float32)
    h = jnp.maximum(h.astype(epi_dtype) + b1_ref[...], 0).astype(jnp.bfloat16)
    # Layer 2.
    h = jnp.dot(h, w2_ref[...], preferred_element_type=jnp.float32)
    h = jnp.maximum(h.astype(epi_dtype) + b2_ref[...], 0).astype(jnp.bfloat16)
    # Layer 3: output lanes padded 10 -> 128; bias add in f32, store bf16.
    o = jnp.dot(h, w3_ref[...], preferred_element_type=jnp.float32)
    o_ref[...] = (o + b3_ref[...]).astype(o_ref.dtype)


def _forward_call(x2d, w1q, b1q, w2q, b2q, w3q, b3q, *, tb, bp,
                  single_buffer_weights):
    grid = (bp // tb,)
    res_kwargs = {}
    if single_buffer_weights and hasattr(pl, "Buffered"):
        # Constant index_map -> never re-fetched; the default second buffer
        # would be dead VMEM.
        res_kwargs = {"pipeline_mode": pl.Buffered(1)}

    batch_tiled = lambda shape: pl.BlockSpec(shape, lambda i: (i, 0))
    resident = lambda shape: pl.BlockSpec(shape, lambda i: (0, 0), **res_kwargs)

    return pl.pallas_call(
        functools.partial(mlp_kernel, epi_dtype=_EPI_DTYPE),
        out_shape=jax.ShapeDtypeStruct((bp, OUT_PAD), jnp.bfloat16),
        grid=grid,
        in_specs=[
            batch_tiled((tb, IN_FEATURES)),
            resident((IN_FEATURES, HIDDEN)),
            resident((1, HIDDEN)),
            resident((HIDDEN, HIDDEN)),
            resident((1, HIDDEN)),
            resident((HIDDEN, OUT_PAD)),
            resident((1, OUT_PAD)),
        ],
        out_specs=batch_tiled((tb, OUT_PAD)),
        compiler_params=pltpu.CompilerParams(
            dimension_semantics=("parallel",),
            vmem_limit_bytes=32 << 20,
        ),
    )(x2d, w1q, b1q, w2q, b2q, w3q, b3q)


def neural_network_forward(x_nchw, params):
    """x_nchw: (B, 1, 28, 28). Returns logits (B, 10) float32."""
    w1, b1, w2, b2, w3, b3 = params
    B = x_nchw.shape[0]

    # nn.Flatten. Keep the producer's dtype (f32 or bf16); the kernel casts to
    # bf16 on the fly, avoiding an extra full-HBM pad/cast pass over x.
    x2d = x_nchw.reshape(B, IN_FEATURES)
    if x2d.dtype not in (jnp.float32, jnp.bfloat16):
        x2d = x2d.astype(jnp.float32)

    tb = _pick_tb(B)
    bp = pl.cdiv(B, tb) * tb
    if bp != B:
        x2d = jnp.pad(x2d, ((0, bp - B), (0, 0)))

    # bf16 weights (f32 MXU accumulation in-kernel); biases in the epilogue
    # dtype; final layer padded to the 128-lane output.
    w1q = w1.astype(jnp.bfloat16)
    w2q = w2.astype(jnp.bfloat16)
    w3q = jnp.zeros((HIDDEN, OUT_PAD), jnp.bfloat16).at[:, :OUT_FEATURES].set(
        w3.astype(jnp.bfloat16))
    b1q = b1.reshape(1, HIDDEN).astype(_EPI_DTYPE)
    b2q = b2.reshape(1, HIDDEN).astype(_EPI_DTYPE)
    b3q = jnp.zeros((1, OUT_PAD), jnp.float32).at[:, :OUT_FEATURES].set(
        b3.reshape(1, OUT_FEATURES).astype(jnp.float32))

    call = functools.partial(_forward_call, x2d, w1q, b1q, w2q, b2q, w3q, b3q,
                             tb=tb, bp=bp)
    try:
        out = call(single_buffer_weights=True)
    except Exception:
        # Fallback for jax versions without BlockSpec(pipeline_mode=...).
        out = call(single_buffer_weights=False)

    return out[:B, :OUT_FEATURES].astype(jnp.float32)


def init_params(key):
    """Deterministic params matching nn.Linear shapes (stored as (in, out))."""
    k1, k2, k3, k4, k5, k6 = jax.random.split(key, 6)

    def uniform(k, shape, fan_in):
        bound = 1.0 / jnp.sqrt(fan_in)
        return jax.random.uniform(
            k, shape, dtype=jnp.float32, minval=-bound, maxval=bound
        )

    w1 = uniform(k1, (IN_FEATURES, HIDDEN), float(IN_FEATURES))
    b1 = uniform(k2, (1, HIDDEN), float(IN_FEATURES))
    w2 = uniform(k3, (HIDDEN, HIDDEN), float(HIDDEN))
    b2 = uniform(k4, (1, HIDDEN), float(HIDDEN))
    w3 = uniform(k5, (HIDDEN, OUT_FEATURES), float(HIDDEN))
    b3 = uniform(k6, (1, OUT_FEATURES), float(HIDDEN))
    return (w1, b1, w2, b2, w3, b3)


if __name__ == "__main__":
    key = jax.random.PRNGKey(0)
    k_params, k_x = jax.random.split(key)
    params = init_params(k_params)

    B = 8
    x = jax.random.normal(k_x, (B, 1, 28, 28), dtype=jnp.float32)

    logits = neural_network_forward(x, params)
    jax.block_until_ready(logits)
    assert logits.shape == (B, OUT_FEATURES)
    assert logits.dtype == jnp.float32

    # Pure-JAX reference mimicking the kernel's dtype path (bf16 weights and
    # activations, f32 accumulation, bf16 output) so the only difference left
    # is MXU accumulation order.
    w1, b1, w2, b2, w3, b3 = params
    q = lambda a: a.astype(jnp.bfloat16).astype(jnp.float32)
    epi = _EPI_DTYPE
    h = q(x.reshape(B, IN_FEATURES)) @ q(w1)
    h = jnp.maximum(h.astype(epi) + b1.astype(epi), 0).astype(jnp.float32)
    h = q(h) @ q(w2)
    h = jnp.maximum(h.astype(epi) + b2.astype(epi), 0).astype(jnp.float32)
    ref = q(h) @ q(w3) + b3
    ref = ref.astype(jnp.bfloat16).astype(jnp.float32)

    err = float(jnp.max(jnp.abs(logits - ref)))
    assert jnp.allclose(logits, ref, atol=2e-2, rtol=2e-2), err

    print("KERNEL_OK")
</pallas_src>

<mosaic_0001>
module attributes {stable_mosaic.version = 11 : i64} {
  func.func @mlp_kernel(%arg0: i32, %arg1: memref<8x784xf32, #tpu.memory_space<vmem>>, %arg2: memref<784x512xbf16, #tpu.memory_space<vmem>>, %arg3: memref<1x512xbf16, #tpu.memory_space<vmem>>, %arg4: memref<512x512xbf16, #tpu.memory_space<vmem>>, %arg5: memref<1x512xbf16, #tpu.memory_space<vmem>>, %arg6: memref<512x128xbf16, #tpu.memory_space<vmem>>, %arg7: memref<1x128xf32, #tpu.memory_space<vmem>>, %arg8: memref<8x128xbf16, #tpu.memory_space<vmem>>) attributes {dimension_semantics = [#tpu.dimension_semantics<parallel>], iteration_bounds = array<i64: 1>, scalar_prefetch = 0 : i64, scratch_operands = 0 : i64, tpu.core_type = #tpu.core_type<tc>, window_params = [{transform_indices = @transform_0, window_bounds = array<i64: 8, 784>}, {pipeline_mode = #tpu.pipeline_mode<synchronous>, transform_indices = @transform_1, window_bounds = array<i64: 784, 512>}, {pipeline_mode = #tpu.pipeline_mode<synchronous>, transform_indices = @transform_2, window_bounds = array<i64: 1, 512>}, {pipeline_mode = #tpu.pipeline_mode<synchronous>, transform_indices = @transform_3, window_bounds = array<i64: 512, 512>}, {pipeline_mode = #tpu.pipeline_mode<synchronous>, transform_indices = @transform_4, window_bounds = array<i64: 1, 512>}, {pipeline_mode = #tpu.pipeline_mode<synchronous>, transform_indices = @transform_5, window_bounds = array<i64: 512, 128>}, {pipeline_mode = #tpu.pipeline_mode<synchronous>, transform_indices = @transform_6, window_bounds = array<i64: 1, 128>}, {transform_indices = @transform_7, window_bounds = array<i64: 8, 128>}]} {
    %c0 = arith.constant 0 : index
    %c0_0 = arith.constant 0 : index
    %0 = vector.load %arg1[%c0, %c0_0] : memref<8x784xf32, #tpu.memory_space<vmem>>, vector<8x784xf32>
    %1 = arith.truncf %0 : vector<8x784xf32> to vector<8x784xbf16>
    %c0_1 = arith.constant 0 : index
    %c0_2 = arith.constant 0 : index
    %2 = vector.load %arg2[%c0_1, %c0_2] : memref<784x512xbf16, #tpu.memory_space<vmem>>, vector<784x512xbf16>
    %cst = arith.constant dense<0.000000e+00> : vector<8x512xf32>
    %3 = tpu.matmul %1, %2, %cst {dimension_numbers = #tpu.dot_dimension_numbers<[1], [0], [0], [1], [0, 0, 1, 1], [], []>} : vector<8x784xbf16>, vector<784x512xbf16>, vector<8x512xf32> -> vector<8x512xf32>
    %4 = arith.truncf %3 : vector<8x512xf32> to vector<8x512xbf16>
    %c0_3 = arith.constant 0 : index
    %c0_4 = arith.constant 0 : index
    %5 = vector.load %arg3[%c0_3, %c0_4] : memref<1x512xbf16, #tpu.memory_space<vmem>>, vector<1x512xbf16>
    %6 = vector.broadcast %5 : vector<1x512xbf16> to vector<8x512xbf16>
    %7 = arith.addf %4, %6 : vector<8x512xbf16>
    %cst_5 = arith.constant 0.000000e+00 : bf16
    %8 = vector.broadcast %cst_5 : bf16 to vector<8x512xbf16>
    %9 = arith.maximumf %7, %8 : vector<8x512xbf16>
    %c0_6 = arith.constant 0 : index
    %c0_7 = arith.constant 0 : index
    %10 = vector.load %arg4[%c0_6, %c0_7] : memref<512x512xbf16, #tpu.memory_space<vmem>>, vector<512x512xbf16>
    %cst_8 = arith.constant dense<0.000000e+00> : vector<8x512xf32>
    %11 = tpu.matmul %9, %10, %cst_8 {dimension_numbers = #tpu.dot_dimension_numbers<[1], [0], [0], [1], [0, 0, 1, 1], [], []>} : vector<8x512xbf16>, vector<512x512xbf16>, vector<8x512xf32> -> vector<8x512xf32>
    %12 = arith.truncf %11 : vector<8x512xf32> to vector<8x512xbf16>
    %c0_9 = arith.constant 0 : index
    %c0_10 = arith.constant 0 : index
    %13 = vector.load %arg5[%c0_9, %c0_10] : memref<1x512xbf16, #tpu.memory_space<vmem>>, vector<1x512xbf16>
    %14 = vector.broadcast %13 : vector<1x512xbf16> to vector<8x512xbf16>
    %15 = arith.addf %12, %14 : vector<8x512xbf16>
    %cst_11 = arith.constant 0.000000e+00 : bf16
    %16 = vector.broadcast %cst_11 : bf16 to vector<8x512xbf16>
    %17 = arith.maximumf %15, %16 : vector<8x512xbf16>
    %c0_12 = arith.constant 0 : index
    %c0_13 = arith.constant 0 : index
    %18 = vector.load %arg6[%c0_12, %c0_13] : memref<512x128xbf16, #tpu.memory_space<vmem>>, vector<512x128xbf16>
    %cst_14 = arith.constant dense<0.000000e+00> : vector<8x128xf32>
    %19 = tpu.matmul %17, %18, %cst_14 {dimension_numbers = #tpu.dot_dimension_numbers<[1], [0], [0], [1], [0, 0, 1, 1], [], []>} : vector<8x512xbf16>, vector<512x128xbf16>, vector<8x128xf32> -> vector<8x128xf32>
    %c0_15 = arith.constant 0 : index
    %c0_16 = arith.constant 0 : index
    %20 = vector.load %arg7[%c0_15, %c0_16] : memref<1x128xf32, #tpu.memory_space<vmem>>, vector<1x128xf32>
    %21 = vector.broadcast %20 : vector<1x128xf32> to vector<8x128xf32>
    %22 = arith.addf %19, %21 : vector<8x128xf32>
    %23 = arith.truncf %22 : vector<8x128xf32> to vector<8x128xbf16>
    %c0_17 = arith.constant 0 : index
    %c0_18 = arith.constant 0 : index
    %24 = vector.load %arg8[%c0_17, %c0_18] : memref<8x128xbf16, #tpu.memory_space<vmem>>, vector<8x128xbf16>
    tpu.vector_store %arg8[%c0_17, %c0_18], %23 {strides = array<i32>} : memref<8x128xbf16, #tpu.memory_space<vmem>>, vector<8x128xbf16>,
    return
  }
  func.func @transform_0(%arg0: i32) -> (i32, i32) {
    %c0_i32 = arith.constant 0 : i32
    %c0_i32_0 = arith.constant 0 : i32
    return %arg0, %c0_i32 : i32, i32
  }
  func.func @transform_1(%arg0: i32) -> (i32, i32) {
    %c0_i32 = arith.constant 0 : i32
    %c0_i32_0 = arith.constant 0 : i32
    %c0_i32_1 = arith.constant 0 : i32
    return %c0_i32, %c0_i32_0 : i32, i32
  }
  func.func @transform_2(%arg0: i32) -> (i32, i32) {
    %c0_i32 = arith.constant 0 : i32
    %c0_i32_0 = arith.constant 0 : i32
    %c0_i32_1 = arith.constant 0 : i32
    return %c0_i32, %c0_i32_0 : i32, i32
  }
  func.func @transform_3(%arg0: i32) -> (i32, i32) {
    %c0_i32 = arith.constant 0 : i32
    %c0_i32_0 = arith.constant 0 : i32
    %c0_i32_1 = arith.constant 0 : i32
    return %c0_i32, %c0_i32_0 : i32, i32
  }
  func.func @transform_4(%arg0: i32) -> (i32, i32) {
    %c0_i32 = arith.constant 0 : i32
    %c0_i32_0 = arith.constant 0 : i32
    %c0_i32_1 = arith.constant 0 : i32
    return %c0_i32, %c0_i32_0 : i32, i32
  }
  func.func @transform_5(%arg0: i32) -> (i32, i32) {
    %c0_i32 = arith.constant 0 : i32
    %c0_i32_0 = arith.constant 0 : i32
    %c0_i32_1 = arith.constant 0 : i32
    return %c0_i32, %c0_i32_0 : i32, i32
  }
  func.func @transform_6(%arg0: i32) -> (i32, i32) {
    %c0_i32 = arith.constant 0 : i32
    %c0_i32_0 = arith.constant 0 : i32
    %c0_i32_1 = arith.constant 0 : i32
    return %c0_i32, %c0_i32_0 : i32, i32
  }
  func.func @transform_7(%arg0: i32) -> (i32, i32) {
    %c0_i32 = arith.constant 0 : i32
    %c0_i32_0 = arith.constant 0 : i32
    return %arg0, %c0_i32 : i32, i32
  }
}

module attributes {stable_mosaic.version = 11 : i64} {
  func.func @mlp_kernel(%arg0: i32, %arg1: memref<8x784xf32, #tpu.memory_space<vmem>>, %arg2: memref<784x512xbf16, #tpu.memory_space<vmem>>, %arg3: memref<1x512xbf16, #tpu.memory_space<vmem>>, %arg4: memref<512x512xbf16, #tpu.memory_space<vmem>>, %arg5: memref<1x512xbf16, #tpu.memory_space<vmem>>, %arg6: memref<512x128xbf16, #tpu.memory_space<vmem>>, %arg7: memref<1x128xf32, #tpu.memory_space<vmem>>, %arg8: memref<8x128xbf16, #tpu.memory_space<vmem>>) attributes {dimension_semantics = [#tpu.dimension_semantics<parallel>], iteration_bounds = array<i64: 1>, scalar_prefetch = 0 : i64, scratch_operands = 0 : i64, tpu.core_type = #tpu.core_type<tc>, window_params = [{transform_indices = @transform_0, window_bounds = array<i64: 8, 784>}, {pipeline_mode = #tpu.pipeline_mode<synchronous>, transform_indices = @transform_1, window_bounds = array<i64: 784, 512>}, {pipeline_mode = #tpu.pipeline_mode<synchronous>, transform_indices = @transform_2, window_bounds = array<i64: 1, 512>}, {pipeline_mode = #tpu.pipeline_mode<synchronous>, transform_indices = @transform_3, window_bounds = array<i64: 512, 512>}, {pipeline_mode = #tpu.pipeline_mode<synchronous>, transform_indices = @transform_4, window_bounds = array<i64: 1, 512>}, {pipeline_mode = #tpu.pipeline_mode<synchronous>, transform_indices = @transform_5, window_bounds = array<i64: 512, 128>}, {pipeline_mode = #tpu.pipeline_mode<synchronous>, transform_indices = @transform_6, window_bounds = array<i64: 1, 128>}, {transform_indices = @transform_7, window_bounds = array<i64: 8, 128>}]} {
    %c0 = arith.constant 0 : index
    %c0_0 = arith.constant 0 : index
    %0 = vector.load %arg1[%c0, %c0_0] : memref<8x784xf32, #tpu.memory_space<vmem>>, vector<8x784xf32>
    %1 = arith.truncf %0 : vector<8x784xf32> to vector<8x784xbf16>
    %c0_1 = arith.constant 0 : index
    %c0_2 = arith.constant 0 : index
    %2 = vector.load %arg2[%c0_1, %c0_2] : memref<784x512xbf16, #tpu.memory_space<vmem>>, vector<784x512xbf16>
    %cst = arith.constant dense<0.000000e+00> : vector<8x512xf32>
    %3 = tpu.matmul %1, %2, %cst {dimension_numbers = #tpu.dot_dimension_numbers<[1], [0], [0], [1], [0, 0, 1, 1], [], []>} : vector<8x784xbf16>, vector<784x512xbf16>, vector<8x512xf32> -> vector<8x512xf32>
    %4 = arith.truncf %3 : vector<8x512xf32> to vector<8x512xbf16>
    %c0_3 = arith.constant 0 : index
    %c0_4 = arith.constant 0 : index
    %5 = vector.load %arg3[%c0_3, %c0_4] : memref<1x512xbf16, #tpu.memory_space<vmem>>, vector<1x512xbf16>
    %6 = vector.broadcast %5 : vector<1x512xbf16> to vector<8x512xbf16>
    %7 = arith.addf %4, %6 : vector<8x512xbf16>
    %cst_5 = arith.constant 0.000000e+00 : bf16
    %8 = vector.broadcast %cst_5 : bf16 to vector<8x512xbf16>
    %9 = arith.maximumf %7, %8 : vector<8x512xbf16>
    %c0_6 = arith.constant 0 : index
    %c0_7 = arith.constant 0 : index
    %10 = vector.load %arg4[%c0_6, %c0_7] : memref<512x512xbf16, #tpu.memory_space<vmem>>, vector<512x512xbf16>
    %cst_8 = arith.constant dense<0.000000e+00> : vector<8x512xf32>
    %11 = tpu.matmul %9, %10, %cst_8 {dimension_numbers = #tpu.dot_dimension_numbers<[1], [0], [0], [1], [0, 0, 1, 1], [], []>} : vector<8x512xbf16>, vector<512x512xbf16>, vector<8x512xf32> -> vector<8x512xf32>
    %12 = arith.truncf %11 : vector<8x512xf32> to vector<8x512xbf16>
    %c0_9 = arith.constant 0 : index
    %c0_10 = arith.constant 0 : index
    %13 = vector.load %arg5[%c0_9, %c0_10] : memref<1x512xbf16, #tpu.memory_space<vmem>>, vector<1x512xbf16>
    %14 = vector.broadcast %13 : vector<1x512xbf16> to vector<8x512xbf16>
    %15 = arith.addf %12, %14 : vector<8x512xbf16>
    %cst_11 = arith.constant 0.000000e+00 : bf16
    %16 = vector.broadcast %cst_11 : bf16 to vector<8x512xbf16>
    %17 = arith.maximumf %15, %16 : vector<8x512xbf16>
    %c0_12 = arith.constant 0 : index
    %c0_13 = arith.constant 0 : index
    %18 = vector.load %arg6[%c0_12, %c0_13] : memref<512x128xbf16, #tpu.memory_space<vmem>>, vector<512x128xbf16>
    %cst_14 = arith.constant dense<0.000000e+00> : vector<8x128xf32>
    %19 = tpu.matmul %17, %18, %cst_14 {dimension_numbers = #tpu.dot_dimension_numbers<[1], [0], [0], [1], [0, 0, 1, 1], [], []>} : vector<8x512xbf16>, vector<512x128xbf16>, vector<8x128xf32> -> vector<8x128xf32>
    %c0_15 = arith.constant 0 : index
    %c0_16 = arith.constant 0 : index
    %20 = vector.load %arg7[%c0_15, %c0_16] : memref<1x128xf32, #tpu.memory_space<vmem>>, vector<1x128xf32>
    %21 = vector.broadcast %20 : vector<1x128xf32> to vector<8x128xf32>
    %22 = arith.addf %19, %21 : vector<8x128xf32>
    %23 = arith.truncf %22 : vector<8x128xf32> to vector<8x128xbf16>
    %c0_17 = arith.constant 0 : index
    %c0_18 = arith.constant 0 : index
    %24 = vector.load %arg8[%c0_17, %c0_18] : memref<8x128xbf16, #tpu.memory_space<vmem>>, vector<8x128xbf16>
    tpu.vector_store %arg8[%c0_17, %c0_18], %23 {strides = array<i32>} : memref<8x128xbf16, #tpu.memory_space<vmem>>, vector<8x128xbf16>,
    return
  }
  func.func @transform_0(%arg0: i32) -> (i32, i32) {
    %c0_i32 = arith.constant 0 : i32
    %c0_i32_0 = arith.constant 0 : i32
    return %arg0, %c0_i32 : i32, i32
  }
  func.func @transform_1(%arg0: i32) -> (i32, i32) {
    %c0_i32 = arith.constant 0 : i32
    %c0_i32_0 = arith.constant 0 : i32
    %c0_i32_1 = arith.constant 0 : i32
    return %c0_i32, %c0_i32_0 : i32, i32
  }
  func.func @transform_2(%arg0: i32) -> (i32, i32) {
    %c0_i32 = arith.constant 0 : i32
    %c0_i32_0 = arith.constant 0 : i32
    %c0_i32_1 = arith.constant 0 : i32
    return %c0_i32, %c0_i32_0 : i32, i32
  }
  func.func @transform_3(%arg0: i32) -> (i32, i32) {
    %c0_i32 = arith.constant 0 : i32
    %c0_i32_0 = arith.constant 0 : i32
    %c0_i32_1 = arith.constant 0 : i32
    return %c0_i32, %c0_i32_0 : i32, i32
  }
  func.func @transform_4(%arg0: i32) -> (i32, i32) {
    %c0_i32 = arith.constant 0 : i32
    %c0_i32_0 = arith.constant 0 : i32
    %c0_i32_1 = arith.constant 0 : i32
    return %c0_i32, %c0_i32_0 : i32, i32
  }
  func.func @transform_5(%arg0: i32) -> (i32, i32) {
    %c0_i32 = arith.constant 0 : i32
    %c0_i32_0 = arith.constant 0 : i32
    %c0_i32_1 = arith.constant 0 : i32
    return %c0_i32, %c0_i32_0 : i32, i32
  }
  func.func @transform_6(%arg0: i32) -> (i32, i32) {
    %c0_i32 = arith.constant 0 : i32
    %c0_i32_0 = arith.constant 0 : i32
    %c0_i32_1 = arith.constant 0 : i32
    return %c0_i32, %c0_i32_0 : i32, i32
  }
  func.func @transform_7(%arg0: i32) -> (i32, i32) {
    %c0_i32 = arith.constant 0 : i32
    %c0_i32_0 = arith.constant 0 : i32
    return %arg0, %c0_i32 : i32, i32
  }
}

</mosaic_0001>

<bundles_post_ra>
// kernel: tpu_custom_call.1
= control target key start
LH: loop header
LB: loop body
LE: loop exit
PB: predicated region body
PF: predicated region fallthrough
CT: control target
= control target key end

     0   :  { %12 = vsyncpa [#allocation3], 0  ;;  %s4275_s0 = inlined_call_operand.hbm [shape: f32[8,784], index: 0, kind: input, shape index: {}]   ;;  %s4276_s1 = inlined_call_operand.hbm [shape: bf16[784,512], index: 1, kind: input, shape index: {}]   ;;  %s4277_s2 = inlined_call_operand.vmem [shape: bf16[1,512], index: 2, kind: input, shape index: {}]   ;;  %s4278_s3 = inlined_call_operand.hbm [shape: bf16[512,512], index: 3, kind: input, shape index: {}]   ;;  %s4279_s4 = inlined_call_operand.vmem [shape: bf16[1,512], index: 4, kind: input, shape index: {}]   ;;  %s4280_s5 = inlined_call_operand.hbm [shape: bf16[512,128], index: 5, kind: input, shape index: {}]   ;;  %s4281_s6 = inlined_call_operand.vmem [shape: f32[1,128], index: 6, kind: input, shape index: {}]   ;;  %s4282_s7 = inlined_call_operand.hbm [shape: bf16[8,128], index: 7, kind: output, shape index: {}]  }
   0x1   :  { %13 = vsyncpa [#allocation6], 0 }
   0x2   :  { %14 = vsyncpa [#allocation9], 0 }
   0x3   :  { %15 = vsyncpa [#allocation4], 0  ;;  %s4113_s24 = smov [#allocation5]   ;;  %s3995_s28 = scalar_lea.hbm %s4276_s1, 25088 }
   0x4   :  { %s31_s25 = sshll.u32 %s4113_s24, 4  ;;  %p3996_p0 = scmp.ne.s32.totalorder %s4276_s1, %s3995_s28  ;;  %s32_s25 = int_to_ptr.vmem [resolvable:$true] %s31_s25 }
   0x5   :  { %p3999_p1 = scmp.lt.u32.totalorder %s3995_s28, %s4276_s1 }
   0x7   :  { %p4001_p2 = pnand %p3999_p1, %p3996_p0 }
   0x9   :  { %4004 = shalt.err (!%p4001_p2)
}
   0xa   :  { %s4005_s10 = scalar_lea.vmem %s32_s25, 25088  ;;  %p4010_p4 = scmp.lt.s32.totalorder %s32_s25, %s32_s25 }
   0xb   :  { %p4006_p3 = scmp.ne.s32.totalorder %s32_s25, %s4005_s10  ;;  %p4011_p5 = scmp.lt.s32.totalorder %s4005_s10, %s4005_s10 }
   0xd   :  { %p4012_p6 = por %p4011_p5, %p4010_p4 }
   0xf   :  { %p4013_p7 = pnand %p4012_p6, %p4006_p3 }
  0x11   :  { %4016 = shalt.err (!%p4013_p7)
}
  0x12   :  { %s4114_s11 = smov 256   ;;  %s4115_s12 = smov 16  }
  0x13   :  { %37 = dma.hbm_to_vmem [thread:$0]  %s4276_s1, 25088, %s32_s25, [#allocation6], %s4114_s11, %s4114_s11, %s4115_s12  }
  0x14   :  { %s4116_s15 = smov [#allocation2]   ;;  %s4117_s17 = smov [#allocation7]  }
  0x15   :  { %s22_s16 = sshll.u32 %s4116_s15, 4  ;;  %s45_s18 = sshll.u32 %s4117_s17, 4  ;;  %s23_s16 = int_to_ptr.vmem [resolvable:$true] %s22_s16  ;;  %s46_s18 = int_to_ptr.vmem [resolvable:$true] %s45_s18 }
  0x16   :  { %s4017_s21 = scalar_lea.hbm %s4275_s0, 896 }
  0x17   :  { %p4018_p8 = scmp.ne.s32.totalorder %s4275_s0, %s4017_s21  ;;  %p4021_p9 = scmp.lt.u32.totalorder %s4017_s21, %s4275_s0 }
  0x19   :  { %p4023_p10 = pnand %p4021_p9, %p4018_p8 }
  0x1b   :  { %4026 = shalt.err (!%p4023_p10)
}
  0x1c   :  { %s4027_s1 = scalar_lea.vmem %s23_s16, 896  ;;  %p4032_p12 = scmp.lt.s32.totalorder %s23_s16, %s23_s16 }
  0x1d   :  { %p4028_p11 = scmp.ne.s32.totalorder %s23_s16, %s4027_s1  ;;  %p4033_p13 = scmp.lt.s32.totalorder %s4027_s1, %s4027_s1 }
  0x1f   :  { %p4034_p0 = por %p4033_p13, %p4032_p12 }
  0x21   :  { %p4035_p1 = pnand %p4034_p0, %p4028_p11 }
  0x23   :  { %4038 = shalt.err (!%p4035_p1)
}
  0x24   :  { %25 = dma.hbm_to_vmem [thread:$0]  %s4275_s0, 896, %s23_s16, [#allocation3]  }
  0x25   :  { %s4039_s30 = scalar_lea.hbm %s4278_s3, 16384 }
  0x26   :  { %p4040_p2 = scmp.ne.s32.totalorder %s4278_s3, %s4039_s30  ;;  %p4043_p3 = scmp.lt.u32.totalorder %s4039_s30, %s4278_s3 }
  0x28   :  { %p4045_p4 = pnand %p4043_p3, %p4040_p2 }
  0x2a   :  { %4048 = shalt.err (!%p4045_p4)
}
  0x2b   :  { %s4049_s14 = scalar_lea.vmem %s46_s18, 16384  ;;  %p4054_p6 = scmp.lt.s32.totalorder %s46_s18, %s46_s18 }
  0x2c   :  { %p4050_p5 = scmp.ne.s32.totalorder %s46_s18, %s4049_s14  ;;  %p4055_p7 = scmp.lt.s32.totalorder %s4049_s14, %s4049_s14 }
  0x2e   :  { %p4056_p8 = por %p4055_p7, %p4054_p6 }
  0x30   :  { %p4057_p9 = pnand %p4056_p8, %p4050_p5 }
  0x32   :  { %4060 = shalt.err (!%p4057_p9)
}
  0x33   :  { %51 = dma.hbm_to_vmem [thread:$0]  %s4278_s3, 16384, %s46_s18, [#allocation6], %s4114_s11, %s4114_s11, %s4115_s12  }
  0x34   :  { %s4118_s16 = smov [#allocation8]   ;;  %s4061_s21 = scalar_lea.hbm %s4280_s5, 4096 }
  0x35   :  { %s59_s17 = sshll.u32 %s4118_s16, 4  ;;  %p4062_p10 = scmp.ne.s32.totalorder %s4280_s5, %s4061_s21  ;;  %s60_s17 = int_to_ptr.vmem [resolvable:$true] %s59_s17 }
  0x36   :  { %p4065_p11 = scmp.lt.u32.totalorder %s4061_s21, %s4280_s5 }
  0x38   :  { %p4067_p12 = pnand %p4065_p11, %p4062_p10 }
  0x3a   :  { %4070 = shalt.err (!%p4067_p12)
}
  0x3b   :  { %s4071_s1 = scalar_lea.vmem %s60_s17, 4096  ;;  %p4076_p0 = scmp.lt.s32.totalorder %s60_s17, %s60_s17 }
  0x3c   :  { %p4072_p13 = scmp.ne.s32.totalorder %s60_s17, %s4071_s1  ;;  %p4077_p1 = scmp.lt.s32.totalorder %s4071_s1, %s4071_s1 }
  0x3e   :  { %p4078_p2 = por %p4077_p1, %p4076_p0 }
  0x40   :  { %p4079_p3 = pnand %p4078_p2, %p4072_p13 }
  0x42   :  { %4082 = shalt.err (!%p4079_p3)
}
  0x43   :  { %s4119_s3 = smov 64   ;;  %s4120_s11 = smov 4  }
  0x44   :  { %65 = dma.hbm_to_vmem [thread:$0]  %s4280_s5, 4096, %s60_s17, [#allocation9], %s4119_s3, %s4119_s3, %s4120_s11  }
  0x45   :  { %4105 = dma.done.wait [#allocation3], 896  }
  0x46   :  { %4106 = vsyncadd [#allocation3], 4294966400 }
  0x47   :  { %4107 = dma.done.wait [#allocation6], 41472  }
  0x48   :  { %4108 = vsyncadd [#allocation6], 4294925824 }
  0x49   :  { %4109 = dma.done.wait [#allocation9], 4096  }
  0x4a   :  { %4110 = vsyncadd [#allocation9], 4294963200  ;;  %v3477_v0 = vld [vmem:[#allocation5 + $0x4] ss:$16 sps:$4 sm:$0xff]   ;;  %v3479_v1 = vld [vmem:[#allocation5 + $0xc] ss:$16 sps:$4 sm:$0xff]  }
  0x4b   :  { %1275 = vmatprep.subr.bf16.mxu0 %v3477_v0  ;;  %v3481_v2 = vld [vmem:[#allocation5] ss:$16 sps:$4 sm:$0xff]   ;;  %v3482_v3 = vld [vmem:[#allocation5 + $0x8] ss:$16 sps:$4 sm:$0xff]   ;;  %1439 = vmatprep.subr.bf16.mxu1 %v3479_v1  ;;  %v3483_v4 = vld [vmem:[#allocation5 + $0x24] ss:$16 sps:$4 sm:$0xff]  }
  0x4c   :  { %1276 = vmatpush1.bf16.msra.mxu0 %v3481_v2  ;;  %1440 = vmatpush1.bf16.msra.mxu1 %v3482_v3  ;;  %v3485_v5 = vld [vmem:[#allocation5 + $0x2c] ss:$16 sps:$4 sm:$0xff]   ;;  %v3487_v6 = vld [vmem:[#allocation5 + $0x20] ss:$16 sps:$4 sm:$0xff]   ;;  %v3488_v7 = vld [vmem:[#allocation5 + $0x28] ss:$16 sps:$4 sm:$0xff]  }
  0x4d   :  { %1277 = vmatprep.subr.bf16.mxu0 %v3483_v4  ;;  %1441 = vmatprep.subr.bf16.mxu1 %v3485_v5  ;;  %v3489_v8 = vld [vmem:[#allocation5 + $0x44] ss:$16 sps:$4 sm:$0xff]   ;;  %v3491_v9 = vld [vmem:[#allocation5 + $0x4c] ss:$16 sps:$4 sm:$0xff]   ;;  %v3493_v10 = vld [vmem:[#allocation5 + $0x40] ss:$16 sps:$4 sm:$0xff]  }
  0x4e   :  { %v3494_v11 = vld [vmem:[#allocation5 + $0x48] ss:$16 sps:$4 sm:$0xff]   ;;  %v3495_v12 = vld [vmem:[#allocation5 + $0x64] ss:$16 sps:$4 sm:$0xff]   ;;  %v3497_v13 = vld [vmem:[#allocation5 + $0x6c] ss:$16 sps:$4 sm:$0xff]  }
  0x4f   :  { %v3499_v14 = vld [vmem:[#allocation5 + $0x60] ss:$16 sps:$4 sm:$0xff]   ;;  %v3500_v15 = vld [vmem:[#allocation5 + $0x68] ss:$16 sps:$4 sm:$0xff]   ;;  %v3501_v16 = vld [vmem:[#allocation5 + $0x84] ss:$16 sps:$4 sm:$0xff]  }
  0x50   :  { %1278 = vmatpush1.bf16.msra.mxu0 %v3487_v6  ;;  %1442 = vmatpush1.bf16.msra.mxu1 %v3488_v7  ;;  %v3503_v17 = vld [vmem:[#allocation5 + $0x8c] ss:$16 sps:$4 sm:$0xff]   ;;  %v3505_v18 = vld [vmem:[#allocation5 + $0x80] ss:$16 sps:$4 sm:$0xff]   ;;  %v3506_v19 = vld [vmem:[#allocation5 + $0x88] ss:$16 sps:$4 sm:$0xff]  }
  0x51   :  { %1279 = vmatprep.subr.bf16.mxu0 %v3489_v8  ;;  %1443 = vmatprep.subr.bf16.mxu1 %v3491_v9  ;;  %v3507_v20 = vld [vmem:[#allocation5 + $0xa4] ss:$16 sps:$4 sm:$0xff]   ;;  %v3509_v21 = vld [vmem:[#allocation5 + $0xac] ss:$16 sps:$4 sm:$0xff]   ;;  %v3511_v22 = vld [vmem:[#allocation5 + $0xa0] ss:$16 sps:$4 sm:$0xff]  }
  0x52   :  { %v3512_v23 = vld [vmem:[#allocation5 + $0xa8] ss:$16 sps:$4 sm:$0xff]   ;;  %v3513_v24 = vld [vmem:[#allocation5 + $0xc4] ss:$16 sps:$4 sm:$0xff]   ;;  %v3515_v25 = vld [vmem:[#allocation5 + $0xcc] ss:$16 sps:$4 sm:$0xff]  }
  0x53   :  { %v3517_v26 = vld [vmem:[#allocation5 + $0xc0] ss:$16 sps:$4 sm:$0xff]   ;;  %v3518_v27 = vld [vmem:[#allocation5 + $0xc8] ss:$16 sps:$4 sm:$0xff]   ;;  %v3519_v28 = vld [vmem:[#allocation5 + $0xe4] ss:$16 sps:$4 sm:$0xff]  }
  0x54   :  { %1280 = vmatpush1.bf16.msra.mxu0 %v3493_v10  ;;  %1444 = vmatpush1.bf16.msra.mxu1 %v3494_v11  ;;  %v3521_v29 = vld [vmem:[#allocation5 + $0xec] ss:$16 sps:$4 sm:$0xff]   ;;  %v3523_v30 = vld [vmem:[#allocation5 + $0xe0] ss:$16 sps:$4 sm:$0xff]   ;;  %v3524_v31 = vld [vmem:[#allocation5 + $0xe8] ss:$16 sps:$4 sm:$0xff]  }
  0x55   :  { %1281 = vmatprep.subr.bf16.mxu0 %v3495_v12  ;;  %1445 = vmatprep.subr.bf16.mxu1 %v3497_v13  ;;  %v3525_v32 = vld [vmem:[#allocation5 + $0x104] ss:$16 sps:$4 sm:$0xff]   ;;  %v3527_v33 = vld [vmem:[#allocation5 + $0x10c] ss:$16 sps:$4 sm:$0xff]   ;;  %v3529_v34 = vld [vmem:[#allocation5 + $0x100] ss:$16 sps:$4 sm:$0xff]  }
  0x56   :  { %v3530_v35 = vld [vmem:[#allocation5 + $0x108] ss:$16 sps:$4 sm:$0xff]   ;;  %v3531_v36 = vld [vmem:[#allocation5 + $0x124] ss:$16 sps:$4 sm:$0xff]   ;;  %v3533_v37 = vld [vmem:[#allocation5 + $0x12c] ss:$16 sps:$4 sm:$0xff]  }
  0x57   :  { %v3535_v38 = vld [vmem:[#allocation5 + $0x120] ss:$16 sps:$4 sm:$0xff]   ;;  %v3536_v39 = vld [vmem:[#allocation5 + $0x128] ss:$16 sps:$4 sm:$0xff]   ;;  %v3537_v40 = vld [vmem:[#allocation5 + $0x144] ss:$16 sps:$4 sm:$0xff]  }
  0x58   :  { %1282 = vmatpush1.bf16.msra.mxu0 %v3499_v14  ;;  %1446 = vmatpush1.bf16.msra.mxu1 %v3500_v15  ;;  %v3539_v41 = vld [vmem:[#allocation5 + $0x14c] ss:$16 sps:$4 sm:$0xff]   ;;  %v3541_v42 = vld [vmem:[#allocation5 + $0x140] ss:$16 sps:$4 sm:$0xff]   ;;  %v3542_v43 = vld [vmem:[#allocation5 + $0x148] ss:$16 sps:$4 sm:$0xff]  }
  0x59   :  { %1283 = vmatprep.subr.bf16.mxu0 %v3501_v16  ;;  %1447 = vmatprep.subr.bf16.mxu1 %v3503_v17  ;;  %v3543_v44 = vld [vmem:[#allocation5 + $0x164] ss:$16 sps:$4 sm:$0xff]   ;;  %v3545_v45 = vld [vmem:[#allocation5 + $0x16c] ss:$16 sps:$4 sm:$0xff]   ;;  %v3547_v47 = vld [vmem:[#allocation5 + $0x160] ss:$16 sps:$4 sm:$0xff]  }
  0x5a   :  { %v82_v46 = vld [vmem:[#allocation2 + $0x8] sm:$0xff]  ;;  %v3548_v49 = vld [vmem:[#allocation5 + $0x168] ss:$16 sps:$4 sm:$0xff]   ;;  %v3551_v51 = vld [vmem:[#allocation5 + $0x18c] ss:$16 sps:$4 sm:$0xff]   ;;  %vm1271_vm0 = vcmask 130048  }
  0x5b   :  { %v89_v48 = vpack.c.bf16 %v82_v46, %v82_v46  ;;  %v3549_v50 = vld [vmem:[#allocation5 + $0x184] ss:$16 sps:$4 sm:$0xff]   ;;  %v3553_v52 = vld [vmem:[#allocation5 + $0x180] ss:$16 sps:$4 sm:$0xff]   ;;  %v3554_v53 = vld [vmem:[#allocation5 + $0x188] ss:$16 sps:$4 sm:$0xff]  }
  0x5c   :  { %1284 = vmatpush1.bf16.msra.mxu0 %v3505_v18  ;;  %1448 = vmatpush1.bf16.msra.mxu1 %v3506_v19  ;;  %v3555_v54 = vld [vmem:[#allocation5 + $0x1a4] ss:$16 sps:$4 sm:$0xff]   ;;  %v3557_v55 = vld [vmem:[#allocation5 + $0x1ac] ss:$16 sps:$4 sm:$0xff]   ;;  %v3559_v56 = vld [vmem:[#allocation5 + $0x1a0] ss:$16 sps:$4 sm:$0xff]  }
  0x5d   :  { %1285 = vmatprep.subr.bf16.mxu0 %v3507_v20  ;;  %1449 = vmatprep.subr.bf16.mxu1 %v3509_v21  ;;  %v3560_v57 = vld [vmem:[#allocation5 + $0x1a8] ss:$16 sps:$4 sm:$0xff]   ;;  %v3561_v58 = vld [vmem:[#allocation5 + $0x1c4] ss:$16 sps:$4 sm:$0xff]   ;;  %v3563_v59 = vld [vmem:[#allocation5 + $0x1cc] ss:$16 sps:$4 sm:$0xff]  }
  0x5e   :  { %1307 = vmatprep.mubr.bf16.mxu0 %v89_v48  ;;  %1471 = vmatprep.mubr.bf16.mxu1 %v89_v48  ;;  %v3565_v60 = vld [vmem:[#allocation5 + $0x1c0] ss:$16 sps:$4 sm:$0xff]   ;;  %v3566_v61 = vld [vmem:[#allocation5 + $0x1c8] ss:$16 sps:$4 sm:$0xff]   ;;  %v3567_v62 = vld [vmem:[#allocation5 + $0x1e4] ss:$16 sps:$4 sm:$0xff]  }
  0x5f   :  { %v3569_v63 = vld [vmem:[#allocation5 + $0x1ec] ss:$16 sps:$4 sm:$0xff]   ;;  %v3571_v0 = vld [vmem:[#allocation5 + $0x1e0] ss:$16 sps:$4 sm:$0xff]   ;;  %v3572_v1 = vld [vmem:[#allocation5 + $0x1e8] ss:$16 sps:$4 sm:$0xff]  }
  0x60   :  { %1286 = vmatpush1.bf16.msra.mxu0 %v3511_v22  ;;  %1450 = vmatpush1.bf16.msra.mxu1 %v3512_v23  ;;  %v81_v2 = vld [vmem:[#allocation2] sm:$0xff]  ;;  %v3575_v3 = vld [vmem:[#allocation5 + $0x204] ss:$16 sps:$4 sm:$0xff]   ;;  %v3573_v6 = vld [vmem:[#allocation5 + $0x200] ss:$16 sps:$4 sm:$0xff]   ;;  %s4123_s29 = smov [#allocation10]  }
  0x61   :  { %1287 = vmatprep.subr.bf16.mxu0 %v3513_v24  ;;  %1451 = vmatprep.subr.bf16.mxu1 %v3515_v25  ;;  %v3578_v4 = vld [vmem:[#allocation5 + $0x20c] ss:$16 sps:$4 sm:$0xff]   ;;  %v88_v5 = vpack.c.bf16 %v81_v2, %v81_v2  ;;  %v3576_v7 = vld [vmem:[#allocation5 + $0x208] ss:$16 sps:$4 sm:$0xff]   ;;  %v3581_v8 = vld [vmem:[#allocation5 + $0x224] ss:$16 sps:$4 sm:$0xff]  }
  0x62   :  { %v3584_v9 = vld [vmem:[#allocation5 + $0x22c] ss:$16 sps:$4 sm:$0xff]   ;;  %v3579_v10 = vld [vmem:[#allocation5 + $0x220] ss:$16 sps:$4 sm:$0xff]   ;;  %v3582_v11 = vld [vmem:[#allocation5 + $0x228] ss:$16 sps:$4 sm:$0xff]  }
  0x63   :  { %v3587_v12 = vld [vmem:[#allocation5 + $0x244] ss:$16 sps:$4 sm:$0xff]   ;;  %v3590_v13 = vld [vmem:[#allocation5 + $0x24c] ss:$16 sps:$4 sm:$0xff]   ;;  %v3585_v14 = vld [vmem:[#allocation5 + $0x240] ss:$16 sps:$4 sm:$0xff]  }
  0x64   :  { %1288 = vmatpush1.bf16.msra.mxu0 %v3517_v26  ;;  %1452 = vmatpush1.bf16.msra.mxu1 %v3518_v27  ;;  %v3588_v15 = vld [vmem:[#allocation5 + $0x248] ss:$16 sps:$4 sm:$0xff]   ;;  %v3593_v16 = vld [vmem:[#allocation5 + $0x264] ss:$16 sps:$4 sm:$0xff]   ;;  %v3596_v17 = vld [vmem:[#allocation5 + $0x26c] ss:$16 sps:$4 sm:$0xff]  }
  0x65   :  { %1289 = vmatprep.subr.bf16.mxu0 %v3519_v28  ;;  %1453 = vmatprep.subr.bf16.mxu1 %v3521_v29  ;;  %v3591_v18 = vld [vmem:[#allocation5 + $0x260] ss:$16 sps:$4 sm:$0xff]   ;;  %v3594_v19 = vld [vmem:[#allocation5 + $0x268] ss:$16 sps:$4 sm:$0xff]   ;;  %v3599_v20 = vld [vmem:[#allocation5 + $0x284] ss:$16 sps:$4 sm:$0xff]  }
  0x66   :  { %v3602_v21 = vld [vmem:[#allocation5 + $0x28c] ss:$16 sps:$4 sm:$0xff]   ;;  %v3597_v22 = vld [vmem:[#allocation5 + $0x280] ss:$16 sps:$4 sm:$0xff]   ;;  %v3600_v23 = vld [vmem:[#allocation5 + $0x288] ss:$16 sps:$4 sm:$0xff]  }
  0x67   :  { %v3605_v24 = vld [vmem:[#allocation5 + $0x2a4] ss:$16 sps:$4 sm:$0xff]   ;;  %v3608_v25 = vld [vmem:[#allocation5 + $0x2ac] ss:$16 sps:$4 sm:$0xff]   ;;  %v3603_v26 = vld [vmem:[#allocation5 + $0x2a0] ss:$16 sps:$4 sm:$0xff]  }
  0x68   :  { %1290 = vmatpush1.bf16.msra.mxu0 %v3523_v30  ;;  %1454 = vmatpush1.bf16.msra.mxu1 %v3524_v31  ;;  %v3606_v27 = vld [vmem:[#allocation5 + $0x2a8] ss:$16 sps:$4 sm:$0xff]   ;;  %v3611_v28 = vld [vmem:[#allocation5 + $0x2c4] ss:$16 sps:$4 sm:$0xff]   ;;  %v3614_v29 = vld [vmem:[#allocation5 + $0x2cc] ss:$16 sps:$4 sm:$0xff]  }
  0x69   :  { %1291 = vmatprep.subr.bf16.mxu0 %v3525_v32  ;;  %1455 = vmatprep.subr.bf16.mxu1 %v3527_v33  ;;  %v84_v30 = vld [vmem:[#allocation2 + $0x18] sm:$0xff]  ;;  %v3612_v33 = vld [vmem:[#allocation5 + $0x2c8] ss:$16 sps:$4 sm:$0xff]   ;;  %s3018_s30 = sshll.u32 %s4123_s29, 4  ;;  %s3019_s30 = int_to_ptr.vmem [resolvable:$true] %s3018_s30 }
  0x6a   :  { %v3609_v31 = vld [vmem:[#allocation5 + $0x2c0] ss:$16 sps:$4 sm:$0xff]   ;;  %v91_v32 = vpack.c.bf16 %v84_v30, %v84_v30  ;;  %v3635_v46 = vld [vmem:[#allocation5 + $0x344] ss:$16 sps:$4 sm:$0xff]   ;;  %s4083_s8 = scalar_lea.vmem %s3019_s30, 64  ;;  %p4088_p5 = scmp.lt.s32.totalorder %s3019_s30, %s3019_s30 }
  0x6b   :  { %v3633_v48 = vld [vmem:[#allocation5 + $0x340] ss:$16 sps:$4 sm:$0xff]   ;;  %v3665_v2 = vld [vmem:[#allocation5 + $0x3e4] ss:$16 sps:$4 sm:$0xff]   ;;  %p4084_p4 = scmp.ne.s32.totalorder %s3019_s30, %s4083_s8  ;;  %p4089_p6 = scmp.lt.s32.totalorder %s4083_s8, %s4083_s8 }
  0x6c   :  { %1292 = vmatpush1.bf16.msra.mxu0 %v3529_v34  ;;  %1456 = vmatpush1.bf16.msra.mxu1 %v3530_v35  ;;  %v3617_v34 = vld [vmem:[#allocation5 + $0x2e4] ss:$16 sps:$4 sm:$0xff]   ;;  %v3620_v35 = vld [vmem:[#allocation5 + $0x2ec] ss:$16 sps:$4 sm:$0xff]  }
  0x6d   :  { %1293 = vmatprep.subr.bf16.mxu0 %v3531_v36  ;;  %1457 = vmatprep.subr.bf16.mxu1 %v3533_v37  ;;  %v3615_v36 = vld [vmem:[#allocation5 + $0x2e0] ss:$16 sps:$4 sm:$0xff]   ;;  %v3618_v37 = vld [vmem:[#allocation5 + $0x2e8] ss:$16 sps:$4 sm:$0xff]   ;;  %v3701_v30 = vld [vmem:[#allocation5 + $0x4a4] ss:$16 sps:$4 sm:$0xff]   ;;  %p4090_p7 = por %p4089_p6, %p4088_p5 }
  0x6f   :  { %p4091_p8 = pnand %p4090_p7, %p4084_p4 }
  0x70   :  { %1294 = vmatpush1.bf16.msra.mxu0 %v3535_v38  ;;  %1458 = vmatpush1.bf16.msra.mxu1 %v3536_v39  ;;  %v3623_v38 = vld [vmem:[#allocation5 + $0x304] ss:$16 sps:$4 sm:$0xff]   ;;  %v3626_v39 = vld [vmem:[#allocation5 + $0x30c] ss:$16 sps:$4 sm:$0xff]  }
  0x71   :  { %1295 = vmatprep.subr.bf16.mxu0 %v3537_v40  ;;  %1459 = vmatprep.subr.bf16.mxu1 %v3539_v41  ;;  %v3621_v40 = vld [vmem:[#allocation5 + $0x300] ss:$16 sps:$4 sm:$0xff]   ;;  %v3624_v41 = vld [vmem:[#allocation5 + $0x308] ss:$16 sps:$4 sm:$0xff]  }
  0x74   :  { %1296 = vmatpush1.bf16.msra.mxu0 %v3541_v42  ;;  %1460 = vmatpush1.bf16.msra.mxu1 %v3542_v43  ;;  %v3629_v42 = vld [vmem:[#allocation5 + $0x324] ss:$16 sps:$4 sm:$0xff]   ;;  %v3632_v43 = vld [vmem:[#allocation5 + $0x32c] ss:$16 sps:$4 sm:$0xff]  }
  0x75   :  { %1297 = vmatprep.subr.bf16.mxu0 %v3543_v44  ;;  %1461 = vmatprep.subr.bf16.mxu1 %v3545_v45  ;;  %v3627_v44 = vld [vmem:[#allocation5 + $0x320] ss:$16 sps:$4 sm:$0xff]   ;;  %v3630_v45 = vld [vmem:[#allocation5 + $0x328] ss:$16 sps:$4 sm:$0xff]  }
  0x78   :  { %1298 = vmatpush1.bf16.msra.mxu0 %v3547_v47  ;;  %1462 = vmatpush1.bf16.msra.mxu1 %v3548_v49  ;;  %v3638_v47 = vld [vmem:[#allocation5 + $0x34c] ss:$16 sps:$4 sm:$0xff]   ;;  %v3636_v49 = vld [vmem:[#allocation5 + $0x348] ss:$16 sps:$4 sm:$0xff]  }
  0x79   :  { %1299 = vmatprep.subr.bf16.mxu0 %v3549_v50  ;;  %1463 = vmatprep.subr.bf16.mxu1 %v3551_v51  ;;  %v3641_v50 = vld [vmem:[#allocation5 + $0x364] ss:$16 sps:$4 sm:$0xff]   ;;  %v3644_v51 = vld [vmem:[#allocation5 + $0x36c] ss:$16 sps:$4 sm:$0xff]  }
  0x7c   :  { %1300 = vmatpush1.bf16.msra.mxu0 %v3553_v52  ;;  %1464 = vmatpush1.bf16.msra.mxu1 %v3554_v53  ;;  %v3639_v52 = vld [vmem:[#allocation5 + $0x360] ss:$16 sps:$4 sm:$0xff]   ;;  %v3642_v53 = vld [vmem:[#allocation5 + $0x368] ss:$16 sps:$4 sm:$0xff]  }
  0x7d   :  { %1301 = vmatprep.subr.bf16.mxu0 %v3555_v54  ;;  %1465 = vmatprep.subr.bf16.mxu1 %v3557_v55  ;;  %v3647_v54 = vld [vmem:[#allocation5 + $0x384] ss:$16 sps:$4 sm:$0xff]   ;;  %v3650_v55 = vld [vmem:[#allocation5 + $0x38c] ss:$16 sps:$4 sm:$0xff]  }
  0x80   :  { %1302 = vmatpush1.bf16.msra.mxu0 %v3559_v56  ;;  %1466 = vmatpush1.bf16.msra.mxu1 %v3560_v57  ;;  %v3645_v56 = vld [vmem:[#allocation5 + $0x380] ss:$16 sps:$4 sm:$0xff]   ;;  %v3648_v57 = vld [vmem:[#allocation5 + $0x388] ss:$16 sps:$4 sm:$0xff]  }
  0x81   :  { %1303 = vmatprep.subr.bf16.mxu0 %v3561_v58  ;;  %1467 = vmatprep.subr.bf16.mxu1 %v3563_v59  ;;  %v3653_v58 = vld [vmem:[#allocation5 + $0x3a4] ss:$16 sps:$4 sm:$0xff]   ;;  %v3656_v59 = vld [vmem:[#allocation5 + $0x3ac] ss:$16 sps:$4 sm:$0xff]  }
  0x84   :  { %1304 = vmatpush1.bf16.msra.mxu0 %v3565_v60  ;;  %1468 = vmatpush1.bf16.msra.mxu1 %v3566_v61  ;;  %v3651_v60 = vld [vmem:[#allocation5 + $0x3a0] ss:$16 sps:$4 sm:$0xff]   ;;  %v3654_v61 = vld [vmem:[#allocation5 + $0x3a8] ss:$16 sps:$4 sm:$0xff]  }
  0x85   :  { %1305 = vmatprep.subr.bf16.mxu0 %v3567_v62  ;;  %1469 = vmatprep.subr.bf16.mxu1 %v3569_v63  ;;  %v3659_v62 = vld [vmem:[#allocation5 + $0x3c4] ss:$16 sps:$4 sm:$0xff]   ;;  %v3662_v63 = vld [vmem:[#allocation5 + $0x3cc] ss:$16 sps:$4 sm:$0xff]  }
  0x88   :  { %1306 = vmatpush1.bf16.msra.mxu0 %v3571_v0  ;;  %1470 = vmatpush1.bf16.msra.mxu1 %v3572_v1  ;;  %v3657_v0 = vld [vmem:[#allocation5 + $0x3c0] ss:$16 sps:$4 sm:$0xff]   ;;  %v3660_v1 = vld [vmem:[#allocation5 + $0x3c8] ss:$16 sps:$4 sm:$0xff]  }
  0x89   :  { %1316 = vmatprep.subr.bf16.mxu0 %v3575_v3  ;;  %1480 = vmatprep.subr.bf16.mxu1 %v3578_v4  ;;  %v3668_v3 = vld [vmem:[#allocation5 + $0x3ec] ss:$16 sps:$4 sm:$0xff]   ;;  %v3663_v4 = vld [vmem:[#allocation5 + $0x3e0] ss:$16 sps:$4 sm:$0xff]  }
  0x8b   :  { %1308 = vmatmul.mubr.bf16.vlgmr.msra.gmra.mrb[0].mxu0 %v88_v5  ;;  %1472 = vmatmul.mubr.bf16.vlgmr.msra.gmra.mrb[0].mxu1 %v88_v5  ;;  %v3666_v5 = vld [vmem:[#allocation5 + $0x3e8] ss:$16 sps:$4 sm:$0xff]  }
  0x8c   :  { %1317 = vmatpush1.bf16.msra.mxu0 %v3573_v6  ;;  %1481 = vmatpush1.bf16.msra.mxu1 %v3576_v7  ;;  %v3671_v6 = vld [vmem:[#allocation5 + $0x404] ss:$16 sps:$4 sm:$0xff]   ;;  %v83_v7 = vld [vmem:[#allocation2 + $0x10] sm:$0xff] }
  0x8d   :  { %1318 = vmatprep.subr.bf16.mxu0 %v3581_v8  ;;  %1482 = vmatprep.subr.bf16.mxu1 %v3584_v9  ;;  %v3674_v8 = vld [vmem:[#allocation5 + $0x40c] ss:$16 sps:$4 sm:$0xff]   ;;  %v3669_v9 = vld [vmem:[#allocation5 + $0x400] ss:$16 sps:$4 sm:$0xff]  }
  0x8e   :  { %1348 = vmatprep.mubr.bf16.mxu0 %v91_v32  ;;  %1512 = vmatprep.mubr.bf16.mxu1 %v91_v32  ;;  %v3699_v32 = vld [vmem:[#allocation5 + $0x4a0] ss:$16 sps:$4 sm:$0xff]  }
  0x90   :  { %1319 = vmatpush1.bf16.msra.mxu0 %v3579_v10  ;;  %1483 = vmatpush1.bf16.msra.mxu1 %v3582_v11  ;;  %v90_v10 = vpack.c.bf16 %v83_v7, %v83_v7  ;;  %v3672_v11 = vld [vmem:[#allocation5 + $0x408] ss:$16 sps:$4 sm:$0xff]   ;;  %v3764_v7 = vld [vmem:[#allocation5 + $0x5ec] ss:$16 sps:$4 sm:$0xff]  }
  0x91   :  { %1320 = vmatprep.subr.bf16.mxu0 %v3587_v12  ;;  %1484 = vmatprep.subr.bf16.mxu1 %v3590_v13  ;;  %v3677_v12 = vld [vmem:[#allocation5 + $0x424] ss:$16 sps:$4 sm:$0xff]   ;;  %v3680_v13 = vld [vmem:[#allocation5 + $0x42c] ss:$16 sps:$4 sm:$0xff]  }
  0x94   :  { %1321 = vmatpush1.bf16.msra.mxu0 %v3585_v14  ;;  %1485 = vmatpush1.bf16.msra.mxu1 %v3588_v15  ;;  %v86_v14 = vld [vmem:[#allocation2 + $0x28] sm:$0xff] }
  0x95   :  { %1322 = vmatprep.subr.bf16.mxu0 %v3593_v16  ;;  %1486 = vmatprep.subr.bf16.mxu1 %v3596_v17  ;;  %v93_v15 = vpack.c.bf16 %v86_v14, %v86_v14  ;;  %v3675_v16 = vld [vmem:[#allocation5 + $0x420] ss:$16 sps:$4 sm:$0xff]   ;;  %v3678_v17 = vld [vmem:[#allocation5 + $0x428] ss:$16 sps:$4 sm:$0xff]  }
  0x96   :  { %v3768_v14 = vld [vmem:[#allocation5 + $0x608] ss:$16 sps:$4 sm:$0xff]  }
  0x98   :  { %1323 = vmatpush1.bf16.msra.mxu0 %v3591_v18  ;;  %1487 = vmatpush1.bf16.msra.mxu1 %v3594_v19  ;;  %v3683_v18 = vld [vmem:[#allocation5 + $0x444] ss:$16 sps:$4 sm:$0xff]   ;;  %v3686_v19 = vld [vmem:[#allocation5 + $0x44c] ss:$16 sps:$4 sm:$0xff]  }
  0x99   :  { %1324 = vmatprep.subr.bf16.mxu0 %v3599_v20  ;;  %1488 = vmatprep.subr.bf16.mxu1 %v3602_v21  ;;  %v3681_v20 = vld [vmem:[#allocation5 + $0x440] ss:$16 sps:$4 sm:$0xff]   ;;  %v3684_v21 = vld [vmem:[#allocation5 + $0x448] ss:$16 sps:$4 sm:$0xff]  }
  0x9c   :  { %1325 = vmatpush1.bf16.msra.mxu0 %v3597_v22  ;;  %1489 = vmatpush1.bf16.msra.mxu1 %v3600_v23  ;;  %v3689_v22 = vld [vmem:[#allocation5 + $0x464] ss:$16 sps:$4 sm:$0xff]   ;;  %v3692_v23 = vld [vmem:[#allocation5 + $0x46c] ss:$16 sps:$4 sm:$0xff]  }
  0x9d   :  { %1326 = vmatprep.subr.bf16.mxu0 %v3605_v24  ;;  %1490 = vmatprep.subr.bf16.mxu1 %v3608_v25  ;;  %v3687_v24 = vld [vmem:[#allocation5 + $0x460] ss:$16 sps:$4 sm:$0xff]   ;;  %v3690_v25 = vld [vmem:[#allocation5 + $0x468] ss:$16 sps:$4 sm:$0xff]  }
  0xa0   :  { %1327 = vmatpush1.bf16.msra.mxu0 %v3603_v26  ;;  %1491 = vmatpush1.bf16.msra.mxu1 %v3606_v27  ;;  %v3695_v26 = vld [vmem:[#allocation5 + $0x484] ss:$16 sps:$4 sm:$0xff]   ;;  %v3698_v27 = vld [vmem:[#allocation5 + $0x48c] ss:$16 sps:$4 sm:$0xff]  }
  0xa1   :  { %1328 = vmatprep.subr.bf16.mxu0 %v3611_v28  ;;  %1492 = vmatprep.subr.bf16.mxu1 %v3614_v29  ;;  %v3693_v28 = vld [vmem:[#allocation5 + $0x480] ss:$16 sps:$4 sm:$0xff]   ;;  %v3696_v29 = vld [vmem:[#allocation5 + $0x488] ss:$16 sps:$4 sm:$0xff]  }
  0xa4   :  { %1329 = vmatpush1.bf16.msra.mxu0 %v3609_v31  ;;  %1493 = vmatpush1.bf16.msra.mxu1 %v3612_v33  ;;  %v3704_v31 = vld [vmem:[#allocation5 + $0x4ac] ss:$16 sps:$4 sm:$0xff]   ;;  %v3702_v33 = vld [vmem:[#allocation5 + $0x4a8] ss:$16 sps:$4 sm:$0xff]  }
  0xa5   :  { %1330 = vmatprep.subr.bf16.mxu0 %v3617_v34  ;;  %1494 = vmatprep.subr.bf16.mxu1 %v3620_v35  ;;  %v3707_v34 = vld [vmem:[#allocation5 + $0x4c4] ss:$16 sps:$4 sm:$0xff]   ;;  %v3710_v35 = vld [vmem:[#allocation5 + $0x4cc] ss:$16 sps:$4 sm:$0xff]  }
  0xa8   :  { %1331 = vmatpush1.bf16.msra.mxu0 %v3615_v36  ;;  %1495 = vmatpush1.bf16.msra.mxu1 %v3618_v37  ;;  %v3705_v36 = vld [vmem:[#allocation5 + $0x4c0] ss:$16 sps:$4 sm:$0xff]   ;;  %v3708_v37 = vld [vmem:[#allocation5 + $0x4c8] ss:$16 sps:$4 sm:$0xff]  }
  0xa9   :  { %1332 = vmatprep.subr.bf16.mxu0 %v3623_v38  ;;  %1496 = vmatprep.subr.bf16.mxu1 %v3626_v39  ;;  %v3713_v38 = vld [vmem:[#allocation5 + $0x4e4] ss:$16 sps:$4 sm:$0xff]   ;;  %v3716_v39 = vld [vmem:[#allocation5 + $0x4ec] ss:$16 sps:$4 sm:$0xff]  }
  0xac   :  { %1333 = vmatpush1.bf16.msra.mxu0 %v3621_v40  ;;  %1497 = vmatpush1.bf16.msra.mxu1 %v3624_v41  ;;  %v3711_v40 = vld [vmem:[#allocation5 + $0x4e0] ss:$16 sps:$4 sm:$0xff]   ;;  %v3714_v41 = vld [vmem:[#allocation5 + $0x4e8] ss:$16 sps:$4 sm:$0xff]  }
  0xad   :  { %1334 = vmatprep.subr.bf16.mxu0 %v3629_v42  ;;  %1498 = vmatprep.subr.bf16.mxu1 %v3632_v43  ;;  %v3719_v42 = vld [vmem:[#allocation5 + $0x504] ss:$16 sps:$4 sm:$0xff]   ;;  %v3722_v43 = vld [vmem:[#allocation5 + $0x50c] ss:$16 sps:$4 sm:$0xff]  }
  0xb0   :  { %1335 = vmatpush1.bf16.msra.mxu0 %v3627_v44  ;;  %1499 = vmatpush1.bf16.msra.mxu1 %v3630_v45  ;;  %v3717_v44 = vld [vmem:[#allocation5 + $0x500] ss:$16 sps:$4 sm:$0xff]   ;;  %v3720_v45 = vld [vmem:[#allocation5 + $0x508] ss:$16 sps:$4 sm:$0xff]  }
  0xb1   :  { %1336 = vmatprep.subr.bf16.mxu0 %v3635_v46  ;;  %1500 = vmatprep.subr.bf16.mxu1 %v3638_v47  ;;  %v3725_v46 = vld [vmem:[#allocation5 + $0x524] ss:$16 sps:$4 sm:$0xff]   ;;  %v3728_v47 = vld [vmem:[#allocation5 + $0x52c] ss:$16 sps:$4 sm:$0xff]  }
  0xb4   :  { %1337 = vmatpush1.bf16.msra.mxu0 %v3633_v48  ;;  %1501 = vmatpush1.bf16.msra.mxu1 %v3636_v49  ;;  %v3723_v48 = vld [vmem:[#allocation5 + $0x520] ss:$16 sps:$4 sm:$0xff]   ;;  %v3726_v49 = vld [vmem:[#allocation5 + $0x528] ss:$16 sps:$4 sm:$0xff]  }
  0xb5   :  { %1338 = vmatprep.subr.bf16.mxu0 %v3641_v50  ;;  %1502 = vmatprep.subr.bf16.mxu1 %v3644_v51  ;;  %v3731_v50 = vld [vmem:[#allocation5 + $0x544] ss:$16 sps:$4 sm:$0xff]   ;;  %v3734_v51 = vld [vmem:[#allocation5 + $0x54c] ss:$16 sps:$4 sm:$0xff]  }
  0xb8   :  { %1339 = vmatpush1.bf16.msra.mxu0 %v3639_v52  ;;  %1503 = vmatpush1.bf16.msra.mxu1 %v3642_v53  ;;  %v3729_v52 = vld [vmem:[#allocation5 + $0x540] ss:$16 sps:$4 sm:$0xff]   ;;  %v3732_v53 = vld [vmem:[#allocation5 + $0x548] ss:$16 sps:$4 sm:$0xff]  }
  0xb9   :  { %1340 = vmatprep.subr.bf16.mxu0 %v3647_v54  ;;  %1504 = vmatprep.subr.bf16.mxu1 %v3650_v55  ;;  %v3737_v54 = vld [vmem:[#allocation5 + $0x564] ss:$16 sps:$4 sm:$0xff]   ;;  %v3740_v55 = vld [vmem:[#allocation5 + $0x56c] ss:$16 sps:$4 sm:$0xff]  }
  0xbc   :  { %1341 = vmatpush1.bf16.msra.mxu0 %v3645_v56  ;;  %1505 = vmatpush1.bf16.msra.mxu1 %v3648_v57  ;;  %v3735_v56 = vld [vmem:[#allocation5 + $0x560] ss:$16 sps:$4 sm:$0xff]   ;;  %v3738_v57 = vld [vmem:[#allocation5 + $0x568] ss:$16 sps:$4 sm:$0xff]  }
  0xbd   :  { %1342 = vmatprep.subr.bf16.mxu0 %v3653_v58  ;;  %1506 = vmatprep.subr.bf16.mxu1 %v3656_v59  ;;  %v3743_v58 = vld [vmem:[#allocation5 + $0x584] ss:$16 sps:$4 sm:$0xff]   ;;  %v3746_v59 = vld [vmem:[#allocation5 + $0x58c] ss:$16 sps:$4 sm:$0xff]  }
  0xc0   :  { %1343 = vmatpush1.bf16.msra.mxu0 %v3651_v60  ;;  %1507 = vmatpush1.bf16.msra.mxu1 %v3654_v61  ;;  %v3741_v60 = vld [vmem:[#allocation5 + $0x580] ss:$16 sps:$4 sm:$0xff]   ;;  %v3744_v61 = vld [vmem:[#allocation5 + $0x588] ss:$16 sps:$4 sm:$0xff]  }
  0xc1   :  { %1344 = vmatprep.subr.bf16.mxu0 %v3659_v62  ;;  %1508 = vmatprep.subr.bf16.mxu1 %v3662_v63  ;;  %v3749_v62 = vld [vmem:[#allocation5 + $0x5a4] ss:$16 sps:$4 sm:$0xff]   ;;  %v3752_v63 = vld [vmem:[#allocation5 + $0x5ac] ss:$16 sps:$4 sm:$0xff]  }
  0xc4   :  { %1345 = vmatpush1.bf16.msra.mxu0 %v3657_v0  ;;  %1509 = vmatpush1.bf16.msra.mxu1 %v3660_v1  ;;  %v3747_v0 = vld [vmem:[#allocation5 + $0x5a0] ss:$16 sps:$4 sm:$0xff]   ;;  %v3750_v1 = vld [vmem:[#allocation5 + $0x5a8] ss:$16 sps:$4 sm:$0xff]  }
  0xc5   :  { %1346 = vmatprep.subr.bf16.mxu0 %v3665_v2  ;;  %1510 = vmatprep.subr.bf16.mxu1 %v3668_v3  ;;  %v3755_v2 = vld [vmem:[#allocation5 + $0x5c4] ss:$16 sps:$4 sm:$0xff]   ;;  %v3758_v3 = vld [vmem:[#allocation5 + $0x5cc] ss:$16 sps:$4 sm:$0xff]  }
  0xc8   :  { %1347 = vmatpush1.bf16.msra.mxu0 %v3663_v4  ;;  %1511 = vmatpush1.bf16.msra.mxu1 %v3666_v5  ;;  %v3753_v4 = vld [vmem:[#allocation5 + $0x5c0] ss:$16 sps:$4 sm:$0xff]   ;;  %v3756_v5 = vld [vmem:[#allocation5 + $0x5c8] ss:$16 sps:$4 sm:$0xff]  }
  0xc9   :  { %1357 = vmatprep.subr.bf16.mxu0 %v3671_v6  ;;  %1521 = vmatprep.subr.bf16.mxu1 %v3674_v8  ;;  %v3761_v6 = vld [vmem:[#allocation5 + $0x5e4] ss:$16 sps:$4 sm:$0xff]   ;;  %v3759_v8 = vld [vmem:[#allocation5 + $0x5e0] ss:$16 sps:$4 sm:$0xff]  }
  0xcb   :  { %1349 = vmatmul.mubr.bf16.vlgmr.msra.gmra.mrb[0].mxu0 %v90_v10  ;;  %1513 = vmatmul.mubr.bf16.vlgmr.msra.gmra.mrb[0].mxu1 %v90_v10  ;;  %v85_v10 = vld [vmem:[#allocation2 + $0x20] sm:$0xff] }
  0xcc   :  { %1358 = vmatpush1.bf16.msra.mxu0 %v3669_v9  ;;  %1522 = vmatpush1.bf16.msra.mxu1 %v3672_v11  ;;  %v3762_v9 = vld [vmem:[#allocation5 + $0x5e8] ss:$16 sps:$4 sm:$0xff]   ;;  %v3767_v11 = vld [vmem:[#allocation5 + $0x604] ss:$16 sps:$4 sm:$0xff]  }
  0xcd   :  { %1359 = vmatprep.subr.bf16.mxu0 %v3677_v12  ;;  %1523 = vmatprep.subr.bf16.mxu1 %v3680_v13  ;;  %v3770_v12 = vld [vmem:[#allocation5 + $0x60c] ss:$16 sps:$4 sm:$0xff]   ;;  %v3765_v13 = vld [vmem:[#allocation5 + $0x600] ss:$16 sps:$4 sm:$0xff]  }
  0xce   :  { %1389 = vmatprep.mubr.bf16.mxu0 %v93_v15  ;;  %1553 = vmatprep.mubr.bf16.mxu1 %v93_v15  ;;  %v92_v15 = vpack.c.bf16 %v85_v10, %v85_v10  ;;  %v3852_v10 = vld [vmem:[#allocation7 + $0x1a8] ss:$16 sps:$4 sm:$0xff]  }
  0xd0   :  { %1360 = vmatpush1.bf16.msra.mxu0 %v3675_v16  ;;  %1524 = vmatpush1.bf16.msra.mxu1 %v3678_v17  ;;  %v3773_v16 = vld [vmem:[#allocation7 + $0x4] ss:$16 sps:$4 sm:$0xff]   ;;  %v3776_v17 = vld [vmem:[#allocation7 + $0xc] ss:$16 sps:$4 sm:$0xff]  }
  0xd1   :  { %1361 = vmatprep.subr.bf16.mxu0 %v3683_v18  ;;  %1525 = vmatprep.subr.bf16.mxu1 %v3686_v19  ;;  %v4121_v18 = vmov 0   ;;  %v87_v19 = vld [vmem:[#allocation2 + $0x30] sm:$0xff] }
  0xd4   :  { %1362 = vmatpush1.bf16.msra.mxu0 %v3681_v20  ;;  %1526 = vmatpush1.bf16.msra.mxu1 %v3684_v21  ;;  %v3771_v20 = vld [vmem:[#allocation7] ss:$16 sps:$4 sm:$0xff]   ;;  %v3774_v21 = vld [vmem:[#allocation7 + $0x8] ss:$16 sps:$4 sm:$0xff]  }
  0xd5   :  { %1363 = vmatprep.subr.bf16.mxu0 %v3689_v22  ;;  %1527 = vmatprep.subr.bf16.mxu1 %v3692_v23  ;;  %v94_v22 = vpack.c.bf16 %v87_v19, %v87_v19  ;;  %v3779_v23 = vld [vmem:[#allocation7 + $0x24] ss:$16 sps:$4 sm:$0xff]   ;;  %v3864_v19 = vld [vmem:[#allocation7 + $0x1e8] ss:$16 sps:$4 sm:$0xff]  }
  0xd8   :  { %1364 = vmatpush1.bf16.msra.mxu0 %v3687_v24  ;;  %1528 = vmatpush1.bf16.msra.mxu1 %v3690_v25  ;;  %v3782_v24 = vld [vmem:[#allocation7 + $0x2c] ss:$16 sps:$4 sm:$0xff]   ;;  %v3777_v25 = vld [vmem:[#allocation7 + $0x20] ss:$16 sps:$4 sm:$0xff]  }
  0xd9   :  { %1365 = vmatprep.subr.bf16.mxu0 %v3695_v26  ;;  %1529 = vmatprep.subr.bf16.mxu1 %v3698_v27  ;;  %v3780_v26 = vld [vmem:[#allocation7 + $0x28] ss:$16 sps:$4 sm:$0xff]   ;;  %v3785_v27 = vld [vmem:[#allocation7 + $0x44] ss:$16 sps:$4 sm:$0xff]  }
  0xdc   :  { %1366 = vmatpush1.bf16.msra.mxu0 %v3693_v28  ;;  %1530 = vmatpush1.bf16.msra.mxu1 %v3696_v29  ;;  %v3788_v28 = vld [vmem:[#allocation7 + $0x4c] ss:$16 sps:$4 sm:$0xff]   ;;  %v3783_v29 = vld [vmem:[#allocation7 + $0x40] ss:$16 sps:$4 sm:$0xff]  }
  0xdd   :  { %1367 = vmatprep.subr.bf16.mxu0 %v3701_v30  ;;  %1531 = vmatprep.subr.bf16.mxu1 %v3704_v31  ;;  %v3786_v30 = vld [vmem:[#allocation7 + $0x48] ss:$16 sps:$4 sm:$0xff]   ;;  %v3791_v31 = vld [vmem:[#allocation7 + $0x64] ss:$16 sps:$4 sm:$0xff]  }
  0xe0   :  { %1368 = vmatpush1.bf16.msra.mxu0 %v3699_v32  ;;  %1532 = vmatpush1.bf16.msra.mxu1 %v3702_v33  ;;  %v3794_v32 = vld [vmem:[#allocation7 + $0x6c] ss:$16 sps:$4 sm:$0xff]   ;;  %v3789_v33 = vld [vmem:[#allocation7 + $0x60] ss:$16 sps:$4 sm:$0xff]  }
  0xe1   :  { %1369 = vmatprep.subr.bf16.mxu0 %v3707_v34  ;;  %1533 = vmatprep.subr.bf16.mxu1 %v3710_v35  ;;  %v3792_v34 = vld [vmem:[#allocation7 + $0x68] ss:$16 sps:$4 sm:$0xff]   ;;  %v3797_v35 = vld [vmem:[#allocation7 + $0x84] ss:$16 sps:$4 sm:$0xff]  }
  0xe4   :  { %1370 = vmatpush1.bf16.msra.mxu0 %v3705_v36  ;;  %1534 = vmatpush1.bf16.msra.mxu1 %v3708_v37  ;;  %v3800_v36 = vld [vmem:[#allocation7 + $0x8c] ss:$16 sps:$4 sm:$0xff]   ;;  %v3795_v37 = vld [vmem:[#allocation7 + $0x80] ss:$16 sps:$4 sm:$0xff]  }
  0xe5   :  { %1371 = vmatprep.subr.bf16.mxu0 %v3713_v38  ;;  %1535 = vmatprep.subr.bf16.mxu1 %v3716_v39  ;;  %v3798_v38 = vld [vmem:[#allocation7 + $0x88] ss:$16 sps:$4 sm:$0xff]   ;;  %v3803_v39 = vld [vmem:[#allocation7 + $0xa4] ss:$16 sps:$4 sm:$0xff]  }
  0xe8   :  { %1372 = vmatpush1.bf16.msra.mxu0 %v3711_v40  ;;  %1536 = vmatpush1.bf16.msra.mxu1 %v3714_v41  ;;  %v3806_v40 = vld [vmem:[#allocation7 + $0xac] ss:$16 sps:$4 sm:$0xff]   ;;  %v3801_v41 = vld [vmem:[#allocation7 + $0xa0] ss:$16 sps:$4 sm:$0xff]  }
  0xe9   :  { %1373 = vmatprep.subr.bf16.mxu0 %v3719_v42  ;;  %1537 = vmatprep.subr.bf16.mxu1 %v3722_v43  ;;  %v3804_v42 = vld [vmem:[#allocation7 + $0xa8] ss:$16 sps:$4 sm:$0xff]   ;;  %v3809_v43 = vld [vmem:[#allocation7 + $0xc4] ss:$16 sps:$4 sm:$0xff]  }
  0xec   :  { %1374 = vmatpush1.bf16.msra.mxu0 %v3717_v44  ;;  %1538 = vmatpush1.bf16.msra.mxu1 %v3720_v45  ;;  %v3812_v44 = vld [vmem:[#allocation7 + $0xcc] ss:$16 sps:$4 sm:$0xff]   ;;  %v3807_v45 = vld [vmem:[#allocation7 + $0xc0] ss:$16 sps:$4 sm:$0xff]  }
  0xed   :  { %1375 = vmatprep.subr.bf16.mxu0 %v3725_v46  ;;  %1539 = vmatprep.subr.bf16.mxu1 %v3728_v47  ;;  %v3810_v46 = vld [vmem:[#allocation7 + $0xc8] ss:$16 sps:$4 sm:$0xff]   ;;  %v3815_v47 = vld [vmem:[#allocation7 + $0xe4] ss:$16 sps:$4 sm:$0xff]  }
  0xf0   :  { %1376 = vmatpush1.bf16.msra.mxu0 %v3723_v48  ;;  %1540 = vmatpush1.bf16.msra.mxu1 %v3726_v49  ;;  %v3818_v48 = vld [vmem:[#allocation7 + $0xec] ss:$16 sps:$4 sm:$0xff]   ;;  %v3813_v49 = vld [vmem:[#allocation7 + $0xe0] ss:$16 sps:$4 sm:$0xff]  }
  0xf1   :  { %1377 = vmatprep.subr.bf16.mxu0 %v3731_v50  ;;  %1541 = vmatprep.subr.bf16.mxu1 %v3734_v51  ;;  %v3816_v50 = vld [vmem:[#allocation7 + $0xe8] ss:$16 sps:$4 sm:$0xff]   ;;  %v3821_v51 = vld [vmem:[#allocation7 + $0x104] ss:$16 sps:$4 sm:$0xff]  }
  0xf4   :  { %1378 = vmatpush1.bf16.msra.mxu0 %v3729_v52  ;;  %1542 = vmatpush1.bf16.msra.mxu1 %v3732_v53  ;;  %v3824_v52 = vld [vmem:[#allocation7 + $0x10c] ss:$16 sps:$4 sm:$0xff]   ;;  %v3819_v53 = vld [vmem:[#allocation7 + $0x100] ss:$16 sps:$4 sm:$0xff]  }
  0xf5   :  { %1379 = vmatprep.subr.bf16.mxu0 %v3737_v54  ;;  %1543 = vmatprep.subr.bf16.mxu1 %v3740_v55  ;;  %v3822_v54 = vld [vmem:[#allocation7 + $0x108] ss:$16 sps:$4 sm:$0xff]   ;;  %v3827_v55 = vld [vmem:[#allocation7 + $0x124] ss:$16 sps:$4 sm:$0xff]  }
  0xf8   :  { %1380 = vmatpush1.bf16.msra.mxu0 %v3735_v56  ;;  %1544 = vmatpush1.bf16.msra.mxu1 %v3738_v57  ;;  %v3830_v56 = vld [vmem:[#allocation7 + $0x12c] ss:$16 sps:$4 sm:$0xff]   ;;  %v3825_v57 = vld [vmem:[#allocation7 + $0x120] ss:$16 sps:$4 sm:$0xff]  }
  0xf9   :  { %1381 = vmatprep.subr.bf16.mxu0 %v3743_v58  ;;  %1545 = vmatprep.subr.bf16.mxu1 %v3746_v59  ;;  %v3828_v58 = vld [vmem:[#allocation7 + $0x128] ss:$16 sps:$4 sm:$0xff]   ;;  %v3833_v59 = vld [vmem:[#allocation7 + $0x144] ss:$16 sps:$4 sm:$0xff]  }
  0xfc   :  { %1382 = vmatpush1.bf16.msra.mxu0 %v3741_v60  ;;  %1546 = vmatpush1.bf16.msra.mxu1 %v3744_v61  ;;  %v3836_v60 = vld [vmem:[#allocation7 + $0x14c] ss:$16 sps:$4 sm:$0xff]   ;;  %v3831_v61 = vld [vmem:[#allocation7 + $0x140] ss:$16 sps:$4 sm:$0xff]  }
  0xfd   :  { %1383 = vmatprep.subr.bf16.mxu0 %v3749_v62  ;;  %1547 = vmatprep.subr.bf16.mxu1 %v3752_v63  ;;  %v3834_v62 = vld [vmem:[#allocation7 + $0x148] ss:$16 sps:$4 sm:$0xff]   ;;  %v3839_v63 = vld [vmem:[#allocation7 + $0x164] ss:$16 sps:$4 sm:$0xff]  }
 0x100   :  { %1384 = vmatpush1.bf16.msra.mxu0 %v3747_v0  ;;  %1548 = vmatpush1.bf16.msra.mxu1 %v3750_v1  ;;  %v3842_v0 = vld [vmem:[#allocation7 + $0x16c] ss:$16 sps:$4 sm:$0xff]   ;;  %v3837_v1 = vld [vmem:[#allocation7 + $0x160] ss:$16 sps:$4 sm:$0xff]  }
 0x101   :  { %1385 = vmatprep.subr.bf16.mxu0 %v3755_v2  ;;  %1549 = vmatprep.subr.bf16.mxu1 %v3758_v3  ;;  %v3840_v2 = vld [vmem:[#allocation7 + $0x168] ss:$16 sps:$4 sm:$0xff]   ;;  %v3845_v3 = vld [vmem:[#allocation7 + $0x184] ss:$16 sps:$4 sm:$0xff]  }
 0x104   :  { %1386 = vmatpush1.bf16.msra.mxu0 %v3753_v4  ;;  %1550 = vmatpush1.bf16.msra.mxu1 %v3756_v5  ;;  %v3848_v4 = vld [vmem:[#allocation7 + $0x18c] ss:$16 sps:$4 sm:$0xff]   ;;  %v3843_v5 = vld [vmem:[#allocation7 + $0x180] ss:$16 sps:$4 sm:$0xff]  }
 0x105   :  { %1387 = vmatprep.subr.bf16.mxu0 %v3761_v6  ;;  %1551 = vmatprep.subr.bf16.mxu1 %v3764_v7  ;;  %v3846_v6 = vld [vmem:[#allocation7 + $0x188] ss:$16 sps:$4 sm:$0xff]   ;;  %v3851_v7 = vld [vmem:[#allocation7 + $0x1a4] ss:$16 sps:$4 sm:$0xff]  }
 0x108   :  { %1388 = vmatpush1.bf16.msra.mxu0 %v3759_v8  ;;  %1552 = vmatpush1.bf16.msra.mxu1 %v3762_v9  ;;  %v3854_v8 = vld [vmem:[#allocation7 + $0x1ac] ss:$16 sps:$4 sm:$0xff]   ;;  %v3849_v9 = vld [vmem:[#allocation7 + $0x1a0] ss:$16 sps:$4 sm:$0xff]  }
 0x109   :  { %1398 = vmatprep.subr.bf16.mxu0 %v3767_v11  ;;  %1562 = vmatprep.subr.bf16.mxu1 %v3770_v12  ;;  %v3857_v11 = vld [vmem:[#allocation7 + $0x1c4] ss:$16 sps:$4 sm:$0xff]   ;;  %v3860_v12 = vld [vmem:[#allocation7 + $0x1cc] ss:$16 sps:$4 sm:$0xff]  }
 0x10b   :  { %1390 = vmatmul.mubr.bf16.vlgmr.msra.gmra.mrb[0].mxu0 %v92_v15  ;;  %1554 = vmatmul.mubr.bf16.vlgmr.msra.gmra.mrb[0].mxu1 %v92_v15  ;;  %v3863_v15 = vld [vmem:[#allocation7 + $0x1e4] ss:$16 sps:$4 sm:$0xff]  }
 0x10c   :  { %1399 = vmatpush1.bf16.msra.mxu0 %v3765_v13  ;;  %1563 = vmatpush1.bf16.msra.mxu1 %v3768_v14  ;;  %v3855_v13 = vld [vmem:[#allocation7 + $0x1c0] ss:$16 sps:$4 sm:$0xff]   ;;  %v3858_v14 = vld [vmem:[#allocation7 + $0x1c8] ss:$16 sps:$4 sm:$0xff]  }
 0x10d   :  { %1430 = vmatprep.mubr.bf16.mxu0 %v4121_v18  ;;  %1594 = vmatprep.mubr.bf16.mxu1 %v4121_v18 }
 0x10e   :  { %2437 = vmatprep.subr.bf16.mxu0 %v3773_v16  ;;  %2519 = vmatprep.subr.bf16.mxu1 %v3776_v17  ;;  %v3866_v16 = vld [vmem:[#allocation7 + $0x1ec] ss:$16 sps:$4 sm:$0xff]   ;;  %v3861_v17 = vld [vmem:[#allocation7 + $0x1e0] ss:$16 sps:$4 sm:$0xff]  }
 0x117   :  { %3225 = vmatmul.mubr.msk.bf16.vlgmr.msra.gmra.mrb[0].mxu0 %vm1271_vm0, %v94_v22  ;;  %3226 = vmatmul.mubr.msk.bf16.vlgmr.msra.gmra.mrb[0].mxu1 %vm1271_vm0, %v94_v22  ;;  %v4122_v22 = vmov 1966171168  }
 0x118   :  { %2438 = vmatpush1.bf16.msra.mxu0 %v3771_v20  ;;  %2520 = vmatpush1.bf16.msra.mxu1 %v3774_v21  ;;  %v3869_v20 = vld [vmem:[#allocation7 + $0x204] ss:$16 sps:$4 sm:$0xff]   ;;  %v3872_v21 = vld [vmem:[#allocation7 + $0x20c] ss:$16 sps:$4 sm:$0xff]  }
 0x119   :  { %2439 = vmatprep.subr.bf16.mxu0 %v3779_v23  ;;  %2521 = vmatprep.subr.bf16.mxu1 %v3782_v24  ;;  %v1618_v23 = vunpack.c.l.s4 %v4122_v22  ;;  %v1620_v24 = vlaneseq  ;;  %v3909_v22 = vld [vmem:[#allocation7 + $0x2e0] ss:$16 sps:$4 sm:$0xff]  }
 0x11c   :  { %2440 = vmatpush1.bf16.msra.mxu0 %v3777_v25  ;;  %2522 = vmatpush1.bf16.msra.mxu1 %v3780_v26  ;;  %v1619_v25 = vunpack.c.0.s8 %v1618_v23  ;;  %v1621_v26 = vshrl.u32 %v1620_v24, 7  ;;  %v3912_v23 = vld [vmem:[#allocation7 + $0x2e8] ss:$16 sps:$4 sm:$0xff]   ;;  %v3917_v24 = vld [vmem:[#allocation7 + $0x304] ss:$16 sps:$4 sm:$0xff]  }
 0x11d   :  { %2441 = vmatprep.subr.bf16.mxu0 %v3785_v27  ;;  %2523 = vmatprep.subr.bf16.mxu1 %v3788_v28  ;;  %v3227_v27 = vld.sshfl [vmem:[%s4277_s2] sm:$0x33 pattern:$0x75316420] }
 0x11e   :  { %v4223_v28 = vsub.s32 %v1619_v25, %v1621_v26  ;;  %v3920_v25 = vld [vmem:[#allocation7 + $0x30c] ss:$16 sps:$4 sm:$0xff]  }
 0x120   :  { %2442 = vmatpush1.bf16.msra.mxu0 %v3783_v29  ;;  %2524 = vmatpush1.bf16.msra.mxu1 %v3786_v30  ;;  %v1616_v29 = vcombine.high %v3227_v27, %v3227_v27 }
 0x121   :  { %2443 = vmatprep.subr.bf16.mxu0 %v3791_v31  ;;  %2525 = vmatprep.subr.bf16.mxu1 %v3794_v32  ;;  %v4227_v31 = vrot.slane %v3227_v27, %v4223_v28  ;;  %v3918_v27 = vld [vmem:[#allocation7 + $0x308] ss:$16 sps:$4 sm:$0xff]  }
 0x122   :  { %v1630_v30 = vrot.slane %v1616_v29, %v4223_v28  ;;  %v3923_v29 = vld [vmem:[#allocation7 + $0x324] ss:$16 sps:$4 sm:$0xff]  }
 0x124   :  { %2444 = vmatpush1.bf16.msra.mxu0 %v3789_v33  ;;  %2526 = vmatpush1.bf16.msra.mxu1 %v3792_v34  ;;  %v1632_v32 = vcombine.high %v1630_v30, %v1630_v30  ;;  %v1634_v33 = vpack.i.b16 %v4227_v31, %v4227_v31  ;;  %v4231_v34 = vsub.s32 0, %v1621_v26  ;;  %v3915_v26 = vld [vmem:[#allocation7 + $0x300] ss:$16 sps:$4 sm:$0xff]  }
 0x125   :  { %2445 = vmatprep.subr.bf16.mxu0 %v3797_v35  ;;  %2527 = vmatprep.subr.bf16.mxu1 %v3800_v36  ;;  %v1641_v35 = vpack.i.b16 %v1630_v30, %v1630_v30  ;;  %v3926_v30 = vld [vmem:[#allocation7 + $0x32c] ss:$16 sps:$4 sm:$0xff]  }
 0x126   :  { %v1655_v36 = vpack.i.b16 %v1632_v32, %v1632_v32  ;;  %v3921_v32 = vld [vmem:[#allocation7 + $0x320] ss:$16 sps:$4 sm:$0xff]  }
 0x128   :  { %2446 = vmatpush1.bf16.msra.mxu0 %v3795_v37  ;;  %2528 = vmatpush1.bf16.msra.mxu1 %v3798_v38  ;;  %v1639_v37 = vrot.slane %v1634_v33, %v4231_v34  ;;  %v3924_v33 = vld [vmem:[#allocation7 + $0x328] ss:$16 sps:$4 sm:$0xff]  }
 0x129   :  { %2447 = vmatprep.subr.bf16.mxu0 %v3803_v39  ;;  %2529 = vmatprep.subr.bf16.mxu1 %v3806_v40  ;;  %v1646_v40 = vrot.slane %v1641_v35, %v4231_v34  ;;  %v3929_v35 = vld [vmem:[#allocation7 + $0x344] ss:$16 sps:$4 sm:$0xff]  }
 0x12c   :  { %2448 = vmatpush1.bf16.msra.mxu0 %v3801_v41  ;;  %2530 = vmatpush1.bf16.msra.mxu1 %v3804_v42 }
 0x12d   :  { %2449 = vmatprep.subr.bf16.mxu0 %v3809_v43  ;;  %2531 = vmatprep.subr.bf16.mxu1 %v3812_v44  ;;  %v1660_v44 = vrot.slane %v1655_v36, %v4231_v34  ;;  %v3932_v36 = vld [vmem:[#allocation7 + $0x34c] ss:$16 sps:$4 sm:$0xff]  }
 0x130   :  { %2450 = vmatpush1.bf16.msra.mxu0 %v3807_v45  ;;  %2532 = vmatpush1.bf16.msra.mxu1 %v3810_v46 }
 0x131   :  { %2451 = vmatprep.subr.bf16.mxu0 %v3815_v47  ;;  %2533 = vmatprep.subr.bf16.mxu1 %v3818_v48 }
 0x134   :  { %2452 = vmatpush1.bf16.msra.mxu0 %v3813_v49  ;;  %2534 = vmatpush1.bf16.msra.mxu1 %v3816_v50 }
 0x135   :  { %2453 = vmatprep.subr.bf16.mxu0 %v3821_v51  ;;  %2535 = vmatprep.subr.bf16.mxu1 %v3824_v52 }
 0x138   :  { %2454 = vmatpush1.bf16.msra.mxu0 %v3819_v53  ;;  %2536 = vmatpush1.bf16.msra.mxu1 %v3822_v54 }
 0x139   :  { %2455 = vmatprep.subr.bf16.mxu0 %v3827_v55  ;;  %2537 = vmatprep.subr.bf16.mxu1 %v3830_v56  ;;  %v3867_v55 = vld [vmem:[#allocation7 + $0x200] ss:$16 sps:$4 sm:$0xff]   ;;  %v3870_v56 = vld [vmem:[#allocation7 + $0x208] ss:$16 sps:$4 sm:$0xff]  }
 0x13c   :  { %2456 = vmatpush1.bf16.msra.mxu0 %v3825_v57  ;;  %2538 = vmatpush1.bf16.msra.mxu1 %v3828_v58  ;;  %v3875_v58 = vld [vmem:[#allocation7 + $0x224] ss:$16 sps:$4 sm:$0xff]  }
 0x13d   :  { %2457 = vmatprep.subr.bf16.mxu0 %v3833_v59  ;;  %2539 = vmatprep.subr.bf16.mxu1 %v3836_v60  ;;  %v3878_v59 = vld [vmem:[#allocation7 + $0x22c] ss:$16 sps:$4 sm:$0xff]  }
 0x140   :  { %2458 = vmatpush1.bf16.msra.mxu0 %v3831_v61  ;;  %2540 = vmatpush1.bf16.msra.mxu1 %v3834_v62  ;;  %v3873_v61 = vld [vmem:[#allocation7 + $0x220] ss:$16 sps:$4 sm:$0xff]   ;;  %v3876_v62 = vld [vmem:[#allocation7 + $0x228] ss:$16 sps:$4 sm:$0xff]  }
 0x141   :  { %2459 = vmatprep.subr.bf16.mxu0 %v3839_v63  ;;  %2541 = vmatprep.subr.bf16.mxu1 %v3842_v0  ;;  %v3881_v63 = vld [vmem:[#allocation7 + $0x244] ss:$16 sps:$4 sm:$0xff]   ;;  %v3884_v0 = vld [vmem:[#allocation7 + $0x24c] ss:$16 sps:$4 sm:$0xff]  }
 0x144   :  { %2460 = vmatpush1.bf16.msra.mxu0 %v3837_v1  ;;  %2542 = vmatpush1.bf16.msra.mxu1 %v3840_v2  ;;  %v3879_v1 = vld [vmem:[#allocation7 + $0x240] ss:$16 sps:$4 sm:$0xff]   ;;  %v3882_v2 = vld [vmem:[#allocation7 + $0x248] ss:$16 sps:$4 sm:$0xff]  }
 0x145   :  { %2461 = vmatprep.subr.bf16.mxu0 %v3845_v3  ;;  %2543 = vmatprep.subr.bf16.mxu1 %v3848_v4  ;;  %v3887_v3 = vld [vmem:[#allocation7 + $0x264] ss:$16 sps:$4 sm:$0xff]   ;;  %v3890_v4 = vld [vmem:[#allocation7 + $0x26c] ss:$16 sps:$4 sm:$0xff]  }
 0x148   :  { %2462 = vmatpush1.bf16.msra.mxu0 %v3843_v5  ;;  %2544 = vmatpush1.bf16.msra.mxu1 %v3846_v6  ;;  %v3885_v5 = vld [vmem:[#allocation7 + $0x260] ss:$16 sps:$4 sm:$0xff]   ;;  %v3888_v6 = vld [vmem:[#allocation7 + $0x268] ss:$16 sps:$4 sm:$0xff]  }
 0x149   :  { %2463 = vmatprep.subr.bf16.mxu0 %v3851_v7  ;;  %2545 = vmatprep.subr.bf16.mxu1 %v3854_v8  ;;  %v3893_v7 = vld [vmem:[#allocation7 + $0x284] ss:$16 sps:$4 sm:$0xff]   ;;  %v3896_v8 = vld [vmem:[#allocation7 + $0x28c] ss:$16 sps:$4 sm:$0xff]  }
 0x14c   :  { %2464 = vmatpush1.bf16.msra.mxu0 %v3849_v9  ;;  %2546 = vmatpush1.bf16.msra.mxu1 %v3852_v10  ;;  %v3891_v9 = vld [vmem:[#allocation7 + $0x280] ss:$16 sps:$4 sm:$0xff]   ;;  %v3894_v10 = vld [vmem:[#allocation7 + $0x288] ss:$16 sps:$4 sm:$0xff]  }
 0x14d   :  { %2465 = vmatprep.subr.bf16.mxu0 %v3857_v11  ;;  %2547 = vmatprep.subr.bf16.mxu1 %v3860_v12  ;;  %v3899_v11 = vld [vmem:[#allocation7 + $0x2a4] ss:$16 sps:$4 sm:$0xff]   ;;  %v3902_v12 = vld [vmem:[#allocation7 + $0x2ac] ss:$16 sps:$4 sm:$0xff]  }
 0x150   :  { %2466 = vmatpush1.bf16.msra.mxu0 %v3855_v13  ;;  %2548 = vmatpush1.bf16.msra.mxu1 %v3858_v14  ;;  %v3897_v13 = vld [vmem:[#allocation7 + $0x2a0] ss:$16 sps:$4 sm:$0xff]   ;;  %v3900_v14 = vld [vmem:[#allocation7 + $0x2a8] ss:$16 sps:$4 sm:$0xff]  }
 0x151   :  { %2467 = vmatprep.subr.bf16.mxu0 %v3863_v15  ;;  %2549 = vmatprep.subr.bf16.mxu1 %v3866_v16  ;;  %v3905_v15 = vld [vmem:[#allocation7 + $0x2c4] ss:$16 sps:$4 sm:$0xff]   ;;  %v3908_v16 = vld [vmem:[#allocation7 + $0x2cc] ss:$16 sps:$4 sm:$0xff]  }
 0x154   :  { %2468 = vmatpush1.bf16.msra.mxu0 %v3861_v17  ;;  %2550 = vmatpush1.bf16.msra.mxu1 %v3864_v19  ;;  %v3903_v17 = vld [vmem:[#allocation7 + $0x2c0] ss:$16 sps:$4 sm:$0xff]   ;;  %v3906_v19 = vld [vmem:[#allocation7 + $0x2c8] ss:$16 sps:$4 sm:$0xff]  }
 0x155   :  { %2478 = vmatprep.subr.bf16.mxu0 %v3869_v20  ;;  %2560 = vmatprep.subr.bf16.mxu1 %v3872_v21  ;;  %v3911_v20 = vld [vmem:[#allocation7 + $0x2e4] ss:$16 sps:$4 sm:$0xff]   ;;  %v3914_v21 = vld [vmem:[#allocation7 + $0x2ec] ss:$16 sps:$4 sm:$0xff]  }
 0x1ea   :  { %v1432_v38 = vpop.f32.mrb[0].mxu0  ;;  %v4234_v39 = vpop.f32.mrb[0].mxu1 }
 0x1eb   :  { %v1603_v41 = vpack.c.bf16 %v1432_v38, %v1432_v38  ;;  %v1434_v42 = vpop.f32.mrb[1].mxu0  ;;  %v1598_v43 = vpop.f32.mrb[1].mxu1  ;;  %v3930_v38 = vld [vmem:[#allocation7 + $0x348] ss:$16 sps:$4 sm:$0xff]  }
 0x1ec   :  { %v1604_v45 = vpack.c.bf16 %v1434_v42, %v1434_v42  ;;  %v1606_v46 = vpack.c.bf16 %v1598_v43, %v1598_v43  ;;  %v1436_v47 = vpop.f32.mrb[2].mxu0  ;;  %v1600_v48 = vpop.f32.mrb[2].mxu1  ;;  %v3933_v42 = vld [vmem:[#allocation7 + $0x360] ss:$16 sps:$4 sm:$0xff]   ;;  %v3936_v43 = vld [vmem:[#allocation7 + $0x368] ss:$16 sps:$4 sm:$0xff]  }
 0x1ed   :  { %v1661_v49 = vadd.bf16 %v1639_v37, %v1603_v41  ;;  %v1437_v50 = vpop.f32.mrb[3].mxu0  ;;  %v1601_v51 = vpop.f32.mrb[3].mxu1  ;;  %v3927_v37 = vld [vmem:[#allocation7 + $0x340] ss:$16 sps:$4 sm:$0xff]   ;;  %v3938_v41 = vld [vmem:[#allocation7 + $0x36c] ss:$16 sps:$4 sm:$0xff]   ;;  %v1631_v48 = vcombine.high %v4227_v31, %v4227_v31  ;;  %v1605_v31 = vpack.c.bf16 %v4234_v39, %v4234_v39 }
 0x1ee   :  { %v1662_v52 = vadd.bf16 %v1646_v40, %v1604_v45  ;;  %v1664_v53 = vadd.bf16 %v1660_v44, %v1606_v46  ;;  %v3935_v40 = vld [vmem:[#allocation7 + $0x364] ss:$16 sps:$4 sm:$0xff]   ;;  %v3944_v45 = vld [vmem:[#allocation7 + $0x38c] ss:$16 sps:$4 sm:$0xff]   ;;  %v3939_v46 = vld [vmem:[#allocation7 + $0x380] ss:$16 sps:$4 sm:$0xff]  }
 0x1ef   :  { %v1665_v57 = vmax.bf16 %v4121_v18, %v1661_v49  ;;  %v3941_v44 = vld [vmem:[#allocation7 + $0x384] ss:$16 sps:$4 sm:$0xff]   ;;  %v3942_v47 = vld [vmem:[#allocation7 + $0x388] ss:$16 sps:$4 sm:$0xff]   ;;  %v3950_v50 = vld [vmem:[#allocation7 + $0x3ac] ss:$16 sps:$4 sm:$0xff]  }
 0x1f0   :  { %v1666_v54 = vmax.bf16 %v4121_v18, %v1662_v52  ;;  %v1668_v60 = vmax.bf16 %v4121_v18, %v1664_v53  ;;  %v3947_v49 = vld [vmem:[#allocation7 + $0x3a4] ss:$16 sps:$4 sm:$0xff]   ;;  %v3945_v51 = vld [vmem:[#allocation7 + $0x3a0] ss:$16 sps:$4 sm:$0xff]   ;;  %v3948_v52 = vld [vmem:[#allocation7 + $0x3a8] ss:$16 sps:$4 sm:$0xff]   ;;  %v1648_v53 = vpack.i.b16 %v1631_v48, %v1631_v48 }
 0x1f2   :  { %2469 = vmatprep.mubr.bf16.mxu0 %v1666_v54  ;;  %2551 = vmatprep.mubr.bf16.mxu1 %v1666_v54  ;;  %v3953_v54 = vld [vmem:[#allocation7 + $0x3c4] ss:$16 sps:$4 sm:$0xff]  }
 0x1f3   :  { %2470 = vmatmul.mubr.bf16.vlgmr.msra.gmra.mrb[4].mxu0 %v1665_v57  ;;  %2552 = vmatmul.mubr.bf16.vlgmr.msra.gmra.mrb[4].mxu1 %v1665_v57  ;;  %v3954_v57 = vld [vmem:[#allocation7 + $0x3c8] ss:$16 sps:$4 sm:$0xff]  }
 0x1f4   :  { %2479 = vmatpush1.bf16.msra.mxu0 %v3867_v55  ;;  %2561 = vmatpush1.bf16.msra.mxu1 %v3870_v56  ;;  %v3956_v55 = vld [vmem:[#allocation7 + $0x3cc] ss:$16 sps:$4 sm:$0xff]   ;;  %v3951_v56 = vld [vmem:[#allocation7 + $0x3c0] ss:$16 sps:$4 sm:$0xff]  }
 0x1f5   :  { %2510 = vmatprep.mubr.bf16.mxu0 %v1668_v60  ;;  %2592 = vmatprep.mubr.bf16.mxu1 %v1668_v60  ;;  %v3962_v60 = vld [vmem:[#allocation7 + $0x3ec] ss:$16 sps:$4 sm:$0xff]  }
 0x1f6   :  { %2480 = vmatprep.subr.bf16.mxu0 %v3875_v58  ;;  %2562 = vmatprep.subr.bf16.mxu1 %v3878_v59  ;;  %v1653_v58 = vrot.slane %v1648_v53, %v4231_v34  ;;  %v3959_v59 = vld [vmem:[#allocation7 + $0x3e4] ss:$16 sps:$4 sm:$0xff]  }
 0x1f8   :  { %2481 = vmatpush1.bf16.msra.mxu0 %v3873_v61  ;;  %2563 = vmatpush1.bf16.msra.mxu1 %v3876_v62  ;;  %v3957_v61 = vld [vmem:[#allocation7 + $0x3e0] ss:$16 sps:$4 sm:$0xff]   ;;  %v3960_v62 = vld [vmem:[#allocation7 + $0x3e8] ss:$16 sps:$4 sm:$0xff]  }
 0x1f9   :  { %2482 = vmatprep.subr.bf16.mxu0 %v3881_v63  ;;  %2564 = vmatprep.subr.bf16.mxu1 %v3884_v0  ;;  %v1663_v63 = vadd.bf16 %v1653_v58, %v1605_v31  ;;  %v3963_v0 = vld [vmem:[#allocation8 + $0x40] sm:$0xff]  }
 0x1fb   :  { %v1667_v39 = vmax.bf16 %v4121_v18, %v1663_v63 }
 0x1fc   :  { %2483 = vmatpush1.bf16.msra.mxu0 %v3879_v1  ;;  %2565 = vmatpush1.bf16.msra.mxu1 %v3882_v2  ;;  %v3964_v1 = vld [vmem:[#allocation8 + $0xc0] sm:$0xff]  }
 0x1fd   :  { %2484 = vmatprep.subr.bf16.mxu0 %v3887_v3  ;;  %2566 = vmatprep.subr.bf16.mxu1 %v3890_v4  ;;  %v3965_v2 = vld [vmem:[#allocation8] sm:$0xff]   ;;  %v3967_v4 = vld [vmem:[#allocation8 + $0x48] sm:$0xff]  }
 0x1fe   :  { %v3966_v3 = vld [vmem:[#allocation8 + $0x80] sm:$0xff]  }
 0x200   :  { %2485 = vmatpush1.bf16.msra.mxu0 %v3885_v5  ;;  %2567 = vmatpush1.bf16.msra.mxu1 %v3888_v6  ;;  %v3968_v5 = vld [vmem:[#allocation8 + $0xc8] sm:$0xff]  }
 0x201   :  { %2486 = vmatprep.subr.bf16.mxu0 %v3893_v7  ;;  %2568 = vmatprep.subr.bf16.mxu1 %v3896_v8  ;;  %v3969_v6 = vld [vmem:[#allocation8 + $0x8] sm:$0xff]   ;;  %v3971_v8 = vld [vmem:[#allocation8 + $0x50] sm:$0xff]  }
 0x202   :  { %v3970_v7 = vld [vmem:[#allocation8 + $0x88] sm:$0xff]  }
 0x204   :  { %2487 = vmatpush1.bf16.msra.mxu0 %v3891_v9  ;;  %2569 = vmatpush1.bf16.msra.mxu1 %v3894_v10  ;;  %v3972_v9 = vld [vmem:[#allocation8 + $0xd0] sm:$0xff]  }
 0x205   :  { %2488 = vmatprep.subr.bf16.mxu0 %v3899_v11  ;;  %2570 = vmatprep.subr.bf16.mxu1 %v3902_v12  ;;  %v3973_v10 = vld [vmem:[#allocation8 + $0x10] sm:$0xff]   ;;  %v3975_v12 = vld [vmem:[#allocation8 + $0x58] sm:$0xff]  }
 0x206   :  { %v3974_v11 = vld [vmem:[#allocation8 + $0x90] sm:$0xff]  }
 0x208   :  { %2489 = vmatpush1.bf16.msra.mxu0 %v3897_v13  ;;  %2571 = vmatpush1.bf16.msra.mxu1 %v3900_v14  ;;  %v3976_v13 = vld [vmem:[#allocation8 + $0xd8] sm:$0xff]  }
 0x209   :  { %2490 = vmatprep.subr.bf16.mxu0 %v3905_v15  ;;  %2572 = vmatprep.subr.bf16.mxu1 %v3908_v16  ;;  %v3977_v14 = vld [vmem:[#allocation8 + $0x18] sm:$0xff]   ;;  %v3979_v16 = vld [vmem:[#allocation8 + $0x60] sm:$0xff]  }
 0x20a   :  { %v3978_v15 = vld [vmem:[#allocation8 + $0x98] sm:$0xff]  }
 0x20c   :  { %2491 = vmatpush1.bf16.msra.mxu0 %v3903_v17  ;;  %2573 = vmatpush1.bf16.msra.mxu1 %v3906_v19  ;;  %v3980_v17 = vld [vmem:[#allocation8 + $0xe0] sm:$0xff]  }
 0x20d   :  { %2492 = vmatprep.subr.bf16.mxu0 %v3911_v20  ;;  %2574 = vmatprep.subr.bf16.mxu1 %v3914_v21  ;;  %v3981_v19 = vld [vmem:[#allocation8 + $0x20] sm:$0xff]   ;;  %v3983_v21 = vld [vmem:[#allocation8 + $0x68] sm:$0xff]  }
 0x20e   :  { %v3982_v20 = vld [vmem:[#allocation8 + $0xa0] sm:$0xff]  }
 0x210   :  { %2493 = vmatpush1.bf16.msra.mxu0 %v3909_v22  ;;  %2575 = vmatpush1.bf16.msra.mxu1 %v3912_v23  ;;  %v3984_v22 = vld [vmem:[#allocation8 + $0xe8] sm:$0xff]  }
 0x211   :  { %2494 = vmatprep.subr.bf16.mxu0 %v3917_v24  ;;  %2576 = vmatprep.subr.bf16.mxu1 %v3920_v25  ;;  %v3985_v23 = vld [vmem:[#allocation8 + $0x28] sm:$0xff]   ;;  %v3987_v25 = vld [vmem:[#allocation8 + $0x70] sm:$0xff]  }
 0x212   :  { %v3986_v24 = vld [vmem:[#allocation8 + $0xa8] sm:$0xff]  }
 0x214   :  { %2495 = vmatpush1.bf16.msra.mxu0 %v3915_v26  ;;  %2577 = vmatpush1.bf16.msra.mxu1 %v3918_v27  ;;  %v3988_v26 = vld [vmem:[#allocation8 + $0xf0] sm:$0xff]  }
 0x215   :  { %2496 = vmatprep.subr.bf16.mxu0 %v3923_v29  ;;  %2578 = vmatprep.subr.bf16.mxu1 %v3926_v30  ;;  %v3989_v27 = vld [vmem:[#allocation8 + $0x30] sm:$0xff]   ;;  %v3991_v30 = vld [vmem:[#allocation8 + $0x78] sm:$0xff]  }
 0x216   :  { %v3990_v29 = vld [vmem:[#allocation8 + $0xb0] sm:$0xff]  }
 0x218   :  { %2497 = vmatpush1.bf16.msra.mxu0 %v3921_v32  ;;  %2579 = vmatpush1.bf16.msra.mxu1 %v3924_v33  ;;  %v3992_v32 = vld [vmem:[#allocation8 + $0xf8] sm:$0xff]  }
 0x219   :  { %2498 = vmatprep.subr.bf16.mxu0 %v3929_v35  ;;  %2580 = vmatprep.subr.bf16.mxu1 %v3932_v36  ;;  %v3993_v33 = vld [vmem:[#allocation8 + $0x38] sm:$0xff]   ;;  %v3356_v36 = vld.sshfl [vmem:[%s4279_s4] sm:$0x33 pattern:$0x75316420] }
 0x21a   :  { %v3994_v35 = vld [vmem:[#allocation8 + $0xb8] sm:$0xff]  }
 0x21c   :  { %2499 = vmatpush1.bf16.msra.mxu0 %v3927_v37  ;;  %2581 = vmatpush1.bf16.msra.mxu1 %v3930_v38  ;;  %v2614_v37 = vcombine.high %v3356_v36, %v3356_v36  ;;  %v2621_v38 = vrot.slane %v3356_v36, %v4223_v28 }
 0x21d   :  { %2500 = vmatprep.subr.bf16.mxu0 %v3935_v40  ;;  %2582 = vmatprep.subr.bf16.mxu1 %v3938_v41 }
 0x21e   :  { %v2628_v40 = vrot.slane %v2614_v37, %v4223_v28  ;;  %v2629_v41 = vcombine.high %v2621_v38, %v2621_v38 }
 0x220   :  { %2501 = vmatpush1.bf16.msra.mxu0 %v3933_v42  ;;  %2583 = vmatpush1.bf16.msra.mxu1 %v3936_v43  ;;  %v2630_v42 = vcombine.high %v2628_v40, %v2628_v40  ;;  %v2632_v43 = vpack.i.b16 %v2621_v38, %v2621_v38 }
 0x221   :  { %2502 = vmatprep.subr.bf16.mxu0 %v3941_v44  ;;  %2584 = vmatprep.subr.bf16.mxu1 %v3944_v45  ;;  %v2646_v44 = vpack.i.b16 %v2629_v41, %v2629_v41  ;;  %v2639_v45 = vpack.i.b16 %v2628_v40, %v2628_v40 }
 0x223   :  { %v2651_v48 = vrot.slane %v2646_v44, %v4231_v34 }
 0x224   :  { %2503 = vmatpush1.bf16.msra.mxu0 %v3939_v46  ;;  %2585 = vmatpush1.bf16.msra.mxu1 %v3942_v47  ;;  %v2653_v46 = vpack.i.b16 %v2630_v42, %v2630_v42  ;;  %v2637_v47 = vrot.slane %v2632_v43, %v4231_v34 }
 0x225   :  { %2504 = vmatprep.subr.bf16.mxu0 %v3947_v49  ;;  %2586 = vmatprep.subr.bf16.mxu1 %v3950_v50 }
 0x228   :  { %2505 = vmatpush1.bf16.msra.mxu0 %v3945_v51  ;;  %2587 = vmatpush1.bf16.msra.mxu1 %v3948_v52  ;;  %v2644_v51 = vrot.slane %v2639_v45, %v4231_v34  ;;  %v2658_v52 = vrot.slane %v2653_v46, %v4231_v34 }
 0x229   :  { %2506 = vmatprep.subr.bf16.mxu0 %v3953_v54  ;;  %2588 = vmatprep.subr.bf16.mxu1 %v3956_v55 }
 0x22c   :  { %2507 = vmatpush1.bf16.msra.mxu0 %v3951_v56  ;;  %2589 = vmatpush1.bf16.msra.mxu1 %v3954_v57 }
 0x22d   :  { %2508 = vmatprep.subr.bf16.mxu0 %v3959_v59  ;;  %2590 = vmatprep.subr.bf16.mxu1 %v3962_v60 }
 0x230   :  { %2509 = vmatpush1.bf16.msra.mxu0 %v3957_v61  ;;  %2591 = vmatpush1.bf16.msra.mxu1 %v3960_v62 }
 0x231   :  { %3390 = vmatprep.subr.bf16.mxu0 %v3963_v0  ;;  %3412 = vmatprep.subr.bf16.mxu1 %v3964_v1 }
 0x233   :  { %2511 = vmatmul.mubr.bf16.vlgmr.msra.gmra.mrb[4].mxu0 %v1667_v39  ;;  %2593 = vmatmul.mubr.bf16.vlgmr.msra.gmra.mrb[4].mxu1 %v1667_v39 }
 0x234   :  { %3391 = vmatpush3.bf16.msra.mxu0 %v3965_v2  ;;  %3413 = vmatpush3.bf16.msra.mxu1 %v3966_v3 }
 0x235   :  { %3392 = vmatprep.subr.bf16.mxu0 %v3967_v4  ;;  %3414 = vmatprep.subr.bf16.mxu1 %v3968_v5  ;;  %v3357_v5 = vld [vmem:[%s4281_s6] ss:$0 sm:$0xff] }
 0x238   :  { %3393 = vmatpush3.bf16.msra.mxu0 %v3969_v6  ;;  %3415 = vmatpush3.bf16.msra.mxu1 %v3970_v7 }
 0x239   :  { %3394 = vmatprep.subr.bf16.mxu0 %v3971_v8  ;;  %3416 = vmatprep.subr.bf16.mxu1 %v3972_v9 }
 0x23c   :  { %3395 = vmatpush3.bf16.msra.mxu0 %v3973_v10  ;;  %3417 = vmatpush3.bf16.msra.mxu1 %v3974_v11 }
 0x23d   :  { %3396 = vmatprep.subr.bf16.mxu0 %v3975_v12  ;;  %3418 = vmatprep.subr.bf16.mxu1 %v3976_v13 }
 0x240   :  { %3397 = vmatpush3.bf16.msra.mxu0 %v3977_v14  ;;  %3419 = vmatpush3.bf16.msra.mxu1 %v3978_v15 }
 0x241   :  { %3398 = vmatprep.subr.bf16.mxu0 %v3979_v16  ;;  %3420 = vmatprep.subr.bf16.mxu1 %v3980_v17 }
 0x244   :  { %3399 = vmatpush3.bf16.msra.mxu0 %v3981_v19  ;;  %3421 = vmatpush3.bf16.msra.mxu1 %v3982_v20 }
 0x245   :  { %3400 = vmatprep.subr.bf16.mxu0 %v3983_v21  ;;  %3422 = vmatprep.subr.bf16.mxu1 %v3984_v22 }
 0x248   :  { %3401 = vmatpush3.bf16.msra.mxu0 %v3985_v23  ;;  %3423 = vmatpush3.bf16.msra.mxu1 %v3986_v24 }
 0x249   :  { %3402 = vmatprep.subr.bf16.mxu0 %v3987_v25  ;;  %3424 = vmatprep.subr.bf16.mxu1 %v3988_v26 }
 0x24c   :  { %3403 = vmatpush3.bf16.msra.mxu0 %v3989_v27  ;;  %3425 = vmatpush3.bf16.msra.mxu1 %v3990_v29 }
 0x24d   :  { %3404 = vmatprep.subr.bf16.mxu0 %v3991_v30  ;;  %3426 = vmatprep.subr.bf16.mxu1 %v3992_v32 }
 0x250   :  { %3405 = vmatpush3.bf16.msra.mxu0 %v3993_v33  ;;  %3427 = vmatpush3.bf16.msra.mxu1 %v3994_v35 }
 0x306   :  { %v2512_v49 = vpop.f32.mrb[4].mxu0  ;;  %v2594_v50 = vpop.f32.mrb[4].mxu1 }
 0x307   :  { %v2601_v53 = vpack.c.bf16 %v2512_v49, %v2512_v49  ;;  %v2603_v54 = vpack.c.bf16 %v2594_v50, %v2594_v50  ;;  %v2514_v55 = vpop.f32.mrb[5].mxu0  ;;  %v2596_v28 = vpop.f32.mrb[5].mxu1 }
 0x308   :  { %v2602_v56 = vpack.c.bf16 %v2514_v55, %v2514_v55  ;;  %v2604_v57 = vpack.c.bf16 %v2596_v28, %v2596_v28  ;;  %v2516_v31 = vpop.f32.mrb[6].mxu0  ;;  %v2598_v58 = vpop.f32.mrb[6].mxu1 }
 0x309   :  { %v2659_v59 = vadd.bf16 %v2637_v47, %v2601_v53  ;;  %v2661_v60 = vadd.bf16 %v2651_v48, %v2603_v54  ;;  %v2517_v61 = vpop.f32.mrb[7].mxu0  ;;  %v2599_v62 = vpop.f32.mrb[7].mxu1 }
 0x30a   :  { %v2660_v63 = vadd.bf16 %v2644_v51, %v2602_v56  ;;  %v2662_v0 = vadd.bf16 %v2658_v52, %v2604_v57 }
 0x30b   :  { %v2663_v34 = vmax.bf16 %v4121_v18, %v2659_v59  ;;  %v2665_v3 = vmax.bf16 %v4121_v18, %v2661_v60 }
 0x30c   :  { %v2664_v1 = vmax.bf16 %v4121_v18, %v2660_v63  ;;  %v2666_v2 = vmax.bf16 %v4121_v18, %v2662_v0 }
 0x30e   :  { %2962 = vmatprep.mubr.bf16.mxu0 %v2664_v1  ;;  %3002 = vmatprep.mubr.bf16.mxu1 %v2666_v2 }
 0x30f   :  { %2963 = vmatmul.mubr.bf16.vlgmr.msra.gmra.mrb[8].mxu0 %v2663_v34  ;;  %3003 = vmatmul.mubr.bf16.vlgmr.msra.gmra.mrb[8].mxu1 %v2665_v3 }
 0x3e2   :  { %v3406_v39 = vpop.f32.mrb[8].mxu0  ;;  %v3428_v4 = vpop.f32.mrb[8].mxu1 }
 0x3e3   :  { %v3407_v6 = vpop.f32.mrb[9].mxu0  ;;  %v3429_v7 = vpop.f32.mrb[9].mxu1 }
 0x3e4   :  { %v3408_v8 = vadd.f32 %v3407_v6, %v3406_v39  ;;  %v3430_v9 = vadd.f32 %v3429_v7, %v3428_v4  ;;  %v3409_v10 = vpop.f32.mrb[10].mxu0  ;;  %v3431_v11 = vpop.f32.mrb[10].mxu1 }
 0x3e5   :  { %v3410_v12 = vpop.f32.mrb[11].mxu0  ;;  %v3432_v13 = vpop.f32.mrb[11].mxu1 }
 0x3e6   :  { %v2965_v14 = vadd.f32 %v3408_v8, %v3357_v5 }
 0x3e8   :  { %v3005_v18 = vadd.f32 %v3430_v9, %v2965_v14 }
 0x3ea   :  { %v3010_v15 = vpack.c.bf16 %v3005_v18, %v3005_v18 }
 0x3ec   :  { %3011 = vst [vmem:[#allocation10] sm:$0xf] %v3010_v15 }
 0x3ed   :  { %4094 = shalt.err (!%p4091_p8)
}
 0x3ee   :  { %s4095_s10 = scalar_lea.hbm %s4282_s7, 64 }
 0x3ef   :  { %p4096_p9 = scmp.ne.s32.totalorder %s4282_s7, %s4095_s10  ;;  %p4099_p10 = scmp.lt.u32.totalorder %s4095_s10, %s4282_s7 }
 0x3f1   :  { %p4101_p11 = pnand %p4099_p10, %p4096_p9 }
 0x3f3   :  { %4104 = shalt.err (!%p4101_p11)
}
 0x3f4   :  { %3021 = dma.vmem_to_hbm [thread:$0]  %s3019_s30, 64, %s4282_s7, [#allocation4]  }
 0x3f5   :  { %4111 = dma.done.wait [#allocation4], 64  }
 0x3f6   :  { %4112 = vsyncadd [#allocation4], 4294967232 }
 0x3f7   :  { %3025 = vsyncpa [#allocation3], 1 }
 0x3f8   :  { %3026 = vsyncpa [#allocation6], 1 }
 0x3f9   :  { %3027 = vsyncpa [#allocation9], 1 }
 0x3fa   :  { %3028 = vsyncpa [#allocation4], 1 }

// kernel: tpu_custom_call.1
= control target key start
LH: loop header
LB: loop body
LE: loop exit
PB: predicated region body
PF: predicated region fallthrough
CT: control target
= control target key end

     0   :  { %12 = vsyncpa [#allocation3], 0  ;;  %s4275_s0 = inlined_call_operand.hbm [shape: f32[8,784], index: 0, kind: input, shape index: {}]   ;;  %s4276_s1 = inlined_call_operand.hbm [shape: bf16[784,512], index: 1, kind: input, shape index: {}]   ;;  %s4277_s2 = inlined_call_operand.vmem [shape: bf16[1,512], index: 2, kind: input, shape index: {}]   ;;  %s4278_s3 = inlined_call_operand.hbm [shape: bf16[512,512], index: 3, kind: input, shape index: {}]   ;;  %s4279_s4 = inlined_call_operand.vmem [shape: bf16[1,512], index: 4, kind: input, shape index: {}]   ;;  %s4280_s5 = inlined_call_operand.hbm [shape: bf16[512,128], index: 5, kind: input, shape index: {}]   ;;  %s4281_s6 = inlined_call_operand.vmem [shape: f32[1,128], index: 6, kind: input, shape index: {}]   ;;  %s4282_s7 = inlined_call_operand.hbm [shape: bf16[8,128], index: 7, kind: output, shape index: {}]  }
   0x1   :  { %13 = vsyncpa [#allocation6], 0 }
   0x2   :  { %14 = vsyncpa [#allocation9], 0 }
   0x3   :  { %15 = vsyncpa [#allocation4], 0  ;;  %s4113_s24 = smov [#allocation5]   ;;  %s3995_s28 = scalar_lea.hbm %s4276_s1, 25088 }
   0x4   :  { %s31_s25 = sshll.u32 %s4113_s24, 4  ;;  %p3996_p0 = scmp.ne.s32.totalorder %s4276_s1, %s3995_s28  ;;  %s32_s25 = int_to_ptr.vmem [resolvable:$true] %s31_s25 }
   0x5   :  { %p3999_p1 = scmp.lt.u32.totalorder %s3995_s28, %s4276_s1 }
   0x7   :  { %p4001_p2 = pnand %p3999_p1, %p3996_p0 }
   0x9   :  { %4004 = shalt.err (!%p4001_p2)
}
   0xa   :  { %s4005_s10 = scalar_lea.vmem %s32_s25, 25088  ;;  %p4010_p4 = scmp.lt.s32.totalorder %s32_s25, %s32_s25 }
   0xb   :  { %p4006_p3 = scmp.ne.s32.totalorder %s32_s25, %s4005_s10  ;;  %p4011_p5 = scmp.lt.s32.totalorder %s4005_s10, %s4005_s10 }
   0xd   :  { %p4012_p6 = por %p4011_p5, %p4010_p4 }
   0xf   :  { %p4013_p7 = pnand %p4012_p6, %p4006_p3 }
  0x11   :  { %4016 = shalt.err (!%p4013_p7)
}
  0x12   :  { %s4114_s11 = smov 256   ;;  %s4115_s12 = smov 16  }
  0x13   :  { %37 = dma.hbm_to_vmem [thread:$0]  %s4276_s1, 25088, %s32_s25, [#allocation6], %s4114_s11, %s4114_s11, %s4115_s12  }
  0x14   :  { %s4116_s15 = smov [#allocation2]   ;;  %s4117_s17 = smov [#allocation7]  }
  0x15   :  { %s22_s16 = sshll.u32 %s4116_s15, 4  ;;  %s45_s18 = sshll.u32 %s4117_s17, 4  ;;  %s23_s16 = int_to_ptr.vmem [resolvable:$true] %s22_s16  ;;  %s46_s18 = int_to_ptr.vmem [resolvable:$true] %s45_s18 }
  0x16   :  { %s4017_s21 = scalar_lea.hbm %s4275_s0, 896 }
  0x17   :  { %p4018_p8 = scmp.ne.s32.totalorder %s4275_s0, %s4017_s21  ;;  %p4021_p9 = scmp.lt.u32.totalorder %s4017_s21, %s4275_s0 }
  0x19   :  { %p4023_p10 = pnand %p4021_p9, %p4018_p8 }
  0x1b   :  { %4026 = shalt.err (!%p4023_p10)
}
  0x1c   :  { %s4027_s1 = scalar_lea.vmem %s23_s16, 896  ;;  %p4032_p12 = scmp.lt.s32.totalorder %s23_s16, %s23_s16 }
  0x1d   :  { %p4028_p11 = scmp.ne.s32.totalorder %s23_s16, %s4027_s1  ;;  %p4033_p13 = scmp.lt.s32.totalorder %s4027_s1, %s4027_s1 }
  0x1f   :  { %p4034_p0 = por %p4033_p13, %p4032_p12 }
  0x21   :  { %p4035_p1 = pnand %p4034_p0, %p4028_p11 }
  0x23   :  { %4038 = shalt.err (!%p4035_p1)
}
  0x24   :  { %25 = dma.hbm_to_vmem [thread:$0]  %s4275_s0, 896, %s23_s16, [#allocation3]  }
  0x25   :  { %s4039_s30 = scalar_lea.hbm %s4278_s3, 16384 }
  0x26   :  { %p4040_p2 = scmp.ne.s32.totalorder %s4278_s3, %s4039_s30  ;;  %p4043_p3 = scmp.lt.u32.totalorder %s4039_s30, %s4278_s3 }
  0x28   :  { %p4045_p4 = pnand %p4043_p3, %p4040_p2 }
  0x2a   :  { %4048 = shalt.err (!%p4045_p4)
}
  0x2b   :  { %s4049_s14 = scalar_lea.vmem %s46_s18, 16384  ;;  %p4054_p6 = scmp.lt.s32.totalorder %s46_s18, %s46_s18 }
  0x2c   :  { %p4050_p5 = scmp.ne.s32.totalorder %s46_s18, %s4049_s14  ;;  %p4055_p7 = scmp.lt.s32.totalorder %s4049_s14, %s4049_s14 }
  0x2e   :  { %p4056_p8 = por %p4055_p7, %p4054_p6 }
  0x30   :  { %p4057_p9 = pnand %p4056_p8, %p4050_p5 }
  0x32   :  { %4060 = shalt.err (!%p4057_p9)
}
  0x33   :  { %51 = dma.hbm_to_vmem [thread:$0]  %s4278_s3, 16384, %s46_s18, [#allocation6], %s4114_s11, %s4114_s11, %s4115_s12  }
  0x34   :  { %s4118_s16 = smov [#allocation8]   ;;  %s4061_s21 = scalar_lea.hbm %s4280_s5, 4096 }
  0x35   :  { %s59_s17 = sshll.u32 %s4118_s16, 4  ;;  %p4062_p10 = scmp.ne.s32.totalorder %s4280_s5, %s4061_s21  ;;  %s60_s17 = int_to_ptr.vmem [resolvable:$true] %s59_s17 }
  0x36   :  { %p4065_p11 = scmp.lt.u32.totalorder %s4061_s21, %s4280_s5 }
  0x38   :  { %p4067_p12 = pnand %p4065_p11, %p4062_p10 }
  0x3a   :  { %4070 = shalt.err (!%p4067_p12)
}
  0x3b   :  { %s4071_s1 = scalar_lea.vmem %s60_s17, 4096  ;;  %p4076_p0 = scmp.lt.s32.totalorder %s60_s17, %s60_s17 }
  0x3c   :  { %p4072_p13 = scmp.ne.s32.totalorder %s60_s17, %s4071_s1  ;;  %p4077_p1 = scmp.lt.s32.totalorder %s4071_s1, %s4071_s1 }
  0x3e   :  { %p4078_p2 = por %p4077_p1, %p4076_p0 }
  0x40   :  { %p4079_p3 = pnand %p4078_p2, %p4072_p13 }
  0x42   :  { %4082 = shalt.err (!%p4079_p3)
}
  0x43   :  { %s4119_s3 = smov 64   ;;  %s4120_s11 = smov 4  }
  0x44   :  { %65 = dma.hbm_to_vmem [thread:$0]  %s4280_s5, 4096, %s60_s17, [#allocation9], %s4119_s3, %s4119_s3, %s4120_s11  }
  0x45   :  { %4105 = dma.done.wait [#allocation3], 896  }
  0x46   :  { %4106 = vsyncadd [#allocation3], 4294966400 }
  0x47   :  { %4107 = dma.done.wait [#allocation6], 41472  }
  0x48   :  { %4108 = vsyncadd [#allocation6], 4294925824 }
  0x49   :  { %4109 = dma.done.wait [#allocation9], 4096  }
  0x4a   :  { %4110 = vsyncadd [#allocation9], 4294963200  ;;  %v3477_v0 = vld [vmem:[#allocation5 + $0x4] ss:$16 sps:$4 sm:$0xff]   ;;  %v3479_v1 = vld [vmem:[#allocation5 + $0xc] ss:$16 sps:$4 sm:$0xff]  }
  0x4b   :  { %1275 = vmatprep.subr.bf16.mxu0 %v3477_v0  ;;  %v3481_v2 = vld [vmem:[#allocation5] ss:$16 sps:$4 sm:$0xff]   ;;  %v3482_v3 = vld [vmem:[#allocation5 + $0x8] ss:$16 sps:$4 sm:$0xff]   ;;  %1439 = vmatprep.subr.bf16.mxu1 %v3479_v1  ;;  %v3483_v4 = vld [vmem:[#allocation5 + $0x24] ss:$16 sps:$4 sm:$0xff]  }
  0x4c   :  { %1276 = vmatpush1.bf16.msra.mxu0 %v3481_v2  ;;  %1440 = vmatpush1.bf16.msra.mxu1 %v3482_v3  ;;  %v3485_v5 = vld [vmem:[#allocation5 + $0x2c] ss:$16 sps:$4 sm:$0xff]   ;;  %v3487_v6 = vld [vmem:[#allocation5 + $0x20] ss:$16 sps:$4 sm:$0xff]   ;;  %v3488_v7 = vld [vmem:[#allocation5 + $0x28] ss:$16 sps:$4 sm:$0xff]  }
  0x4d   :  { %1277 = vmatprep.subr.bf16.mxu0 %v3483_v4  ;;  %1441 = vmatprep.subr.bf16.mxu1 %v3485_v5  ;;  %v3489_v8 = vld [vmem:[#allocation5 + $0x44] ss:$16 sps:$4 sm:$0xff]   ;;  %v3491_v9 = vld [vmem:[#allocation5 + $0x4c] ss:$16 sps:$4 sm:$0xff]   ;;  %v3493_v10 = vld [vmem:[#allocation5 + $0x40] ss:$16 sps:$4 sm:$0xff]  }
  0x4e   :  { %v3494_v11 = vld [vmem:[#allocation5 + $0x48] ss:$16 sps:$4 sm:$0xff]   ;;  %v3495_v12 = vld [vmem:[#allocation5 + $0x64] ss:$16 sps:$4 sm:$0xff]   ;;  %v3497_v13 = vld [vmem:[#allocation5 + $0x6c] ss:$16 sps:$4 sm:$0xff]  }
  0x4f   :  { %v3499_v14 = vld [vmem:[#allocation5 + $0x60] ss:$16 sps:$4 sm:$0xff]   ;;  %v3500_v15 = vld [vmem:[#allocation5 + $0x68] ss:$16 sps:$4 sm:$0xff]   ;;  %v3501_v16 = vld [vmem:[#allocation5 + $0x84] ss:$16 sps:$4 sm:$0xff]  }
  0x50   :  { %1278 = vmatpush1.bf16.msra.mxu0 %v3487_v6  ;;  %1442 = vmatpush1.bf16.msra.mxu1 %v3488_v7  ;;  %v3503_v17 = vld [vmem:[#allocation5 + $0x8c] ss:$16 sps:$4 sm:$0xff]   ;;  %v3505_v18 = vld [vmem:[#allocation5 + $0x80] ss:$16 sps:$4 sm:$0xff]   ;;  %v3506_v19 = vld [vmem:[#allocation5 + $0x88] ss:$16 sps:$4 sm:$0xff]  }
  0x51   :  { %1279 = vmatprep.subr.bf16.mxu0 %v3489_v8  ;;  %1443 = vmatprep.subr.bf16.mxu1 %v3491_v9  ;;  %v3507_v20 = vld [vmem:[#allocation5 + $0xa4] ss:$16 sps:$4 sm:$0xff]   ;;  %v3509_v21 = vld [vmem:[#allocation5 + $0xac] ss:$16 sps:$4 sm:$0xff]   ;;  %v3511_v22 = vld [vmem:[#allocation5 + $0xa0] ss:$16 sps:$4 sm:$0xff]  }
  0x52   :  { %v3512_v23 = vld [vmem:[#allocation5 + $0xa8] ss:$16 sps:$4 sm:$0xff]   ;;  %v3513_v24 = vld [vmem:[#allocation5 + $0xc4] ss:$16 sps:$4 sm:$0xff]   ;;  %v3515_v25 = vld [vmem:[#allocation5 + $0xcc] ss:$16 sps:$4 sm:$0xff]  }
  0x53   :  { %v3517_v26 = vld [vmem:[#allocation5 + $0xc0] ss:$16 sps:$4 sm:$0xff]   ;;  %v3518_v27 = vld [vmem:[#allocation5 + $0xc8] ss:$16 sps:$4 sm:$0xff]   ;;  %v3519_v28 = vld [vmem:[#allocation5 + $0xe4] ss:$16 sps:$4 sm:$0xff]  }
  0x54   :  { %1280 = vmatpush1.bf16.msra.mxu0 %v3493_v10  ;;  %1444 = vmatpush1.bf16.msra.mxu1 %v3494_v11  ;;  %v3521_v29 = vld [vmem:[#allocation5 + $0xec] ss:$16 sps:$4 sm:$0xff]   ;;  %v3523_v30 = vld [vmem:[#allocation5 + $0xe0] ss:$16 sps:$4 sm:$0xff]   ;;  %v3524_v31 = vld [vmem:[#allocation5 + $0xe8] ss:$16 sps:$4 sm:$0xff]  }
  0x55   :  { %1281 = vmatprep.subr.bf16.mxu0 %v3495_v12  ;;  %1445 = vmatprep.subr.bf16.mxu1 %v3497_v13  ;;  %v3525_v32 = vld [vmem:[#allocation5 + $0x104] ss:$16 sps:$4 sm:$0xff]   ;;  %v3527_v33 = vld [vmem:[#allocation5 + $0x10c] ss:$16 sps:$4 sm:$0xff]   ;;  %v3529_v34 = vld [vmem:[#allocation5 + $0x100] ss:$16 sps:$4 sm:$0xff]  }
  0x56   :  { %v3530_v35 = vld [vmem:[#allocation5 + $0x108] ss:$16 sps:$4 sm:$0xff]   ;;  %v3531_v36 = vld [vmem:[#allocation5 + $0x124] ss:$16 sps:$4 sm:$0xff]   ;;  %v3533_v37 = vld [vmem:[#allocation5 + $0x12c] ss:$16 sps:$4 sm:$0xff]  }
  0x57   :  { %v3535_v38 = vld [vmem:[#allocation5 + $0x120] ss:$16 sps:$4 sm:$0xff]   ;;  %v3536_v39 = vld [vmem:[#allocation5 + $0x128] ss:$16 sps:$4 sm:$0xff]   ;;  %v3537_v40 = vld [vmem:[#allocation5 + $0x144] ss:$16 sps:$4 sm:$0xff]  }
  0x58   :  { %1282 = vmatpush1.bf16.msra.mxu0 %v3499_v14  ;;  %1446 = vmatpush1.bf16.msra.mxu1 %v3500_v15  ;;  %v3539_v41 = vld [vmem:[#allocation5 + $0x14c] ss:$16 sps:$4 sm:$0xff]   ;;  %v3541_v42 = vld [vmem:[#allocation5 + $0x140] ss:$16 sps:$4 sm:$0xff]   ;;  %v3542_v43 = vld [vmem:[#allocation5 + $0x148] ss:$16 sps:$4 sm:$0xff]  }
  0x59   :  { %1283 = vmatprep.subr.bf16.mxu0 %v3501_v16  ;;  %1447 = vmatprep.subr.bf16.mxu1 %v3503_v17  ;;  %v3543_v44 = vld [vmem:[#allocation5 + $0x164] ss:$16 sps:$4 sm:$0xff]   ;;  %v3545_v45 = vld [vmem:[#allocation5 + $0x16c] ss:$16 sps:$4 sm:$0xff]   ;;  %v3547_v47 = vld [vmem:[#allocation5 + $0x160] ss:$16 sps:$4 sm:$0xff]  }
  0x5a   :  { %v82_v46 = vld [vmem:[#allocation2 + $0x8] sm:$0xff]  ;;  %v3548_v49 = vld [vmem:[#allocation5 + $0x168] ss:$16 sps:$4 sm:$0xff]   ;;  %v3551_v51 = vld [vmem:[#allocation5 + $0x18c] ss:$16 sps:$4 sm:$0xff]   ;;  %vm1271_vm0 = vcmask 130048  }
  0x5b   :  { %v89_v48 = vpack.c.bf16 %v82_v46, %v82_v46  ;;  %v3549_v50 = vld [vmem:[#allocation5 + $0x184] ss:$16 sps:$4 sm:$0xff]   ;;  %v3553_v52 = vld [vmem:[#allocation5 + $0x180] ss:$16 sps:$4 sm:$0xff]   ;;  %v3554_v53 = vld [vmem:[#allocation5 + $0x188] ss:$16 sps:$4 sm:$0xff]  }
  0x5c   :  { %1284 = vmatpush1.bf16.msra.mxu0 %v3505_v18  ;;  %1448 = vmatpush1.bf16.msra.mxu1 %v3506_v19  ;;  %v3555_v54 = vld [vmem:[#allocation5 + $0x1a4] ss:$16 sps:$4 sm:$0xff]   ;;  %v3557_v55 = vld [vmem:[#allocation5 + $0x1ac] ss:$16 sps:$4 sm:$0xff]   ;;  %v3559_v56 = vld [vmem:[#allocation5 + $0x1a0] ss:$16 sps:$4 sm:$0xff]  }
  0x5d   :  { %1285 = vmatprep.subr.bf16.mxu0 %v3507_v20  ;;  %1449 = vmatprep.subr.bf16.mxu1 %v3509_v21  ;;  %v3560_v57 = vld [vmem:[#allocation5 + $0x1a8] ss:$16 sps:$4 sm:$0xff]   ;;  %v3561_v58 = vld [vmem:[#allocation5 + $0x1c4] ss:$16 sps:$4 sm:$0xff]   ;;  %v3563_v59 = vld [vmem:[#allocation5 + $0x1cc] ss:$16 sps:$4 sm:$0xff]  }
  0x5e   :  { %1307 = vmatprep.mubr.bf16.mxu0 %v89_v48  ;;  %1471 = vmatprep.mubr.bf16.mxu1 %v89_v48  ;;  %v3565_v60 = vld [vmem:[#allocation5 + $0x1c0] ss:$16 sps:$4 sm:$0xff]   ;;  %v3566_v61 = vld [vmem:[#allocation5 + $0x1c8] ss:$16 sps:$4 sm:$0xff]   ;;  %v3567_v62 = vld [vmem:[#allocation5 + $0x1e4] ss:$16 sps:$4 sm:$0xff]  }
  0x5f   :  { %v3569_v63 = vld [vmem:[#allocation5 + $0x1ec] ss:$16 sps:$4 sm:$0xff]   ;;  %v3571_v0 = vld [vmem:[#allocation5 + $0x1e0] ss:$16 sps:$4 sm:$0xff]   ;;  %v3572_v1 = vld [vmem:[#allocation5 + $0x1e8] ss:$16 sps:$4 sm:$0xff]  }
  0x60   :  { %1286 = vmatpush1.bf16.msra.mxu0 %v3511_v22  ;;  %1450 = vmatpush1.bf16.msra.mxu1 %v3512_v23  ;;  %v81_v2 = vld [vmem:[#allocation2] sm:$0xff]  ;;  %v3575_v3 = vld [vmem:[#allocation5 + $0x204] ss:$16 sps:$4 sm:$0xff]   ;;  %v3573_v6 = vld [vmem:[#allocation5 + $0x200] ss:$16 sps:$4 sm:$0xff]   ;;  %s4123_s29 = smov [#allocation10]  }
  0x61   :  { %1287 = vmatprep.subr.bf16.mxu0 %v3513_v24  ;;  %1451 = vmatprep.subr.bf16.mxu1 %v3515_v25  ;;  %v3578_v4 = vld [vmem:[#allocation5 + $0x20c] ss:$16 sps:$4 sm:$0xff]   ;;  %v88_v5 = vpack.c.bf16 %v81_v2, %v81_v2  ;;  %v3576_v7 = vld [vmem:[#allocation5 + $0x208] ss:$16 sps:$4 sm:$0xff]   ;;  %v3581_v8 = vld [vmem:[#allocation5 + $0x224] ss:$16 sps:$4 sm:$0xff]  }
  0x62   :  { %v3584_v9 = vld [vmem:[#allocation5 + $0x22c] ss:$16 sps:$4 sm:$0xff]   ;;  %v3579_v10 = vld [vmem:[#allocation5 + $0x220] ss:$16 sps:$4 sm:$0xff]   ;;  %v3582_v11 = vld [vmem:[#allocation5 + $0x228] ss:$16 sps:$4 sm:$0xff]  }
  0x63   :  { %v3587_v12 = vld [vmem:[#allocation5 + $0x244] ss:$16 sps:$4 sm:$0xff]   ;;  %v3590_v13 = vld [vmem:[#allocation5 + $0x24c] ss:$16 sps:$4 sm:$0xff]   ;;  %v3585_v14 = vld [vmem:[#allocation5 + $0x240] ss:$16 sps:$4 sm:$0xff]  }
  0x64   :  { %1288 = vmatpush1.bf16.msra.mxu0 %v3517_v26  ;;  %1452 = vmatpush1.bf16.msra.mxu1 %v3518_v27  ;;  %v3588_v15 = vld [vmem:[#allocation5 + $0x248] ss:$16 sps:$4 sm:$0xff]   ;;  %v3593_v16 = vld [vmem:[#allocation5 + $0x264] ss:$16 sps:$4 sm:$0xff]   ;;  %v3596_v17 = vld [vmem:[#allocation5 + $0x26c] ss:$16 sps:$4 sm:$0xff]  }
  0x65   :  { %1289 = vmatprep.subr.bf16.mxu0 %v3519_v28  ;;  %1453 = vmatprep.subr.bf16.mxu1 %v3521_v29  ;;  %v3591_v18 = vld [vmem:[#allocation5 + $0x260] ss:$16 sps:$4 sm:$0xff]   ;;  %v3594_v19 = vld [vmem:[#allocation5 + $0x268] ss:$16 sps:$4 sm:$0xff]   ;;  %v3599_v20 = vld [vmem:[#allocation5 + $0x284] ss:$16 sps:$4 sm:$0xff]  }
  0x66   :  { %v3602_v21 = vld [vmem:[#allocation5 + $0x28c] ss:$16 sps:$4 sm:$0xff]   ;;  %v3597_v22 = vld [vmem:[#allocation5 + $0x280] ss:$16 sps:$4 sm:$0xff]   ;;  %v3600_v23 = vld [vmem:[#allocation5 + $0x288] ss:$16 sps:$4 sm:$0xff]  }
  0x67   :  { %v3605_v24 = vld [vmem:[#allocation5 + $0x2a4] ss:$16 sps:$4 sm:$0xff]   ;;  %v3608_v25 = vld [vmem:[#allocation5 + $0x2ac] ss:$16 sps:$4 sm:$0xff]   ;;  %v3603_v26 = vld [vmem:[#allocation5 + $0x2a0] ss:$16 sps:$4 sm:$0xff]  }
  0x68   :  { %1290 = vmatpush1.bf16.msra.mxu0 %v3523_v30  ;;  %1454 = vmatpush1.bf16.msra.mxu1 %v3524_v31  ;;  %v3606_v27 = vld [vmem:[#allocation5 + $0x2a8] ss:$16 sps:$4 sm:$0xff]   ;;  %v3611_v28 = vld [vmem:[#allocation5 + $0x2c4] ss:$16 sps:$4 sm:$0xff]   ;;  %v3614_v29 = vld [vmem:[#allocation5 + $0x2cc] ss:$16 sps:$4 sm:$0xff]  }
  0x69   :  { %1291 = vmatprep.subr.bf16.mxu0 %v3525_v32  ;;  %1455 = vmatprep.subr.bf16.mxu1 %v3527_v33  ;;  %v84_v30 = vld [vmem:[#allocation2 + $0x18] sm:$0xff]  ;;  %v3612_v33 = vld [vmem:[#allocation5 + $0x2c8] ss:$16 sps:$4 sm:$0xff]   ;;  %s3018_s30 = sshll.u32 %s4123_s29, 4  ;;  %s3019_s30 = int_to_ptr.vmem [resolvable:$true] %s3018_s30 }
  0x6a   :  { %v3609_v31 = vld [vmem:[#allocation5 + $0x2c0] ss:$16 sps:$4 sm:$0xff]   ;;  %v91_v32 = vpack.c.bf16 %v84_v30, %v84_v30  ;;  %v3635_v46 = vld [vmem:[#allocation5 + $0x344] ss:$16 sps:$4 sm:$0xff]   ;;  %s4083_s8 = scalar_lea.vmem %s3019_s30, 64  ;;  %p4088_p5 = scmp.lt.s32.totalorder %s3019_s30, %s3019_s30 }
  0x6b   :  { %v3633_v48 = vld [vmem:[#allocation5 + $0x340] ss:$16 sps:$4 sm:$0xff]   ;;  %v3665_v2 = vld [vmem:[#allocation5 + $0x3e4] ss:$16 sps:$4 sm:$0xff]   ;;  %p4084_p4 = scmp.ne.s32.totalorder %s3019_s30, %s4083_s8  ;;  %p4089_p6 = scmp.lt.s32.totalorder %s4083_s8, %s4083_s8 }
  0x6c   :  { %1292 = vmatpush1.bf16.msra.mxu0 %v3529_v34  ;;  %1456 = vmatpush1.bf16.msra.mxu1 %v3530_v35  ;;  %v3617_v34 = vld [vmem:[#allocation5 + $0x2e4] ss:$16 sps:$4 sm:$0xff]   ;;  %v3620_v35 = vld [vmem:[#allocation5 + $0x2ec] ss:$16 sps:$4 sm:$0xff]  }
  0x6d   :  { %1293 = vmatprep.subr.bf16.mxu0 %v3531_v36  ;;  %1457 = vmatprep.subr.bf16.mxu1 %v3533_v37  ;;  %v3615_v36 = vld [vmem:[#allocation5 + $0x2e0] ss:$16 sps:$4 sm:$0xff]   ;;  %v3618_v37 = vld [vmem:[#allocation5 + $0x2e8] ss:$16 sps:$4 sm:$0xff]   ;;  %v3701_v30 = vld [vmem:[#allocation5 + $0x4a4] ss:$16 sps:$4 sm:$0xff]   ;;  %p4090_p7 = por %p4089_p6, %p4088_p5 }
  0x6f   :  { %p4091_p8 = pnand %p4090_p7, %p4084_p4 }
  0x70   :  { %1294 = vmatpush1.bf16.msra.mxu0 %v3535_v38  ;;  %1458 = vmatpush1.bf16.msra.mxu1 %v3536_v39  ;;  %v3623_v38 = vld [vmem:[#allocation5 + $0x304] ss:$16 sps:$4 sm:$0xff]   ;;  %v3626_v39 = vld [vmem:[#allocation5 + $0x30c] ss:$16 sps:$4 sm:$0xff]  }
  0x71   :  { %1295 = vmatprep.subr.bf16.mxu0 %v3537_v40  ;;  %1459 = vmatprep.subr.bf16.mxu1 %v3539_v41  ;;  %v3621_v40 = vld [vmem:[#allocation5 + $0x300] ss:$16 sps:$4 sm:$0xff]   ;;  %v3624_v41 = vld [vmem:[#allocation5 + $0x308] ss:$16 sps:$4 sm:$0xff]  }
  0x74   :  { %1296 = vmatpush1.bf16.msra.mxu0 %v3541_v42  ;;  %1460 = vmatpush1.bf16.msra.mxu1 %v3542_v43  ;;  %v3629_v42 = vld [vmem:[#allocation5 + $0x324] ss:$16 sps:$4 sm:$0xff]   ;;  %v3632_v43 = vld [vmem:[#allocation5 + $0x32c] ss:$16 sps:$4 sm:$0xff]  }
  0x75   :  { %1297 = vmatprep.subr.bf16.mxu0 %v3543_v44  ;;  %1461 = vmatprep.subr.bf16.mxu1 %v3545_v45  ;;  %v3627_v44 = vld [vmem:[#allocation5 + $0x320] ss:$16 sps:$4 sm:$0xff]   ;;  %v3630_v45 = vld [vmem:[#allocation5 + $0x328] ss:$16 sps:$4 sm:$0xff]  }
  0x78   :  { %1298 = vmatpush1.bf16.msra.mxu0 %v3547_v47  ;;  %1462 = vmatpush1.bf16.msra.mxu1 %v3548_v49  ;;  %v3638_v47 = vld [vmem:[#allocation5 + $0x34c] ss:$16 sps:$4 sm:$0xff]   ;;  %v3636_v49 = vld [vmem:[#allocation5 + $0x348] ss:$16 sps:$4 sm:$0xff]  }
  0x79   :  { %1299 = vmatprep.subr.bf16.mxu0 %v3549_v50  ;;  %1463 = vmatprep.subr.bf16.mxu1 %v3551_v51  ;;  %v3641_v50 = vld [vmem:[#allocation5 + $0x364] ss:$16 sps:$4 sm:$0xff]   ;;  %v3644_v51 = vld [vmem:[#allocation5 + $0x36c] ss:$16 sps:$4 sm:$0xff]  }
  0x7c   :  { %1300 = vmatpush1.bf16.msra.mxu0 %v3553_v52  ;;  %1464 = vmatpush1.bf16.msra.mxu1 %v3554_v53  ;;  %v3639_v52 = vld [vmem:[#allocation5 + $0x360] ss:$16 sps:$4 sm:$0xff]   ;;  %v3642_v53 = vld [vmem:[#allocation5 + $0x368] ss:$16 sps:$4 sm:$0xff]  }
  0x7d   :  { %1301 = vmatprep.subr.bf16.mxu0 %v3555_v54  ;;  %1465 = vmatprep.subr.bf16.mxu1 %v3557_v55  ;;  %v3647_v54 = vld [vmem:[#allocation5 + $0x384] ss:$16 sps:$4 sm:$0xff]   ;;  %v3650_v55 = vld [vmem:[#allocation5 + $0x38c] ss:$16 sps:$4 sm:$0xff]  }
  0x80   :  { %1302 = vmatpush1.bf16.msra.mxu0 %v3559_v56  ;;  %1466 = vmatpush1.bf16.msra.mxu1 %v3560_v57  ;;  %v3645_v56 = vld [vmem:[#allocation5 + $0x380] ss:$16 sps:$4 sm:$0xff]   ;;  %v3648_v57 = vld [vmem:[#allocation5 + $0x388] ss:$16 sps:$4 sm:$0xff]  }
  0x81   :  { %1303 = vmatprep.subr.bf16.mxu0 %v3561_v58  ;;  %1467 = vmatprep.subr.bf16.mxu1 %v3563_v59  ;;  %v3653_v58 = vld [vmem:[#allocation5 + $0x3a4] ss:$16 sps:$4 sm:$0xff]   ;;  %v3656_v59 = vld [vmem:[#allocation5 + $0x3ac] ss:$16 sps:$4 sm:$0xff]  }
  0x84   :  { %1304 = vmatpush1.bf16.msra.mxu0 %v3565_v60  ;;  %1468 = vmatpush1.bf16.msra.mxu1 %v3566_v61  ;;  %v3651_v60 = vld [vmem:[#allocation5 + $0x3a0] ss:$16 sps:$4 sm:$0xff]   ;;  %v3654_v61 = vld [vmem:[#allocation5 + $0x3a8] ss:$16 sps:$4 sm:$0xff]  }
  0x85   :  { %1305 = vmatprep.subr.bf16.mxu0 %v3567_v62  ;;  %1469 = vmatprep.subr.bf16.mxu1 %v3569_v63  ;;  %v3659_v62 = vld [vmem:[#allocation5 + $0x3c4] ss:$16 sps:$4 sm:$0xff]   ;;  %v3662_v63 = vld [vmem:[#allocation5 + $0x3cc] ss:$16 sps:$4 sm:$0xff]  }
  0x88   :  { %1306 = vmatpush1.bf16.msra.mxu0 %v3571_v0  ;;  %1470 = vmatpush1.bf16.msra.mxu1 %v3572_v1  ;;  %v3657_v0 = vld [vmem:[#allocation5 + $0x3c0] ss:$16 sps:$4 sm:$0xff]   ;;  %v3660_v1 = vld [vmem:[#allocation5 + $0x3c8] ss:$16 sps:$4 sm:$0xff]  }
  0x89   :  { %1316 = vmatprep.subr.bf16.mxu0 %v3575_v3  ;;  %1480 = vmatprep.subr.bf16.mxu1 %v3578_v4  ;;  %v3668_v3 = vld [vmem:[#allocation5 + $0x3ec] ss:$16 sps:$4 sm:$0xff]   ;;  %v3663_v4 = vld [vmem:[#allocation5 + $0x3e0] ss:$16 sps:$4 sm:$0xff]  }
  0x8b   :  { %1308 = vmatmul.mubr.bf16.vlgmr.msra.gmra.mrb[0].mxu0 %v88_v5  ;;  %1472 = vmatmul.mubr.bf16.vlgmr.msra.gmra.mrb[0].mxu1 %v88_v5  ;;  %v3666_v5 = vld [vmem:[#allocation5 + $0x3e8] ss:$16 sps:$4 sm:$0xff]  }
  0x8c   :  { %1317 = vmatpush1.bf16.msra.mxu0 %v3573_v6  ;;  %1481 = vmatpush1.bf16.msra.mxu1 %v3576_v7  ;;  %v3671_v6 = vld [vmem:[#allocation5 + $0x404] ss:$16 sps:$4 sm:$0xff]   ;;  %v83_v7 = vld [vmem:[#allocation2 + $0x10] sm:$0xff] }
  0x8d   :  { %1318 = vmatprep.subr.bf16.mxu0 %v3581_v8  ;;  %1482 = vmatprep.subr.bf16.mxu1 %v3584_v9  ;;  %v3674_v8 = vld [vmem:[#allocation5 + $0x40c] ss:$16 sps:$4 sm:$0xff]   ;;  %v3669_v9 = vld [vmem:[#allocation5 + $0x400] ss:$16 sps:$4 sm:$0xff]  }
  0x8e   :  { %1348 = vmatprep.mubr.bf16.mxu0 %v91_v32  ;;  %1512 = vmatprep.mubr.bf16.mxu1 %v91_v32  ;;  %v3699_v32 = vld [vmem:[#allocation5 + $0x4a0] ss:$16 sps:$4 sm:$0xff]  }
  0x90   :  { %1319 = vmatpush1.bf16.msra.mxu0 %v3579_v10  ;;  %1483 = vmatpush1.bf16.msra.mxu1 %v3582_v11  ;;  %v90_v10 = vpack.c.bf16 %v83_v7, %v83_v7  ;;  %v3672_v11 = vld [vmem:[#allocation5 + $0x408] ss:$16 sps:$4 sm:$0xff]   ;;  %v3764_v7 = vld [vmem:[#allocation5 + $0x5ec] ss:$16 sps:$4 sm:$0xff]  }
  0x91   :  { %1320 = vmatprep.subr.bf16.mxu0 %v3587_v12  ;;  %1484 = vmatprep.subr.bf16.mxu1 %v3590_v13  ;;  %v3677_v12 = vld [vmem:[#allocation5 + $0x424] ss:$16 sps:$4 sm:$0xff]   ;;  %v3680_v13 = vld [vmem:[#allocation5 + $0x42c] ss:$16 sps:$4 sm:$0xff]  }
  0x94   :  { %1321 = vmatpush1.bf16.msra.mxu0 %v3585_v14  ;;  %1485 = vmatpush1.bf16.msra.mxu1 %v3588_v15  ;;  %v86_v14 = vld [vmem:[#allocation2 + $0x28] sm:$0xff] }
  0x95   :  { %1322 = vmatprep.subr.bf16.mxu0 %v3593_v16  ;;  %1486 = vmatprep.subr.bf16.mxu1 %v3596_v17  ;;  %v93_v15 = vpack.c.bf16 %v86_v14, %v86_v14  ;;  %v3675_v16 = vld [vmem:[#allocation5 + $0x420] ss:$16 sps:$4 sm:$0xff]   ;;  %v3678_v17 = vld [vmem:[#allocation5 + $0x428] ss:$16 sps:$4 sm:$0xff]  }
  0x96   :  { %v3768_v14 = vld [vmem:[#allocation5 + $0x608] ss:$16 sps:$4 sm:$0xff]  }
  0x98   :  { %1323 = vmatpush1.bf16.msra.mxu0 %v3591_v18  ;;  %1487 = vmatpush1.bf16.msra.mxu1 %v3594_v19  ;;  %v3683_v18 = vld [vmem:[#allocation5 + $0x444] ss:$16 sps:$4 sm:$0xff]   ;;  %v3686_v19 = vld [vmem:[#allocation5 + $0x44c] ss:$16 sps:$4 sm:$0xff]  }
  0x99   :  { %1324 = vmatprep.subr.bf16.mxu0 %v3599_v20  ;;  %1488 = vmatprep.subr.bf16.mxu1 %v3602_v21  ;;  %v3681_v20 = vld [vmem:[#allocation5 + $0x440] ss:$16 sps:$4 sm:$0xff]   ;;  %v3684_v21 = vld [vmem:[#allocation5 + $0x448] ss:$16 sps:$4 sm:$0xff]  }
  0x9c   :  { %1325 = vmatpush1.bf16.msra.mxu0 %v3597_v22  ;;  %1489 = vmatpush1.bf16.msra.mxu1 %v3600_v23  ;;  %v3689_v22 = vld [vmem:[#allocation5 + $0x464] ss:$16 sps:$4 sm:$0xff]   ;;  %v3692_v23 = vld [vmem:[#allocation5 + $0x46c] ss:$16 sps:$4 sm:$0xff]  }
  0x9d   :  { %1326 = vmatprep.subr.bf16.mxu0 %v3605_v24  ;;  %1490 = vmatprep.subr.bf16.mxu1 %v3608_v25  ;;  %v3687_v24 = vld [vmem:[#allocation5 + $0x460] ss:$16 sps:$4 sm:$0xff]   ;;  %v3690_v25 = vld [vmem:[#allocation5 + $0x468] ss:$16 sps:$4 sm:$0xff]  }
  0xa0   :  { %1327 = vmatpush1.bf16.msra.mxu0 %v3603_v26  ;;  %1491 = vmatpush1.bf16.msra.mxu1 %v3606_v27  ;;  %v3695_v26 = vld [vmem:[#allocation5 + $0x484] ss:$16 sps:$4 sm:$0xff]   ;;  %v3698_v27 = vld [vmem:[#allocation5 + $0x48c] ss:$16 sps:$4 sm:$0xff]  }
  0xa1   :  { %1328 = vmatprep.subr.bf16.mxu0 %v3611_v28  ;;  %1492 = vmatprep.subr.bf16.mxu1 %v3614_v29  ;;  %v3693_v28 = vld [vmem:[#allocation5 + $0x480] ss:$16 sps:$4 sm:$0xff]   ;;  %v3696_v29 = vld [vmem:[#allocation5 + $0x488] ss:$16 sps:$4 sm:$0xff]  }
  0xa4   :  { %1329 = vmatpush1.bf16.msra.mxu0 %v3609_v31  ;;  %1493 = vmatpush1.bf16.msra.mxu1 %v3612_v33  ;;  %v3704_v31 = vld [vmem:[#allocation5 + $0x4ac] ss:$16 sps:$4 sm:$0xff]   ;;  %v3702_v33 = vld [vmem:[#allocation5 + $0x4a8] ss:$16 sps:$4 sm:$0xff]  }
  0xa5   :  { %1330 = vmatprep.subr.bf16.mxu0 %v3617_v34  ;;  %1494 = vmatprep.subr.bf16.mxu1 %v3620_v35  ;;  %v3707_v34 = vld [vmem:[#allocation5 + $0x4c4] ss:$16 sps:$4 sm:$0xff]   ;;  %v3710_v35 = vld [vmem:[#allocation5 + $0x4cc] ss:$16 sps:$4 sm:$0xff]  }
  0xa8   :  { %1331 = vmatpush1.bf16.msra.mxu0 %v3615_v36  ;;  %1495 = vmatpush1.bf16.msra.mxu1 %v3618_v37  ;;  %v3705_v36 = vld [vmem:[#allocation5 + $0x4c0] ss:$16 sps:$4 sm:$0xff]   ;;  %v3708_v37 = vld [vmem:[#allocation5 + $0x4c8] ss:$16 sps:$4 sm:$0xff]  }
  0xa9   :  { %1332 = vmatprep.subr.bf16.mxu0 %v3623_v38  ;;  %1496 = vmatprep.subr.bf16.mxu1 %v3626_v39  ;;  %v3713_v38 = vld [vmem:[#allocation5 + $0x4e4] ss:$16 sps:$4 sm:$0xff]   ;;  %v3716_v39 = vld [vmem:[#allocation5 + $0x4ec] ss:$16 sps:$4 sm:$0xff]  }
  0xac   :  { %1333 = vmatpush1.bf16.msra.mxu0 %v3621_v40  ;;  %1497 = vmatpush1.bf16.msra.mxu1 %v3624_v41  ;;  %v3711_v40 = vld [vmem:[#allocation5 + $0x4e0] ss:$16 sps:$4 sm:$0xff]   ;;  %v3714_v41 = vld [vmem:[#allocation5 + $0x4e8] ss:$16 sps:$4 sm:$0xff]  }
  0xad   :  { %1334 = vmatprep.subr.bf16.mxu0 %v3629_v42  ;;  %1498 = vmatprep.subr.bf16.mxu1 %v3632_v43  ;;  %v3719_v42 = vld [vmem:[#allocation5 + $0x504] ss:$16 sps:$4 sm:$0xff]   ;;  %v3722_v43 = vld [vmem:[#allocation5 + $0x50c] ss:$16 sps:$4 sm:$0xff]  }
  0xb0   :  { %1335 = vmatpush1.bf16.msra.mxu0 %v3627_v44  ;;  %1499 = vmatpush1.bf16.msra.mxu1 %v3630_v45  ;;  %v3717_v44 = vld [vmem:[#allocation5 + $0x500] ss:$16 sps:$4 sm:$0xff]   ;;  %v3720_v45 = vld [vmem:[#allocation5 + $0x508] ss:$16 sps:$4 sm:$0xff]  }
  0xb1   :  { %1336 = vmatprep.subr.bf16.mxu0 %v3635_v46  ;;  %1500 = vmatprep.subr.bf16.mxu1 %v3638_v47  ;;  %v3725_v46 = vld [vmem:[#allocation5 + $0x524] ss:$16 sps:$4 sm:$0xff]   ;;  %v3728_v47 = vld [vmem:[#allocation5 + $0x52c] ss:$16 sps:$4 sm:$0xff]  }
  0xb4   :  { %1337 = vmatpush1.bf16.msra.mxu0 %v3633_v48  ;;  %1501 = vmatpush1.bf16.msra.mxu1 %v3636_v49  ;;  %v3723_v48 = vld [vmem:[#allocation5 + $0x520] ss:$16 sps:$4 sm:$0xff]   ;;  %v3726_v49 = vld [vmem:[#allocation5 + $0x528] ss:$16 sps:$4 sm:$0xff]  }
  0xb5   :  { %1338 = vmatprep.subr.bf16.mxu0 %v3641_v50  ;;  %1502 = vmatprep.subr.bf16.mxu1 %v3644_v51  ;;  %v3731_v50 = vld [vmem:[#allocation5 + $0x544] ss:$16 sps:$4 sm:$0xff]   ;;  %v3734_v51 = vld [vmem:[#allocation5 + $0x54c] ss:$16 sps:$4 sm:$0xff]  }
  0xb8   :  { %1339 = vmatpush1.bf16.msra.mxu0 %v3639_v52  ;;  %1503 = vmatpush1.bf16.msra.mxu1 %v3642_v53  ;;  %v3729_v52 = vld [vmem:[#allocation5 + $0x540] ss:$16 sps:$4 sm:$0xff]   ;;  %v3732_v53 = vld [vmem:[#allocation5 + $0x548] ss:$16 sps:$4 sm:$0xff]  }
  0xb9   :  { %1340 = vmatprep.subr.bf16.mxu0 %v3647_v54  ;;  %1504 = vmatprep.subr.bf16.mxu1 %v3650_v55  ;;  %v3737_v54 = vld [vmem:[#allocation5 + $0x564] ss:$16 sps:$4 sm:$0xff]   ;;  %v3740_v55 = vld [vmem:[#allocation5 + $0x56c] ss:$16 sps:$4 sm:$0xff]  }
  0xbc   :  { %1341 = vmatpush1.bf16.msra.mxu0 %v3645_v56  ;;  %1505 = vmatpush1.bf16.msra.mxu1 %v3648_v57  ;;  %v3735_v56 = vld [vmem:[#allocation5 + $0x560] ss:$16 sps:$4 sm:$0xff]   ;;  %v3738_v57 = vld [vmem:[#allocation5 + $0x568] ss:$16 sps:$4 sm:$0xff]  }
  0xbd   :  { %1342 = vmatprep.subr.bf16.mxu0 %v3653_v58  ;;  %1506 = vmatprep.subr.bf16.mxu1 %v3656_v59  ;;  %v3743_v58 = vld [vmem:[#allocation5 + $0x584] ss:$16 sps:$4 sm:$0xff]   ;;  %v3746_v59 = vld [vmem:[#allocation5 + $0x58c] ss:$16 sps:$4 sm:$0xff]  }
  0xc0   :  { %1343 = vmatpush1.bf16.msra.mxu0 %v3651_v60  ;;  %1507 = vmatpush1.bf16.msra.mxu1 %v3654_v61  ;;  %v3741_v60 = vld [vmem:[#allocation5 + $0x580] ss:$16 sps:$4 sm:$0xff]   ;;  %v3744_v61 = vld [vmem:[#allocation5 + $0x588] ss:$16 sps:$4 sm:$0xff]  }
  0xc1   :  { %1344 = vmatprep.subr.bf16.mxu0 %v3659_v62  ;;  %1508 = vmatprep.subr.bf16.mxu1 %v3662_v63  ;;  %v3749_v62 = vld [vmem:[#allocation5 + $0x5a4] ss:$16 sps:$4 sm:$0xff]   ;;  %v3752_v63 = vld [vmem:[#allocation5 + $0x5ac] ss:$16 sps:$4 sm:$0xff]  }
  0xc4   :  { %1345 = vmatpush1.bf16.msra.mxu0 %v3657_v0  ;;  %1509 = vmatpush1.bf16.msra.mxu1 %v3660_v1  ;;  %v3747_v0 = vld [vmem:[#allocation5 + $0x5a0] ss:$16 sps:$4 sm:$0xff]   ;;  %v3750_v1 = vld [vmem:[#allocation5 + $0x5a8] ss:$16 sps:$4 sm:$0xff]  }
  0xc5   :  { %1346 = vmatprep.subr.bf16.mxu0 %v3665_v2  ;;  %1510 = vmatprep.subr.bf16.mxu1 %v3668_v3  ;;  %v3755_v2 = vld [vmem:[#allocation5 + $0x5c4] ss:$16 sps:$4 sm:$0xff]   ;;  %v3758_v3 = vld [vmem:[#allocation5 + $0x5cc] ss:$16 sps:$4 sm:$0xff]  }
  0xc8   :  { %1347 = vmatpush1.bf16.msra.mxu0 %v3663_v4  ;;  %1511 = vmatpush1.bf16.msra.mxu1 %v3666_v5  ;;  %v3753_v4 = vld [vmem:[#allocation5 + $0x5c0] ss:$16 sps:$4 sm:$0xff]   ;;  %v3756_v5 = vld [vmem:[#allocation5 + $0x5c8] ss:$16 sps:$4 sm:$0xff]  }
  0xc9   :  { %1357 = vmatprep.subr.bf16.mxu0 %v3671_v6  ;;  %1521 = vmatprep.subr.bf16.mxu1 %v3674_v8  ;;  %v3761_v6 = vld [vmem:[#allocation5 + $0x5e4] ss:$16 sps:$4 sm:$0xff]   ;;  %v3759_v8 = vld [vmem:[#allocation5 + $0x5e0] ss:$16 sps:$4 sm:$0xff]  }
  0xcb   :  { %1349 = vmatmul.mubr.bf16.vlgmr.msra.gmra.mrb[0].mxu0 %v90_v10  ;;  %1513 = vmatmul.mubr.bf16.vlgmr.msra.gmra.mrb[0].mxu1 %v90_v10  ;;  %v85_v10 = vld [vmem:[#allocation2 + $0x20] sm:$0xff] }
  0xcc   :  { %1358 = vmatpush1.bf16.msra.mxu0 %v3669_v9  ;;  %1522 = vmatpush1.bf16.msra.mxu1 %v3672_v11  ;;  %v3762_v9 = vld [vmem:[#allocation5 + $0x5e8] ss:$16 sps:$4 sm:$0xff]   ;;  %v3767_v11 = vld [vmem:[#allocation5 + $0x604] ss:$16 sps:$4 sm:$0xff]  }
  0xcd   :  { %1359 = vmatprep.subr.bf16.mxu0 %v3677_v12  ;;  %1523 = vmatprep.subr.bf16.mxu1 %v3680_v13  ;;  %v3770_v12 = vld [vmem:[#allocation5 + $0x60c] ss:$16 sps:$4 sm:$0xff]   ;;  %v3765_v13 = vld [vmem:[#allocation5 + $0x600] ss:$16 sps:$4 sm:$0xff]  }
  0xce   :  { %1389 = vmatprep.mubr.bf16.mxu0 %v93_v15  ;;  %1553 = vmatprep.mubr.bf16.mxu1 %v93_v15  ;;  %v92_v15 = vpack.c.bf16 %v85_v10, %v85_v10  ;;  %v3852_v10 = vld [vmem:[#allocation7 + $0x1a8] ss:$16 sps:$4 sm:$0xff]  }
  0xd0   :  { %1360 = vmatpush1.bf16.msra.mxu0 %v3675_v16  ;;  %1524 = vmatpush1.bf16.msra.mxu1 %v3678_v17  ;;  %v3773_v16 = vld [vmem:[#allocation7 + $0x4] ss:$16 sps:$4 sm:$0xff]   ;;  %v3776_v17 = vld [vmem:[#allocation7 + $0xc] ss:$16 sps:$4 sm:$0xff]  }
  0xd1   :  { %1361 = vmatprep.subr.bf16.mxu0 %v3683_v18  ;;  %1525 = vmatprep.subr.bf16.mxu1 %v3686_v19  ;;  %v4121_v18 = vmov 0   ;;  %v87_v19 = vld [vmem:[#allocation2 + $0x30] sm:$0xff] }
  0xd4   :  { %1362 = vmatpush1.bf16.msra.mxu0 %v3681_v20  ;;  %1526 = vmatpush1.bf16.msra.mxu1 %v3684_v21  ;;  %v3771_v20 = vld [vmem:[#allocation7] ss:$16 sps:$4 sm:$0xff]   ;;  %v3774_v21 = vld [vmem:[#allocation7 + $0x8] ss:$16 sps:$4 sm:$0xff]  }
  0xd5   :  { %1363 = vmatprep.subr.bf16.mxu0 %v3689_v22  ;;  %1527 = vmatprep.subr.bf16.mxu1 %v3692_v23  ;;  %v94_v22 = vpack.c.bf16 %v87_v19, %v87_v19  ;;  %v3779_v23 = vld [vmem:[#allocation7 + $0x24] ss:$16 sps:$4 sm:$0xff]   ;;  %v3864_v19 = vld [vmem:[#allocation7 + $0x1e8] ss:$16 sps:$4 sm:$0xff]  }
  0xd8   :  { %1364 = vmatpush1.bf16.msra.mxu0 %v3687_v24  ;;  %1528 = vmatpush1.bf16.msra.mxu1 %v3690_v25  ;;  %v3782_v24 = vld [vmem:[#allocation7 + $0x2c] ss:$16 sps:$4 sm:$0xff]   ;;  %v3777_v25 = vld [vmem:[#allocation7 + $0x20] ss:$16 sps:$4 sm:$0xff]  }
  0xd9   :  { %1365 = vmatprep.subr.bf16.mxu0 %v3695_v26  ;;  %1529 = vmatprep.subr.bf16.mxu1 %v3698_v27  ;;  %v3780_v26 = vld [vmem:[#allocation7 + $0x28] ss:$16 sps:$4 sm:$0xff]   ;;  %v3785_v27 = vld [vmem:[#allocation7 + $0x44] ss:$16 sps:$4 sm:$0xff]  }
  0xdc   :  { %1366 = vmatpush1.bf16.msra.mxu0 %v3693_v28  ;;  %1530 = vmatpush1.bf16.msra.mxu1 %v3696_v29  ;;  %v3788_v28 = vld [vmem:[#allocation7 + $0x4c] ss:$16 sps:$4 sm:$0xff]   ;;  %v3783_v29 = vld [vmem:[#allocation7 + $0x40] ss:$16 sps:$4 sm:$0xff]  }
  0xdd   :  { %1367 = vmatprep.subr.bf16.mxu0 %v3701_v30  ;;  %1531 = vmatprep.subr.bf16.mxu1 %v3704_v31  ;;  %v3786_v30 = vld [vmem:[#allocation7 + $0x48] ss:$16 sps:$4 sm:$0xff]   ;;  %v3791_v31 = vld [vmem:[#allocation7 + $0x64] ss:$16 sps:$4 sm:$0xff]  }
  0xe0   :  { %1368 = vmatpush1.bf16.msra.mxu0 %v3699_v32  ;;  %1532 = vmatpush1.bf16.msra.mxu1 %v3702_v33  ;;  %v3794_v32 = vld [vmem:[#allocation7 + $0x6c] ss:$16 sps:$4 sm:$0xff]   ;;  %v3789_v33 = vld [vmem:[#allocation7 + $0x60] ss:$16 sps:$4 sm:$0xff]  }
  0xe1   :  { %1369 = vmatprep.subr.bf16.mxu0 %v3707_v34  ;;  %1533 = vmatprep.subr.bf16.mxu1 %v3710_v35  ;;  %v3792_v34 = vld [vmem:[#allocation7 + $0x68] ss:$16 sps:$4 sm:$0xff]   ;;  %v3797_v35 = vld [vmem:[#allocation7 + $0x84] ss:$16 sps:$4 sm:$0xff]  }
  0xe4   :  { %1370 = vmatpush1.bf16.msra.mxu0 %v3705_v36  ;;  %1534 = vmatpush1.bf16.msra.mxu1 %v3708_v37  ;;  %v3800_v36 = vld [vmem:[#allocation7 + $0x8c] ss:$16 sps:$4 sm:$0xff]   ;;  %v3795_v37 = vld [vmem:[#allocation7 + $0x80] ss:$16 sps:$4 sm:$0xff]  }
  0xe5   :  { %1371 = vmatprep.subr.bf16.mxu0 %v3713_v38  ;;  %1535 = vmatprep.subr.bf16.mxu1 %v3716_v39  ;;  %v3798_v38 = vld [vmem:[#allocation7 + $0x88] ss:$16 sps:$4 sm:$0xff]   ;;  %v3803_v39 = vld [vmem:[#allocation7 + $0xa4] ss:$16 sps:$4 sm:$0xff]  }
  0xe8   :  { %1372 = vmatpush1.bf16.msra.mxu0 %v3711_v40  ;;  %1536 = vmatpush1.bf16.msra.mxu1 %v3714_v41  ;;  %v3806_v40 = vld [vmem:[#allocation7 + $0xac] ss:$16 sps:$4 sm:$0xff]   ;;  %v3801_v41 = vld [vmem:[#allocation7 + $0xa0] ss:$16 sps:$4 sm:$0xff]  }
  0xe9   :  { %1373 = vmatprep.subr.bf16.mxu0 %v3719_v42  ;;  %1537 = vmatprep.subr.bf16.mxu1 %v3722_v43  ;;  %v3804_v42 = vld [vmem:[#allocation7 + $0xa8] ss:$16 sps:$4 sm:$0xff]   ;;  %v3809_v43 = vld [vmem:[#allocation7 + $0xc4] ss:$16 sps:$4 sm:$0xff]  }
  0xec   :  { %1374 = vmatpush1.bf16.msra.mxu0 %v3717_v44  ;;  %1538 = vmatpush1.bf16.msra.mxu1 %v3720_v45  ;;  %v3812_v44 = vld [vmem:[#allocation7 + $0xcc] ss:$16 sps:$4 sm:$0xff]   ;;  %v3807_v45 = vld [vmem:[#allocation7 + $0xc0] ss:$16 sps:$4 sm:$0xff]  }
  0xed   :  { %1375 = vmatprep.subr.bf16.mxu0 %v3725_v46  ;;  %1539 = vmatprep.subr.bf16.mxu1 %v3728_v47  ;;  %v3810_v46 = vld [vmem:[#allocation7 + $0xc8] ss:$16 sps:$4 sm:$0xff]   ;;  %v3815_v47 = vld [vmem:[#allocation7 + $0xe4] ss:$16 sps:$4 sm:$0xff]  }
  0xf0   :  { %1376 = vmatpush1.bf16.msra.mxu0 %v3723_v48  ;;  %1540 = vmatpush1.bf16.msra.mxu1 %v3726_v49  ;;  %v3818_v48 = vld [vmem:[#allocation7 + $0xec] ss:$16 sps:$4 sm:$0xff]   ;;  %v3813_v49 = vld [vmem:[#allocation7 + $0xe0] ss:$16 sps:$4 sm:$0xff]  }
  0xf1   :  { %1377 = vmatprep.subr.bf16.mxu0 %v3731_v50  ;;  %1541 = vmatprep.subr.bf16.mxu1 %v3734_v51  ;;  %v3816_v50 = vld [vmem:[#allocation7 + $0xe8] ss:$16 sps:$4 sm:$0xff]   ;;  %v3821_v51 = vld [vmem:[#allocation7 + $0x104] ss:$16 sps:$4 sm:$0xff]  }
  0xf4   :  { %1378 = vmatpush1.bf16.msra.mxu0 %v3729_v52  ;;  %1542 = vmatpush1.bf16.msra.mxu1 %v3732_v53  ;;  %v3824_v52 = vld [vmem:[#allocation7 + $0x10c] ss:$16 sps:$4 sm:$0xff]   ;;  %v3819_v53 = vld [vmem:[#allocation7 + $0x100] ss:$16 sps:$4 sm:$0xff]  }
  0xf5   :  { %1379 = vmatprep.subr.bf16.mxu0 %v3737_v54  ;;  %1543 = vmatprep.subr.bf16.mxu1 %v3740_v55  ;;  %v3822_v54 = vld [vmem:[#allocation7 + $0x108] ss:$16 sps:$4 sm:$0xff]   ;;  %v3827_v55 = vld [vmem:[#allocation7 + $0x124] ss:$16 sps:$4 sm:$0xff]  }
  0xf8   :  { %1380 = vmatpush1.bf16.msra.mxu0 %v3735_v56  ;;  %1544 = vmatpush1.bf16.msra.mxu1 %v3738_v57  ;;  %v3830_v56 = vld [vmem:[#allocation7 + $0x12c] ss:$16 sps:$4 sm:$0xff]   ;;  %v3825_v57 = vld [vmem:[#allocation7 + $0x120] ss:$16 sps:$4 sm:$0xff]  }
  0xf9   :  { %1381 = vmatprep.subr.bf16.mxu0 %v3743_v58  ;;  %1545 = vmatprep.subr.bf16.mxu1 %v3746_v59  ;;  %v3828_v58 = vld [vmem:[#allocation7 + $0x128] ss:$16 sps:$4 sm:$0xff]   ;;  %v3833_v59 = vld [vmem:[#allocation7 + $0x144] ss:$16 sps:$4 sm:$0xff]  }
  0xfc   :  { %1382 = vmatpush1.bf16.msra.mxu0 %v3741_v60  ;;  %1546 = vmatpush1.bf16.msra.mxu1 %v3744_v61  ;;  %v3836_v60 = vld [vmem:[#allocation7 + $0x14c] ss:$16 sps:$4 sm:$0xff]   ;;  %v3831_v61 = vld [vmem:[#allocation7 + $0x140] ss:$16 sps:$4 sm:$0xff]  }
  0xfd   :  { %1383 = vmatprep.subr.bf16.mxu0 %v3749_v62  ;;  %1547 = vmatprep.subr.bf16.mxu1 %v3752_v63  ;;  %v3834_v62 = vld [vmem:[#allocation7 + $0x148] ss:$16 sps:$4 sm:$0xff]   ;;  %v3839_v63 = vld [vmem:[#allocation7 + $0x164] ss:$16 sps:$4 sm:$0xff]  }
 0x100   :  { %1384 = vmatpush1.bf16.msra.mxu0 %v3747_v0  ;;  %1548 = vmatpush1.bf16.msra.mxu1 %v3750_v1  ;;  %v3842_v0 = vld [vmem:[#allocation7 + $0x16c] ss:$16 sps:$4 sm:$0xff]   ;;  %v3837_v1 = vld [vmem:[#allocation7 + $0x160] ss:$16 sps:$4 sm:$0xff]  }
 0x101   :  { %1385 = vmatprep.subr.bf16.mxu0 %v3755_v2  ;;  %1549 = vmatprep.subr.bf16.mxu1 %v3758_v3  ;;  %v3840_v2 = vld [vmem:[#allocation7 + $0x168] ss:$16 sps:$4 sm:$0xff]   ;;  %v3845_v3 = vld [vmem:[#allocation7 + $0x184] ss:$16 sps:$4 sm:$0xff]  }
 0x104   :  { %1386 = vmatpush1.bf16.msra.mxu0 %v3753_v4  ;;  %1550 = vmatpush1.bf16.msra.mxu1 %v3756_v5  ;;  %v3848_v4 = vld [vmem:[#allocation7 + $0x18c] ss:$16 sps:$4 sm:$0xff]   ;;  %v3843_v5 = vld [vmem:[#allocation7 + $0x180] ss:$16 sps:$4 sm:$0xff]  }
 0x105   :  { %1387 = vmatprep.subr.bf16.mxu0 %v3761_v6  ;;  %1551 = vmatprep.subr.bf16.mxu1 %v3764_v7  ;;  %v3846_v6 = vld [vmem:[#allocation7 + $0x188] ss:$16 sps:$4 sm:$0xff]   ;;  %v3851_v7 = vld [vmem:[#allocation7 + $0x1a4] ss:$16 sps:$4 sm:$0xff]  }
 0x108   :  { %1388 = vmatpush1.bf16.msra.mxu0 %v3759_v8  ;;  %1552 = vmatpush1.bf16.msra.mxu1 %v3762_v9  ;;  %v3854_v8 = vld [vmem:[#allocation7 + $0x1ac] ss:$16 sps:$4 sm:$0xff]   ;;  %v3849_v9 = vld [vmem:[#allocation7 + $0x1a0] ss:$16 sps:$4 sm:$0xff]  }
 0x109   :  { %1398 = vmatprep.subr.bf16.mxu0 %v3767_v11  ;;  %1562 = vmatprep.subr.bf16.mxu1 %v3770_v12  ;;  %v3857_v11 = vld [vmem:[#allocation7 + $0x1c4] ss:$16 sps:$4 sm:$0xff]   ;;  %v3860_v12 = vld [vmem:[#allocation7 + $0x1cc] ss:$16 sps:$4 sm:$0xff]  }
 0x10b   :  { %1390 = vmatmul.mubr.bf16.vlgmr.msra.gmra.mrb[0].mxu0 %v92_v15  ;;  %1554 = vmatmul.mubr.bf16.vlgmr.msra.gmra.mrb[0].mxu1 %v92_v15  ;;  %v3863_v15 = vld [vmem:[#allocation7 + $0x1e4] ss:$16 sps:$4 sm:$0xff]  }
 0x10c   :  { %1399 = vmatpush1.bf16.msra.mxu0 %v3765_v13  ;;  %1563 = vmatpush1.bf16.msra.mxu1 %v3768_v14  ;;  %v3855_v13 = vld [vmem:[#allocation7 + $0x1c0] ss:$16 sps:$4 sm:$0xff]   ;;  %v3858_v14 = vld [vmem:[#allocation7 + $0x1c8] ss:$16 sps:$4 sm:$0xff]  }
 0x10d   :  { %1430 = vmatprep.mubr.bf16.mxu0 %v4121_v18  ;;  %1594 = vmatprep.mubr.bf16.mxu1 %v4121_v18 }
 0x10e   :  { %2437 = vmatprep.subr.bf16.mxu0 %v3773_v16  ;;  %2519 = vmatprep.subr.bf16.mxu1 %v3776_v17  ;;  %v3866_v16 = vld [vmem:[#allocation7 + $0x1ec] ss:$16 sps:$4 sm:$0xff]   ;;  %v3861_v17 = vld [vmem:[#allocation7 + $0x1e0] ss:$16 sps:$4 sm:$0xff]  }
 0x117   :  { %3225 = vmatmul.mubr.msk.bf16.vlgmr.msra.gmra.mrb[0].mxu0 %vm1271_vm0, %v94_v22  ;;  %3226 = vmatmul.mubr.msk.bf16.vlgmr.msra.gmra.mrb[0].mxu1 %vm1271_vm0, %v94_v22  ;;  %v4122_v22 = vmov 1966171168  }
 0x118   :  { %2438 = vmatpush1.bf16.msra.mxu0 %v3771_v20  ;;  %2520 = vmatpush1.bf16.msra.mxu1 %v3774_v21  ;;  %v3869_v20 = vld [vmem:[#allocation7 + $0x204] ss:$16 sps:$4 sm:$0xff]   ;;  %v3872_v21 = vld [vmem:[#allocation7 + $0x20c] ss:$16 sps:$4 sm:$0xff]  }
 0x119   :  { %2439 = vmatprep.subr.bf16.mxu0 %v3779_v23  ;;  %2521 = vmatprep.subr.bf16.mxu1 %v3782_v24  ;;  %v1618_v23 = vunpack.c.l.s4 %v4122_v22  ;;  %v1620_v24 = vlaneseq  ;;  %v3909_v22 = vld [vmem:[#allocation7 + $0x2e0] ss:$16 sps:$4 sm:$0xff]  }
 0x11c   :  { %2440 = vmatpush1.bf16.msra.mxu0 %v3777_v25  ;;  %2522 = vmatpush1.bf16.msra.mxu1 %v3780_v26  ;;  %v1619_v25 = vunpack.c.0.s8 %v1618_v23  ;;  %v1621_v26 = vshrl.u32 %v1620_v24, 7  ;;  %v3912_v23 = vld [vmem:[#allocation7 + $0x2e8] ss:$16 sps:$4 sm:$0xff]   ;;  %v3917_v24 = vld [vmem:[#allocation7 + $0x304] ss:$16 sps:$4 sm:$0xff]  }
 0x11d   :  { %2441 = vmatprep.subr.bf16.mxu0 %v3785_v27  ;;  %2523 = vmatprep.subr.bf16.mxu1 %v3788_v28  ;;  %v3227_v27 = vld.sshfl [vmem:[%s4277_s2] sm:$0x33 pattern:$0x75316420] }
 0x11e   :  { %v4223_v28 = vsub.s32 %v1619_v25, %v1621_v26  ;;  %v3920_v25 = vld [vmem:[#allocation7 + $0x30c] ss:$16 sps:$4 sm:$0xff]  }
 0x120   :  { %2442 = vmatpush1.bf16.msra.mxu0 %v3783_v29  ;;  %2524 = vmatpush1.bf16.msra.mxu1 %v3786_v30  ;;  %v1616_v29 = vcombine.high %v3227_v27, %v3227_v27 }
 0x121   :  { %2443 = vmatprep.subr.bf16.mxu0 %v3791_v31  ;;  %2525 = vmatprep.subr.bf16.mxu1 %v3794_v32  ;;  %v4227_v31 = vrot.slane %v3227_v27, %v4223_v28  ;;  %v3918_v27 = vld [vmem:[#allocation7 + $0x308] ss:$16 sps:$4 sm:$0xff]  }
 0x122   :  { %v1630_v30 = vrot.slane %v1616_v29, %v4223_v28  ;;  %v3923_v29 = vld [vmem:[#allocation7 + $0x324] ss:$16 sps:$4 sm:$0xff]  }
 0x124   :  { %2444 = vmatpush1.bf16.msra.mxu0 %v3789_v33  ;;  %2526 = vmatpush1.bf16.msra.mxu1 %v3792_v34  ;;  %v1632_v32 = vcombine.high %v1630_v30, %v1630_v30  ;;  %v1634_v33 = vpack.i.b16 %v4227_v31, %v4227_v31  ;;  %v4231_v34 = vsub.s32 0, %v1621_v26  ;;  %v3915_v26 = vld [vmem:[#allocation7 + $0x300] ss:$16 sps:$4 sm:$0xff]  }
 0x125   :  { %2445 = vmatprep.subr.bf16.mxu0 %v3797_v35  ;;  %2527 = vmatprep.subr.bf16.mxu1 %v3800_v36  ;;  %v1641_v35 = vpack.i.b16 %v1630_v30, %v1630_v30  ;;  %v3926_v30 = vld [vmem:[#allocation7 + $0x32c] ss:$16 sps:$4 sm:$0xff]  }
 0x126   :  { %v1655_v36 = vpack.i.b16 %v1632_v32, %v1632_v32  ;;  %v3921_v32 = vld [vmem:[#allocation7 + $0x320] ss:$16 sps:$4 sm:$0xff]  }
 0x128   :  { %2446 = vmatpush1.bf16.msra.mxu0 %v3795_v37  ;;  %2528 = vmatpush1.bf16.msra.mxu1 %v3798_v38  ;;  %v1639_v37 = vrot.slane %v1634_v33, %v4231_v34  ;;  %v3924_v33 = vld [vmem:[#allocation7 + $0x328] ss:$16 sps:$4 sm:$0xff]  }
 0x129   :  { %2447 = vmatprep.subr.bf16.mxu0 %v3803_v39  ;;  %2529 = vmatprep.subr.bf16.mxu1 %v3806_v40  ;;  %v1646_v40 = vrot.slane %v1641_v35, %v4231_v34  ;;  %v3929_v35 = vld [vmem:[#allocation7 + $0x344] ss:$16 sps:$4 sm:$0xff]  }
 0x12c   :  { %2448 = vmatpush1.bf16.msra.mxu0 %v3801_v41  ;;  %2530 = vmatpush1.bf16.msra.mxu1 %v3804_v42 }
 0x12d   :  { %2449 = vmatprep.subr.bf16.mxu0 %v3809_v43  ;;  %2531 = vmatprep.subr.bf16.mxu1 %v3812_v44  ;;  %v1660_v44 = vrot.slane %v1655_v36, %v4231_v34  ;;  %v3932_v36 = vld [vmem:[#allocation7 + $0x34c] ss:$16 sps:$4 sm:$0xff]  }
 0x130   :  { %2450 = vmatpush1.bf16.msra.mxu0 %v3807_v45  ;;  %2532 = vmatpush1.bf16.msra.mxu1 %v3810_v46 }
 0x131   :  { %2451 = vmatprep.subr.bf16.mxu0 %v3815_v47  ;;  %2533 = vmatprep.subr.bf16.mxu1 %v3818_v48 }
 0x134   :  { %2452 = vmatpush1.bf16.msra.mxu0 %v3813_v49  ;;  %2534 = vmatpush1.bf16.msra.mxu1 %v3816_v50 }
 0x135   :  { %2453 = vmatprep.subr.bf16.mxu0 %v3821_v51  ;;  %2535 = vmatprep.subr.bf16.mxu1 %v3824_v52 }
 0x138   :  { %2454 = vmatpush1.bf16.msra.mxu0 %v3819_v53  ;;  %2536 = vmatpush1.bf16.msra.mxu1 %v3822_v54 }
 0x139   :  { %2455 = vmatprep.subr.bf16.mxu0 %v3827_v55  ;;  %2537 = vmatprep.subr.bf16.mxu1 %v3830_v56  ;;  %v3867_v55 = vld [vmem:[#allocation7 + $0x200] ss:$16 sps:$4 sm:$0xff]   ;;  %v3870_v56 = vld [vmem:[#allocation7 + $0x208] ss:$16 sps:$4 sm:$0xff]  }
 0x13c   :  { %2456 = vmatpush1.bf16.msra.mxu0 %v3825_v57  ;;  %2538 = vmatpush1.bf16.msra.mxu1 %v3828_v58  ;;  %v3875_v58 = vld [vmem:[#allocation7 + $0x224] ss:$16 sps:$4 sm:$0xff]  }
 0x13d   :  { %2457 = vmatprep.subr.bf16.mxu0 %v3833_v59  ;;  %2539 = vmatprep.subr.bf16.mxu1 %v3836_v60  ;;  %v3878_v59 = vld [vmem:[#allocation7 + $0x22c] ss:$16 sps:$4 sm:$0xff]  }
 0x140   :  { %2458 = vmatpush1.bf16.msra.mxu0 %v3831_v61  ;;  %2540 = vmatpush1.bf16.msra.mxu1 %v3834_v62  ;;  %v3873_v61 = vld [vmem:[#allocation7 + $0x220] ss:$16 sps:$4 sm:$0xff]   ;;  %v3876_v62 = vld [vmem:[#allocation7 + $0x228] ss:$16 sps:$4 sm:$0xff]  }
 0x141   :  { %2459 = vmatprep.subr.bf16.mxu0 %v3839_v63  ;;  %2541 = vmatprep.subr.bf16.mxu1 %v3842_v0  ;;  %v3881_v63 = vld [vmem:[#allocation7 + $0x244] ss:$16 sps:$4 sm:$0xff]   ;;  %v3884_v0 = vld [vmem:[#allocation7 + $0x24c] ss:$16 sps:$4 sm:$0xff]  }
 0x144   :  { %2460 = vmatpush1.bf16.msra.mxu0 %v3837_v1  ;;  %2542 = vmatpush1.bf16.msra.mxu1 %v3840_v2  ;;  %v3879_v1 = vld [vmem:[#allocation7 + $0x240] ss:$16 sps:$4 sm:$0xff]   ;;  %v3882_v2 = vld [vmem:[#allocation7 + $0x248] ss:$16 sps:$4 sm:$0xff]  }
 0x145   :  { %2461 = vmatprep.subr.bf16.mxu0 %v3845_v3  ;;  %2543 = vmatprep.subr.bf16.mxu1 %v3848_v4  ;;  %v3887_v3 = vld [vmem:[#allocation7 + $0x264] ss:$16 sps:$4 sm:$0xff]   ;;  %v3890_v4 = vld [vmem:[#allocation7 + $0x26c] ss:$16 sps:$4 sm:$0xff]  }
 0x148   :  { %2462 = vmatpush1.bf16.msra.mxu0 %v3843_v5  ;;  %2544 = vmatpush1.bf16.msra.mxu1 %v3846_v6  ;;  %v3885_v5 = vld [vmem:[#allocation7 + $0x260] ss:$16 sps:$4 sm:$0xff]   ;;  %v3888_v6 = vld [vmem:[#allocation7 + $0x268] ss:$16 sps:$4 sm:$0xff]  }
 0x149   :  { %2463 = vmatprep.subr.bf16.mxu0 %v3851_v7  ;;  %2545 = vmatprep.subr.bf16.mxu1 %v3854_v8  ;;  %v3893_v7 = vld [vmem:[#allocation7 + $0x284] ss:$16 sps:$4 sm:$0xff]   ;;  %v3896_v8 = vld [vmem:[#allocation7 + $0x28c] ss:$16 sps:$4 sm:$0xff]  }
 0x14c   :  { %2464 = vmatpush1.bf16.msra.mxu0 %v3849_v9  ;;  %2546 = vmatpush1.bf16.msra.mxu1 %v3852_v10  ;;  %v3891_v9 = vld [vmem:[#allocation7 + $0x280] ss:$16 sps:$4 sm:$0xff]   ;;  %v3894_v10 = vld [vmem:[#allocation7 + $0x288] ss:$16 sps:$4 sm:$0xff]  }
 0x14d   :  { %2465 = vmatprep.subr.bf16.mxu0 %v3857_v11  ;;  %2547 = vmatprep.subr.bf16.mxu1 %v3860_v12  ;;  %v3899_v11 = vld [vmem:[#allocation7 + $0x2a4] ss:$16 sps:$4 sm:$0xff]   ;;  %v3902_v12 = vld [vmem:[#allocation7 + $0x2ac] ss:$16 sps:$4 sm:$0xff]  }
 0x150   :  { %2466 = vmatpush1.bf16.msra.mxu0 %v3855_v13  ;;  %2548 = vmatpush1.bf16.msra.mxu1 %v3858_v14  ;;  %v3897_v13 = vld [vmem:[#allocation7 + $0x2a0] ss:$16 sps:$4 sm:$0xff]   ;;  %v3900_v14 = vld [vmem:[#allocation7 + $0x2a8] ss:$16 sps:$4 sm:$0xff]  }
 0x151   :  { %2467 = vmatprep.subr.bf16.mxu0 %v3863_v15  ;;  %2549 = vmatprep.subr.bf16.mxu1 %v3866_v16  ;;  %v3905_v15 = vld [vmem:[#allocation7 + $0x2c4] ss:$16 sps:$4 sm:$0xff]   ;;  %v3908_v16 = vld [vmem:[#allocation7 + $0x2cc] ss:$16 sps:$4 sm:$0xff]  }
 0x154   :  { %2468 = vmatpush1.bf16.msra.mxu0 %v3861_v17  ;;  %2550 = vmatpush1.bf16.msra.mxu1 %v3864_v19  ;;  %v3903_v17 = vld [vmem:[#allocation7 + $0x2c0] ss:$16 sps:$4 sm:$0xff]   ;;  %v3906_v19 = vld [vmem:[#allocation7 + $0x2c8] ss:$16 sps:$4 sm:$0xff]  }
 0x155   :  { %2478 = vmatprep.subr.bf16.mxu0 %v3869_v20  ;;  %2560 = vmatprep.subr.bf16.mxu1 %v3872_v21  ;;  %v3911_v20 = vld [vmem:[#allocation7 + $0x2e4] ss:$16 sps:$4 sm:$0xff]   ;;  %v3914_v21 = vld [vmem:[#allocation7 + $0x2ec] ss:$16 sps:$4 sm:$0xff]  }
 0x1ea   :  { %v1432_v38 = vpop.f32.mrb[0].mxu0  ;;  %v4234_v39 = vpop.f32.mrb[0].mxu1 }
 0x1eb   :  { %v1603_v41 = vpack.c.bf16 %v1432_v38, %v1432_v38  ;;  %v1434_v42 = vpop.f32.mrb[1].mxu0  ;;  %v1598_v43 = vpop.f32.mrb[1].mxu1  ;;  %v3930_v38 = vld [vmem:[#allocation7 + $0x348] ss:$16 sps:$4 sm:$0xff]  }
 0x1ec   :  { %v1604_v45 = vpack.c.bf16 %v1434_v42, %v1434_v42  ;;  %v1606_v46 = vpack.c.bf16 %v1598_v43, %v1598_v43  ;;  %v1436_v47 = vpop.f32.mrb[2].mxu0  ;;  %v1600_v48 = vpop.f32.mrb[2].mxu1  ;;  %v3933_v42 = vld [vmem:[#allocation7 + $0x360] ss:$16 sps:$4 sm:$0xff]   ;;  %v3936_v43 = vld [vmem:[#allocation7 + $0x368] ss:$16 sps:$4 sm:$0xff]  }
 0x1ed   :  { %v1661_v49 = vadd.bf16 %v1639_v37, %v1603_v41  ;;  %v1437_v50 = vpop.f32.mrb[3].mxu0  ;;  %v1601_v51 = vpop.f32.mrb[3].mxu1  ;;  %v3927_v37 = vld [vmem:[#allocation7 + $0x340] ss:$16 sps:$4 sm:$0xff]   ;;  %v3938_v41 = vld [vmem:[#allocation7 + $0x36c] ss:$16 sps:$4 sm:$0xff]   ;;  %v1631_v48 = vcombine.high %v4227_v31, %v4227_v31  ;;  %v1605_v31 = vpack.c.bf16 %v4234_v39, %v4234_v39 }
 0x1ee   :  { %v1662_v52 = vadd.bf16 %v1646_v40, %v1604_v45  ;;  %v1664_v53 = vadd.bf16 %v1660_v44, %v1606_v46  ;;  %v3935_v40 = vld [vmem:[#allocation7 + $0x364] ss:$16 sps:$4 sm:$0xff]   ;;  %v3944_v45 = vld [vmem:[#allocation7 + $0x38c] ss:$16 sps:$4 sm:$0xff]   ;;  %v3939_v46 = vld [vmem:[#allocation7 + $0x380] ss:$16 sps:$4 sm:$0xff]  }
 0x1ef   :  { %v1665_v57 = vmax.bf16 %v4121_v18, %v1661_v49  ;;  %v3941_v44 = vld [vmem:[#allocation7 + $0x384] ss:$16 sps:$4 sm:$0xff]   ;;  %v3942_v47 = vld [vmem:[#allocation7 + $0x388] ss:$16 sps:$4 sm:$0xff]   ;;  %v3950_v50 = vld [vmem:[#allocation7 + $0x3ac] ss:$16 sps:$4 sm:$0xff]  }
 0x1f0   :  { %v1666_v54 = vmax.bf16 %v4121_v18, %v1662_v52  ;;  %v1668_v60 = vmax.bf16 %v4121_v18, %v1664_v53  ;;  %v3947_v49 = vld [vmem:[#allocation7 + $0x3a4] ss:$16 sps:$4 sm:$0xff]   ;;  %v3945_v51 = vld [vmem:[#allocation7 + $0x3a0] ss:$16 sps:$4 sm:$0xff]   ;;  %v3948_v52 = vld [vmem:[#allocation7 + $0x3a8] ss:$16 sps:$4 sm:$0xff]   ;;  %v1648_v53 = vpack.i.b16 %v1631_v48, %v1631_v48 }
 0x1f2   :  { %2469 = vmatprep.mubr.bf16.mxu0 %v1666_v54  ;;  %2551 = vmatprep.mubr.bf16.mxu1 %v1666_v54  ;;  %v3953_v54 = vld [vmem:[#allocation7 + $0x3c4] ss:$16 sps:$4 sm:$0xff]  }
 0x1f3   :  { %2470 = vmatmul.mubr.bf16.vlgmr.msra.gmra.mrb[4].mxu0 %v1665_v57  ;;  %2552 = vmatmul.mubr.bf16.vlgmr.msra.gmra.mrb[4].mxu1 %v1665_v57  ;;  %v3954_v57 = vld [vmem:[#allocation7 + $0x3c8] ss:$16 sps:$4 sm:$0xff]  }
 0x1f4   :  { %2479 = vmatpush1.bf16.msra.mxu0 %v3867_v55  ;;  %2561 = vmatpush1.bf16.msra.mxu1 %v3870_v56  ;;  %v3956_v55 = vld [vmem:[#allocation7 + $0x3cc] ss:$16 sps:$4 sm:$0xff]   ;;  %v3951_v56 = vld [vmem:[#allocation7 + $0x3c0] ss:$16 sps:$4 sm:$0xff]  }
 0x1f5   :  { %2510 = vmatprep.mubr.bf16.mxu0 %v1668_v60  ;;  %2592 = vmatprep.mubr.bf16.mxu1 %v1668_v60  ;;  %v3962_v60 = vld [vmem:[#allocation7 + $0x3ec] ss:$16 sps:$4 sm:$0xff]  }
 0x1f6   :  { %2480 = vmatprep.subr.bf16.mxu0 %v3875_v58  ;;  %2562 = vmatprep.subr.bf16.mxu1 %v3878_v59  ;;  %v1653_v58 = vrot.slane %v1648_v53, %v4231_v34  ;;  %v3959_v59 = vld [vmem:[#allocation7 + $0x3e4] ss:$16 sps:$4 sm:$0xff]  }
 0x1f8   :  { %2481 = vmatpush1.bf16.msra.mxu0 %v3873_v61  ;;  %2563 = vmatpush1.bf16.msra.mxu1 %v3876_v62  ;;  %v3957_v61 = vld [vmem:[#allocation7 + $0x3e0] ss:$16 sps:$4 sm:$0xff]   ;;  %v3960_v62 = vld [vmem:[#allocation7 + $0x3e8] ss:$16 sps:$4 sm:$0xff]  }
 0x1f9   :  { %2482 = vmatprep.subr.bf16.mxu0 %v3881_v63  ;;  %2564 = vmatprep.subr.bf16.mxu1 %v3884_v0  ;;  %v1663_v63 = vadd.bf16 %v1653_v58, %v1605_v31  ;;  %v3963_v0 = vld [vmem:[#allocation8 + $0x40] sm:$0xff]  }
 0x1fb   :  { %v1667_v39 = vmax.bf16 %v4121_v18, %v1663_v63 }
 0x1fc   :  { %2483 = vmatpush1.bf16.msra.mxu0 %v3879_v1  ;;  %2565 = vmatpush1.bf16.msra.mxu1 %v3882_v2  ;;  %v3964_v1 = vld [vmem:[#allocation8 + $0xc0] sm:$0xff]  }
 0x1fd   :  { %2484 = vmatprep.subr.bf16.mxu0 %v3887_v3  ;;  %2566 = vmatprep.subr.bf16.mxu1 %v3890_v4  ;;  %v3965_v2 = vld [vmem:[#allocation8] sm:$0xff]   ;;  %v3967_v4 = vld [vmem:[#allocation8 + $0x48] sm:$0xff]  }
 0x1fe   :  { %v3966_v3 = vld [vmem:[#allocation8 + $0x80] sm:$0xff]  }
 0x200   :  { %2485 = vmatpush1.bf16.msra.mxu0 %v3885_v5  ;;  %2567 = vmatpush1.bf16.msra.mxu1 %v3888_v6  ;;  %v3968_v5 = vld [vmem:[#allocation8 + $0xc8] sm:$0xff]  }
 0x201   :  { %2486 = vmatprep.subr.bf16.mxu0 %v3893_v7  ;;  %2568 = vmatprep.subr.bf16.mxu1 %v3896_v8  ;;  %v3969_v6 = vld [vmem:[#allocation8 + $0x8] sm:$0xff]   ;;  %v3971_v8 = vld [vmem:[#allocation8 + $0x50] sm:$0xff]  }
 0x202   :  { %v3970_v7 = vld [vmem:[#allocation8 + $0x88] sm:$0xff]  }
 0x204   :  { %2487 = vmatpush1.bf16.msra.mxu0 %v3891_v9  ;;  %2569 = vmatpush1.bf16.msra.mxu1 %v3894_v10  ;;  %v3972_v9 = vld [vmem:[#allocation8 + $0xd0] sm:$0xff]  }
 0x205   :  { %2488 = vmatprep.subr.bf16.mxu0 %v3899_v11  ;;  %2570 = vmatprep.subr.bf16.mxu1 %v3902_v12  ;;  %v3973_v10 = vld [vmem:[#allocation8 + $0x10] sm:$0xff]   ;;  %v3975_v12 = vld [vmem:[#allocation8 + $0x58] sm:$0xff]  }
 0x206   :  { %v3974_v11 = vld [vmem:[#allocation8 + $0x90] sm:$0xff]  }
 0x208   :  { %2489 = vmatpush1.bf16.msra.mxu0 %v3897_v13  ;;  %2571 = vmatpush1.bf16.msra.mxu1 %v3900_v14  ;;  %v3976_v13 = vld [vmem:[#allocation8 + $0xd8] sm:$0xff]  }
 0x209   :  { %2490 = vmatprep.subr.bf16.mxu0 %v3905_v15  ;;  %2572 = vmatprep.subr.bf16.mxu1 %v3908_v16  ;;  %v3977_v14 = vld [vmem:[#allocation8 + $0x18] sm:$0xff]   ;;  %v3979_v16 = vld [vmem:[#allocation8 + $0x60] sm:$0xff]  }
 0x20a   :  { %v3978_v15 = vld [vmem:[#allocation8 + $0x98] sm:$0xff]  }
 0x20c   :  { %2491 = vmatpush1.bf16.msra.mxu0 %v3903_v17  ;;  %2573 = vmatpush1.bf16.msra.mxu1 %v3906_v19  ;;  %v3980_v17 = vld [vmem:[#allocation8 + $0xe0] sm:$0xff]  }
 0x20d   :  { %2492 = vmatprep.subr.bf16.mxu0 %v3911_v20  ;;  %2574 = vmatprep.subr.bf16.mxu1 %v3914_v21  ;;  %v3981_v19 = vld [vmem:[#allocation8 + $0x20] sm:$0xff]   ;;  %v3983_v21 = vld [vmem:[#allocation8 + $0x68] sm:$0xff]  }
 0x20e   :  { %v3982_v20 = vld [vmem:[#allocation8 + $0xa0] sm:$0xff]  }
 0x210   :  { %2493 = vmatpush1.bf16.msra.mxu0 %v3909_v22  ;;  %2575 = vmatpush1.bf16.msra.mxu1 %v3912_v23  ;;  %v3984_v22 = vld [vmem:[#allocation8 + $0xe8] sm:$0xff]  }
 0x211   :  { %2494 = vmatprep.subr.bf16.mxu0 %v3917_v24  ;;  %2576 = vmatprep.subr.bf16.mxu1 %v3920_v25  ;;  %v3985_v23 = vld [vmem:[#allocation8 + $0x28] sm:$0xff]   ;;  %v3987_v25 = vld [vmem:[#allocation8 + $0x70] sm:$0xff]  }
 0x212   :  { %v3986_v24 = vld [vmem:[#allocation8 + $0xa8] sm:$0xff]  }
 0x214   :  { %2495 = vmatpush1.bf16.msra.mxu0 %v3915_v26  ;;  %2577 = vmatpush1.bf16.msra.mxu1 %v3918_v27  ;;  %v3988_v26 = vld [vmem:[#allocation8 + $0xf0] sm:$0xff]  }
 0x215   :  { %2496 = vmatprep.subr.bf16.mxu0 %v3923_v29  ;;  %2578 = vmatprep.subr.bf16.mxu1 %v3926_v30  ;;  %v3989_v27 = vld [vmem:[#allocation8 + $0x30] sm:$0xff]   ;;  %v3991_v30 = vld [vmem:[#allocation8 + $0x78] sm:$0xff]  }
 0x216   :  { %v3990_v29 = vld [vmem:[#allocation8 + $0xb0] sm:$0xff]  }
 0x218   :  { %2497 = vmatpush1.bf16.msra.mxu0 %v3921_v32  ;;  %2579 = vmatpush1.bf16.msra.mxu1 %v3924_v33  ;;  %v3992_v32 = vld [vmem:[#allocation8 + $0xf8] sm:$0xff]  }
 0x219   :  { %2498 = vmatprep.subr.bf16.mxu0 %v3929_v35  ;;  %2580 = vmatprep.subr.bf16.mxu1 %v3932_v36  ;;  %v3993_v33 = vld [vmem:[#allocation8 + $0x38] sm:$0xff]   ;;  %v3356_v36 = vld.sshfl [vmem:[%s4279_s4] sm:$0x33 pattern:$0x75316420] }
 0x21a   :  { %v3994_v35 = vld [vmem:[#allocation8 + $0xb8] sm:$0xff]  }
 0x21c   :  { %2499 = vmatpush1.bf16.msra.mxu0 %v3927_v37  ;;  %2581 = vmatpush1.bf16.msra.mxu1 %v3930_v38  ;;  %v2614_v37 = vcombine.high %v3356_v36, %v3356_v36  ;;  %v2621_v38 = vrot.slane %v3356_v36, %v4223_v28 }
 0x21d   :  { %2500 = vmatprep.subr.bf16.mxu0 %v3935_v40  ;;  %2582 = vmatprep.subr.bf16.mxu1 %v3938_v41 }
 0x21e   :  { %v2628_v40 = vrot.slane %v2614_v37, %v4223_v28  ;;  %v2629_v41 = vcombine.high %v2621_v38, %v2621_v38 }
 0x220   :  { %2501 = vmatpush1.bf16.msra.mxu0 %v3933_v42  ;;  %2583 = vmatpush1.bf16.msra.mxu1 %v3936_v43  ;;  %v2630_v42 = vcombine.high %v2628_v40, %v2628_v40  ;;  %v2632_v43 = vpack.i.b16 %v2621_v38, %v2621_v38 }
 0x221   :  { %2502 = vmatprep.subr.bf16.mxu0 %v3941_v44  ;;  %2584 = vmatprep.subr.bf16.mxu1 %v3944_v45  ;;  %v2646_v44 = vpack.i.b16 %v2629_v41, %v2629_v41  ;;  %v2639_v45 = vpack.i.b16 %v2628_v40, %v2628_v40 }
 0x223   :  { %v2651_v48 = vrot.slane %v2646_v44, %v4231_v34 }
 0x224   :  { %2503 = vmatpush1.bf16.msra.mxu0 %v3939_v46  ;;  %2585 = vmatpush1.bf16.msra.mxu1 %v3942_v47  ;;  %v2653_v46 = vpack.i.b16 %v2630_v42, %v2630_v42  ;;  %v2637_v47 = vrot.slane %v2632_v43, %v4231_v34 }
 0x225   :  { %2504 = vmatprep.subr.bf16.mxu0 %v3947_v49  ;;  %2586 = vmatprep.subr.bf16.mxu1 %v3950_v50 }
 0x228   :  { %2505 = vmatpush1.bf16.msra.mxu0 %v3945_v51  ;;  %2587 = vmatpush1.bf16.msra.mxu1 %v3948_v52  ;;  %v2644_v51 = vrot.slane %v2639_v45, %v4231_v34  ;;  %v2658_v52 = vrot.slane %v2653_v46, %v4231_v34 }
 0x229   :  { %2506 = vmatprep.subr.bf16.mxu0 %v3953_v54  ;;  %2588 = vmatprep.subr.bf16.mxu1 %v3956_v55 }
 0x22c   :  { %2507 = vmatpush1.bf16.msra.mxu0 %v3951_v56  ;;  %2589 = vmatpush1.bf16.msra.mxu1 %v3954_v57 }
 0x22d   :  { %2508 = vmatprep.subr.bf16.mxu0 %v3959_v59  ;;  %2590 = vmatprep.subr.bf16.mxu1 %v3962_v60 }
 0x230   :  { %2509 = vmatpush1.bf16.msra.mxu0 %v3957_v61  ;;  %2591 = vmatpush1.bf16.msra.mxu1 %v3960_v62 }
 0x231   :  { %3390 = vmatprep.subr.bf16.mxu0 %v3963_v0  ;;  %3412 = vmatprep.subr.bf16.mxu1 %v3964_v1 }
 0x233   :  { %2511 = vmatmul.mubr.bf16.vlgmr.msra.gmra.mrb[4].mxu0 %v1667_v39  ;;  %2593 = vmatmul.mubr.bf16.vlgmr.msra.gmra.mrb[4].mxu1 %v1667_v39 }
 0x234   :  { %3391 = vmatpush3.bf16.msra.mxu0 %v3965_v2  ;;  %3413 = vmatpush3.bf16.msra.mxu1 %v3966_v3 }
 0x235   :  { %3392 = vmatprep.subr.bf16.mxu0 %v3967_v4  ;;  %3414 = vmatprep.subr.bf16.mxu1 %v3968_v5  ;;  %v3357_v5 = vld [vmem:[%s4281_s6] ss:$0 sm:$0xff] }
 0x238   :  { %3393 = vmatpush3.bf16.msra.mxu0 %v3969_v6  ;;  %3415 = vmatpush3.bf16.msra.mxu1 %v3970_v7 }
 0x239   :  { %3394 = vmatprep.subr.bf16.mxu0 %v3971_v8  ;;  %3416 = vmatprep.subr.bf16.mxu1 %v3972_v9 }
 0x23c   :  { %3395 = vmatpush3.bf16.msra.mxu0 %v3973_v10  ;;  %3417 = vmatpush3.bf16.msra.mxu1 %v3974_v11 }
 0x23d   :  { %3396 = vmatprep.subr.bf16.mxu0 %v3975_v12  ;;  %3418 = vmatprep.subr.bf16.mxu1 %v3976_v13 }
 0x240   :  { %3397 = vmatpush3.bf16.msra.mxu0 %v3977_v14  ;;  %3419 = vmatpush3.bf16.msra.mxu1 %v3978_v15 }
 0x241   :  { %3398 = vmatprep.subr.bf16.mxu0 %v3979_v16  ;;  %3420 = vmatprep.subr.bf16.mxu1 %v3980_v17 }
 0x244   :  { %3399 = vmatpush3.bf16.msra.mxu0 %v3981_v19  ;;  %3421 = vmatpush3.bf16.msra.mxu1 %v3982_v20 }
 0x245   :  { %3400 = vmatprep.subr.bf16.mxu0 %v3983_v21  ;;  %3422 = vmatprep.subr.bf16.mxu1 %v3984_v22 }
 0x248   :  { %3401 = vmatpush3.bf16.msra.mxu0 %v3985_v23  ;;  %3423 = vmatpush3.bf16.msra.mxu1 %v3986_v24 }
 0x249   :  { %3402 = vmatprep.subr.bf16.mxu0 %v3987_v25  ;;  %3424 = vmatprep.subr.bf16.mxu1 %v3988_v26 }
 0x24c   :  { %3403 = vmatpush3.bf16.msra.mxu0 %v3989_v27  ;;  %3425 = vmatpush3.bf16.msra.mxu1 %v3990_v29 }
 0x24d   :  { %3404 = vmatprep.subr.bf16.mxu0 %v3991_v30  ;;  %3426 = vmatprep.subr.bf16.mxu1 %v3992_v32 }
 0x250   :  { %3405 = vmatpush3.bf16.msra.mxu0 %v3993_v33  ;;  %3427 = vmatpush3.bf16.msra.mxu1 %v3994_v35 }
 0x306   :  { %v2512_v49 = vpop.f32.mrb[4].mxu0  ;;  %v2594_v50 = vpop.f32.mrb[4].mxu1 }
 0x307   :  { %v2601_v53 = vpack.c.bf16 %v2512_v49, %v2512_v49  ;;  %v2603_v54 = vpack.c.bf16 %v2594_v50, %v2594_v50  ;;  %v2514_v55 = vpop.f32.mrb[5].mxu0  ;;  %v2596_v28 = vpop.f32.mrb[5].mxu1 }
 0x308   :  { %v2602_v56 = vpack.c.bf16 %v2514_v55, %v2514_v55  ;;  %v2604_v57 = vpack.c.bf16 %v2596_v28, %v2596_v28  ;;  %v2516_v31 = vpop.f32.mrb[6].mxu0  ;;  %v2598_v58 = vpop.f32.mrb[6].mxu1 }
 0x309   :  { %v2659_v59 = vadd.bf16 %v2637_v47, %v2601_v53  ;;  %v2661_v60 = vadd.bf16 %v2651_v48, %v2603_v54  ;;  %v2517_v61 = vpop.f32.mrb[7].mxu0  ;;  %v2599_v62 = vpop.f32.mrb[7].mxu1 }
 0x30a   :  { %v2660_v63 = vadd.bf16 %v2644_v51, %v2602_v56  ;;  %v2662_v0 = vadd.bf16 %v2658_v52, %v2604_v57 }
 0x30b   :  { %v2663_v34 = vmax.bf16 %v4121_v18, %v2659_v59  ;;  %v2665_v3 = vmax.bf16 %v4121_v18, %v2661_v60 }
 0x30c   :  { %v2664_v1 = vmax.bf16 %v4121_v18, %v2660_v63  ;;  %v2666_v2 = vmax.bf16 %v4121_v18, %v2662_v0 }
 0x30e   :  { %2962 = vmatprep.mubr.bf16.mxu0 %v2664_v1  ;;  %3002 = vmatprep.mubr.bf16.mxu1 %v2666_v2 }
 0x30f   :  { %2963 = vmatmul.mubr.bf16.vlgmr.msra.gmra.mrb[8].mxu0 %v2663_v34  ;;  %3003 = vmatmul.mubr.bf16.vlgmr.msra.gmra.mrb[8].mxu1 %v2665_v3 }
 0x3e2   :  { %v3406_v39 = vpop.f32.mrb[8].mxu0  ;;  %v3428_v4 = vpop.f32.mrb[8].mxu1 }
 0x3e3   :  { %v3407_v6 = vpop.f32.mrb[9].mxu0  ;;  %v3429_v7 = vpop.f32.mrb[9].mxu1 }
 0x3e4   :  { %v3408_v8 = vadd.f32 %v3407_v6, %v3406_v39  ;;  %v3430_v9 = vadd.f32 %v3429_v7, %v3428_v4  ;;  %v3409_v10 = vpop.f32.mrb[10].mxu0  ;;  %v3431_v11 = vpop.f32.mrb[10].mxu1 }
 0x3e5   :  { %v3410_v12 = vpop.f32.mrb[11].mxu0  ;;  %v3432_v13 = vpop.f32.mrb[11].mxu1 }
 0x3e6   :  { %v2965_v14 = vadd.f32 %v3408_v8, %v3357_v5 }
 0x3e8   :  { %v3005_v18 = vadd.f32 %v3430_v9, %v2965_v14 }
 0x3ea   :  { %v3010_v15 = vpack.c.bf16 %v3005_v18, %v3005_v18 }
 0x3ec   :  { %3011 = vst [vmem:[#allocation10] sm:$0xf] %v3010_v15 }
 0x3ed   :  { %4094 = shalt.err (!%p4091_p8)
}
 0x3ee   :  { %s4095_s10 = scalar_lea.hbm %s4282_s7, 64 }
 0x3ef   :  { %p4096_p9 = scmp.ne.s32.totalorder %s4282_s7, %s4095_s10  ;;  %p4099_p10 = scmp.lt.u32.totalorder %s4095_s10, %s4282_s7 }
 0x3f1   :  { %p4101_p11 = pnand %p4099_p10, %p4096_p9 }
 0x3f3   :  { %4104 = shalt.err (!%p4101_p11)
}
 0x3f4   :  { %3021 = dma.vmem_to_hbm [thread:$0]  %s3019_s30, 64, %s4282_s7, [#allocation4]  }
 0x3f5   :  { %4111 = dma.done.wait [#allocation4], 64  }
 0x3f6   :  { %4112 = vsyncadd [#allocation4], 4294967232 }
 0x3f7   :  { %3025 = vsyncpa [#allocation3], 1 }
 0x3f8   :  { %3026 = vsyncpa [#allocation6], 1 }
 0x3f9   :  { %3027 = vsyncpa [#allocation9], 1 }
 0x3fa   :  { %3028 = vsyncpa [#allocation4], 1 }

</bundles_post_ra>
